<compile_context>
chip_gen: v7x
topology: tpu7x:2x2x1
jax: 0.10.0
libtpu: 0.0.40
codegen_flags: <defaults>
</compile_context>

<pallas_src>
import functools

import jax
import jax.numpy as jnp
from jax.experimental import pallas as pl
from jax.experimental.pallas import tpu as pltpu


def _round_up(x, m):
    return ((x + m - 1) // m) * m


# ---------------------------------------------------------------------------
# Pallas kernels
# ---------------------------------------------------------------------------
def _matmul_bias_kernel(x_ref, w_ref, b_ref, o_ref, acc_ref, *, activation):
    @pl.when(pl.program_id(2) == 0)
    def _():
        acc_ref[...] = jnp.zeros_like(acc_ref)

    acc_ref[...] += jnp.dot(x_ref[...], w_ref[...],
                            preferred_element_type=jnp.float32)

    @pl.when(pl.program_id(2) == pl.num_programs(2) - 1)
    def _():
        acc = acc_ref[...] + b_ref[...]
        if activation == "relu":
            acc = jnp.maximum(acc, 0.0)
        o_ref[...] = acc.astype(o_ref.dtype)


def matmul_bias(x, w, b, activation="none", tm=256, tn=256, tk=256):
    """[M,K] @ [K,N] + b[N] (optional ReLU).  bf16 MXU operands, f32 accumulation.

    Tiled over a (M//tm, N//tn, K//tk) grid with a VMEM accumulator; all blocks
    are 8/128-aligned and the output is lane-dense (N padded to 128, sliced back).
    """
    M, K = x.shape
    Kw, N = w.shape
    assert K == Kw
    tm = min(tm, _round_up(M, 8))
    tn = min(tn, _round_up(N, 128))
    tk = min(tk, _round_up(K, 128))
    Mp, Kp, Np = _round_up(M, tm), _round_up(K, tk), _round_up(N, tn)

    xp = jnp.pad(x.astype(jnp.bfloat16), ((0, Mp - M), (0, Kp - K)))
    wp = jnp.pad(w.astype(jnp.bfloat16), ((0, Kp - K), (0, Np - N)))
    bp = jnp.pad(b.astype(jnp.float32).reshape(1, N), ((0, 0), (0, Np - N)))

    out = pl.pallas_call(
        functools.partial(_matmul_bias_kernel, activation=activation),
        out_shape=jax.ShapeDtypeStruct((Mp, Np), jnp.float32),
        grid=(Mp // tm, Np // tn, Kp // tk),
        in_specs=[
            pl.BlockSpec((tm, tk), lambda i, j, k: (i, k)),
            pl.BlockSpec((tk, tn), lambda i, j, k: (k, j)),
            pl.BlockSpec((1, tn), lambda i, j, k: (0, j)),
        ],
        out_specs=pl.BlockSpec((tm, tn), lambda i, j, k: (i, j)),
        scratch_shapes=[pltpu.VMEM((tm, tn), jnp.float32)],
        compiler_params=pltpu.CompilerParams(
            dimension_semantics=("parallel", "parallel", "arbitrary")),
    )(xp, wp, bp)
    return out[:M, :N]


def _lstm_seq_kernel(xg_ref, whh_ref, bhh_ref, h_out_ref, h_scr, c_scr, *, hp):
    """One timestep per grid step.  h/c persist in VMEM scratch across the grid;
    W_hh / b_hh stay resident in VMEM (constant block index).  Gate layout is
    gate-major with each gate padded to hp (=128) lanes, so every slice is an
    aligned 128-wide block.  PyTorch gate order (i, f, g, o)."""
    @pl.when(pl.program_id(0) == 0)
    def _():
        h_scr[...] = jnp.zeros_like(h_scr)
        c_scr[...] = jnp.zeros_like(c_scr)

    gates = (xg_ref[0]
             + jnp.dot(h_scr[...].astype(jnp.bfloat16), whh_ref[...],
                       preferred_element_type=jnp.float32)
             + bhh_ref[...])
    i = jax.nn.sigmoid(gates[:, 0 * hp:1 * hp])
    f = jax.nn.sigmoid(gates[:, 1 * hp:2 * hp])
    g = jnp.tanh(gates[:, 2 * hp:3 * hp])
    o = jax.nn.sigmoid(gates[:, 3 * hp:4 * hp])
    c_new = f * c_scr[...] + i * g
    h_new = o * jnp.tanh(c_new)
    c_scr[...] = c_new
    h_scr[...] = h_new
    h_out_ref[0] = h_new


def _mean_h_kernel(x_ref, o_ref, *, inv_h):
    o_ref[...] = jnp.sum(x_ref[...], axis=1) * inv_h


# ---------------------------------------------------------------------------
# Glue: NHWC im2col conv, maxpool, mean-over-H, LSTM drivers
# ---------------------------------------------------------------------------
def conv2d_nhwc(x, w_flat, b, *, kh, kw, stride=(1, 1), padding=(1, 1),
                activation="relu"):
    """x: [B,H,W,Cin] (NHWC); w_flat: [kh*kw*Cin, Cout] pre-transposed (HWIO-flattened)."""
    # TODO(synk): generate im2col patches inside the matmul kernel (shifted loads over
    # kh*kw) instead of materializing the patch matrix in HBM.
    B, H, W, Cin = x.shape
    sh, sw = stride
    ph, pw = padding
    xp = jnp.pad(x, ((0, 0), (ph, ph), (pw, pw), (0, 0)))
    Ho = (H + 2 * ph - kh) // sh + 1
    Wo = (W + 2 * pw - kw) // sw + 1
    cols = []
    for i in range(kh):
        for j in range(kw):
            cols.append(xp[:, i:i + sh * Ho:sh, j:j + sw * Wo:sw, :])
    patches = jnp.concatenate(cols, axis=-1).reshape(B * Ho * Wo, kh * kw * Cin)
    y = matmul_bias(patches, w_flat, b, activation=activation)
    return y.reshape(B, Ho, Wo, -1)


def maxpool2d_nhwc(x, kh, kw):
    # TODO(synk): fuse max-pooling as an epilogue of the preceding conv kernel tile.
    B, H, W, C = x.shape
    Ho, Wo = H // kh, W // kw            # floor-truncate like torch.nn.MaxPool2d
    x = x[:, :Ho * kh, :Wo * kw, :]
    x = x.reshape(B, Ho, kh, Wo, kw, C)
    return x.max(axis=(2, 4))


def mean_over_h(y_nhwc):
    """Torch: permute(0,3,1,2) -> AdaptiveAvgPool2d((None,1)) -> squeeze(3)
    == mean over the H axis.  [B,H,W,C] -> [B,W,C]."""
    B, H, W, C = y_nhwc.shape
    if H == 1:  # mean over a single row is a no-op: just drop the axis
        return y_nhwc.reshape(B, W, C)
    x = jnp.transpose(y_nhwc, (0, 2, 1, 3)).reshape(B * W, H, C)
    M = B * W
    Cp = _round_up(C, 128)
    tm = min(256, _round_up(M, 8))
    Mp = _round_up(M, tm)
    xp = jnp.pad(x, ((0, Mp - M), (0, 0), (0, Cp - C)))
    out = pl.pallas_call(
        functools.partial(_mean_h_kernel, inv_h=1.0 / H),
        out_shape=jax.ShapeDtypeStruct((Mp, Cp), jnp.float32),
        grid=(Mp // tm,),
        in_specs=[pl.BlockSpec((tm, H, Cp), lambda i: (i, 0, 0))],
        out_specs=pl.BlockSpec((tm, Cp), lambda i: (i, 0)),
        compiler_params=pltpu.CompilerParams(dimension_semantics=("parallel",)),
    )(xp)
    return out[:M, :C].reshape(B, W, C)


def lstm_direction(x_tbd, wih_t, bih, whh_t, bhh, hidden, reverse):
    """Whole-sequence LSTM for one direction.  x_tbd: [T, Bp, D] float32.
    Returns [T, Bp, hidden] float32."""
    T, Bp, D = x_tbd.shape
    Hp = whh_t.shape[0]
    if reverse:
        x_tbd = x_tbd[::-1]
    # Input projection for ALL timesteps in one tiled matmul (gate-major padded layout).
    xg = matmul_bias(x_tbd.reshape(T * Bp, D), wih_t, bih).reshape(T, Bp, 4 * Hp)
    hseq = pl.pallas_call(
        functools.partial(_lstm_seq_kernel, hp=Hp),
        out_shape=jax.ShapeDtypeStruct((T, Bp, Hp), jnp.float32),
        grid=(T,),
        in_specs=[
            pl.BlockSpec((1, Bp, 4 * Hp), lambda t: (t, 0, 0)),   # xg[t]
            pl.BlockSpec((Hp, 4 * Hp), lambda t: (0, 0)),         # W_hh (resident)
            pl.BlockSpec((1, 4 * Hp), lambda t: (0, 0)),          # b_hh (resident)
        ],
        out_specs=pl.BlockSpec((1, Bp, Hp), lambda t: (t, 0, 0)),
        scratch_shapes=[pltpu.VMEM((Bp, Hp), jnp.float32),        # h state
                        pltpu.VMEM((Bp, Hp), jnp.float32)],       # c state
        compiler_params=pltpu.CompilerParams(dimension_semantics=("arbitrary",)),
    )(xg, whh_t, bhh.reshape(1, 4 * Hp))
    hseq = hseq[:, :, :hidden]
    if reverse:
        hseq = hseq[::-1]
    return hseq


def bidirectional_lstm(x_tbd, p):
    hidden = p["wlin_t"].shape[0] // 2
    fwd = lstm_direction(x_tbd, p["wih_f_t"], p["bih_f"], p["whh_f_t"], p["bhh_f"],
                         hidden, reverse=False)
    bwd = lstm_direction(x_tbd, p["wih_b_t"], p["bih_b"], p["whh_b_t"], p["bhh_b"],
                         hidden, reverse=True)
    rec = jnp.concatenate([fwd, bwd], axis=-1)                 # [T, Bp, 2H]
    T, Bp, H2 = rec.shape
    out = matmul_bias(rec.reshape(T * Bp, H2), p["wlin_t"], p["b_lin"])
    return out.reshape(T, Bp, -1)


# ---------------------------------------------------------------------------
# OCR forward
# ---------------------------------------------------------------------------
def ocr_forward(params, x, text):  # `text` unused by the CTC-style Linear head
    p = params
    # torch input is NCHW; convert once to NHWC and stay NHWC through the whole stack.
    y = jnp.transpose(x, (0, 2, 3, 1)).astype(jnp.float32)
    # --- VGG_FeatureExtractor ---
    y = conv2d_nhwc(y, *p["c0"], kh=3, kw=3)
    y = maxpool2d_nhwc(y, 2, 2)
    y = conv2d_nhwc(y, *p["c1"], kh=3, kw=3)
    y = maxpool2d_nhwc(y, 2, 2)
    y = conv2d_nhwc(y, *p["c2"], kh=3, kw=3)
    y = conv2d_nhwc(y, *p["c3"], kh=3, kw=3)
    y = maxpool2d_nhwc(y, 2, 1)
    y = conv2d_nhwc(y, *p["c4"], kh=3, kw=3)                   # conv + folded BN + relu
    y = conv2d_nhwc(y, *p["c5"], kh=3, kw=3)
    y = maxpool2d_nhwc(y, 2, 1)
    y = conv2d_nhwc(y, *p["c6"], kh=2, kw=2, padding=(0, 0))
    # --- AdaptiveAvgPool2d((None,1)) after permute(0,3,1,2), squeeze(3) ---
    seq = mean_over_h(y)                                       # [B, T=W', C]
    # --- Sequence modeling (kept in [T, Bp, C] layout; batch padded to 8 sublanes) ---
    B, T, C = seq.shape
    Bp = _round_up(B, 8)
    seq = jnp.pad(jnp.transpose(seq, (1, 0, 2)), ((0, 0), (0, Bp - B), (0, 0)))
    seq = bidirectional_lstm(seq, p["lstm1"])
    seq = bidirectional_lstm(seq, p["lstm2"])
    # --- Prediction ---
    Hs = seq.shape[-1]
    pred = matmul_bias(seq.reshape(T * Bp, Hs), p["pred_w_t"], p["pred_b"])
    pred = pred.reshape(T, Bp, -1)[:, :B, :]
    return jnp.transpose(pred, (1, 0, 2))                      # [B, T, num_class]


# ---------------------------------------------------------------------------
# Parameter construction (torch layouts) + one-time kernel-layout preparation
# ---------------------------------------------------------------------------
def init_params(key, input_channel, output_channel, hidden_size, num_class):
    oc = [output_channel // 8, output_channel // 4, output_channel // 2, output_channel]
    keys = iter(jax.random.split(key, 64))

    def rnd(shape, scale=0.1):
        return scale * jax.random.normal(next(keys), shape, dtype=jnp.float32)

    def bn(c):
        return (
            jnp.ones((c,), jnp.float32) + rnd((c,)),                  # gamma
            rnd((c,)),                                                # beta
            rnd((c,)),                                                # running_mean
            jnp.ones((c,), jnp.float32) + 0.1 * jnp.abs(rnd((c,))),   # running_var
        )

    def lstm(din, H):
        return dict(
            w_ih_f=rnd((4 * H, din)), w_hh_f=rnd((4 * H, H)),
            b_ih_f=rnd((4 * H,)), b_hh_f=rnd((4 * H,)),
            w_ih_b=rnd((4 * H, din)), w_hh_b=rnd((4 * H, H)),
            b_ih_b=rnd((4 * H,)), b_hh_b=rnd((4 * H,)),
            w_lin=rnd((H, 2 * H)), b_lin=rnd((H,)),
        )

    return {
        "c0_w": rnd((oc[0], input_channel, 3, 3)), "c0_b": rnd((oc[0],)),
        "c1_w": rnd((oc[1], oc[0], 3, 3)), "c1_b": rnd((oc[1],)),
        "c2_w": rnd((oc[2], oc[1], 3, 3)), "c2_b": rnd((oc[2],)),
        "c3_w": rnd((oc[2], oc[2], 3, 3)), "c3_b": rnd((oc[2],)),
        "c4_w": rnd((oc[3], oc[2], 3, 3)), "bn4": bn(oc[3]),
        "c5_w": rnd((oc[3], oc[3], 3, 3)), "bn5": bn(oc[3]),
        "c6_w": rnd((oc[3], oc[3], 2, 2)), "c6_b": rnd((oc[3],)),
        "lstm1": lstm(oc[3], hidden_size),
        "lstm2": lstm(hidden_size, hidden_size),
        "pred_w": rnd((num_class, hidden_size)), "pred_b": rnd((num_class,)),
    }


def fold_bn(w, bn, eps=1e-5):
    """Fold eval-mode BatchNorm2d into the preceding bias-free conv."""
    gamma, beta, mean, var = bn
    scale = gamma / jnp.sqrt(var + eps)
    return w * scale[:, None, None, None], beta - mean * scale


def prepare_params(raw, hidden_size):
    """One-time conversion of torch-layout params into kernel-ready layouts:
    BN folding, HWIO-flattened bf16 conv weights, gate-major 128-padded bf16 LSTM
    weights (pre-transposed), pre-transposed bf16 linear heads."""
    H = hidden_size
    Hp = _round_up(H, 128)

    def conv_prep(w, b):
        co, ci, kh, kw = w.shape
        wf = jnp.transpose(w, (2, 3, 1, 0)).reshape(kh * kw * ci, co)
        return wf.astype(jnp.bfloat16), b.astype(jnp.float32)

    def gate_pad_cols(mat):          # [4H, X] -> [X, 4Hp]  (transposed, gate-major padded)
        X = mat.shape[1]
        out = jnp.zeros((X, 4 * Hp), jnp.float32)
        for k in range(4):
            out = out.at[:, k * Hp:k * Hp + H].set(mat[k * H:(k + 1) * H, :].T)
        return out

    def gate_pad_vec(v):             # [4H] -> [4Hp]
        out = jnp.zeros((4 * Hp,), jnp.float32)
        for k in range(4):
            out = out.at[k * Hp:k * Hp + H].set(v[k * H:(k + 1) * H])
        return out

    def lstm_prep(lp):
        return dict(
            wih_f_t=gate_pad_cols(lp["w_ih_f"]).astype(jnp.bfloat16),
            bih_f=gate_pad_vec(lp["b_ih_f"]),
            whh_f_t=jnp.pad(gate_pad_cols(lp["w_hh_f"]),
                            ((0, Hp - H), (0, 0))).astype(jnp.bfloat16),
            bhh_f=gate_pad_vec(lp["b_hh_f"]),
            wih_b_t=gate_pad_cols(lp["w_ih_b"]).astype(jnp.bfloat16),
            bih_b=gate_pad_vec(lp["b_ih_b"]),
            whh_b_t=jnp.pad(gate_pad_cols(lp["w_hh_b"]),
                            ((0, Hp - H), (0, 0))).astype(jnp.bfloat16),
            bhh_b=gate_pad_vec(lp["b_hh_b"]),
            wlin_t=lp["w_lin"].T.astype(jnp.bfloat16),
            b_lin=lp["b_lin"].astype(jnp.float32),
        )

    p = {
        "c0": conv_prep(raw["c0_w"], raw["c0_b"]),
        "c1": conv_prep(raw["c1_w"], raw["c1_b"]),
        "c2": conv_prep(raw["c2_w"], raw["c2_b"]),
        "c3": conv_prep(raw["c3_w"], raw["c3_b"]),
        "c4": conv_prep(*fold_bn(raw["c4_w"], raw["bn4"])),
        "c5": conv_prep(*fold_bn(raw["c5_w"], raw["bn5"])),
        "c6": conv_prep(raw["c6_w"], raw["c6_b"]),
        "lstm1": lstm_prep(raw["lstm1"]),
        "lstm2": lstm_prep(raw["lstm2"]),
        "pred_w_t": raw["pred_w"].T.astype(jnp.bfloat16),
        "pred_b": raw["pred_b"].astype(jnp.float32),
    }
    return p


if __name__ == "__main__":
    # Small config consistent with the module:
    #   input_channel=1, output_channel=32, hidden_size=32, character="0123456789" -> num_class=11
    # Input [B=2, C=1, H=64, W=32]: VGG reduces it to a [2, 3, 7, 32] NHWC feature map
    # (exercises the mean-over-H kernel), so the sequence length is T=7.
    input_channel, output_channel, hidden_size = 1, 32, 32
    num_class = len("0123456789") + 1

    key = jax.random.PRNGKey(0)
    kx, kp = jax.random.split(key)
    x = jax.random.normal(kx, (2, input_channel, 64, 32), dtype=jnp.float32)
    text = jnp.zeros((2, 5), dtype=jnp.int32)  # unused by forward (CTC head), kept for API parity

    raw = init_params(kp, input_channel, output_channel, hidden_size, num_class)
    params = prepare_params(raw, hidden_size)

    fwd = jax.jit(ocr_forward)
    pred = jax.block_until_ready(fwd(params, x, text))

    assert pred.shape == (2, 7, num_class), pred.shape
    assert bool(jnp.all(jnp.isfinite(pred)))
    print("KERNEL_OK")
</pallas_src>

<mosaic_0001>
module attributes {stable_mosaic.version = 11 : i64} {
  func.func @_matmul_bias_kernel(%arg0: i32, %arg1: i32, %arg2: i32, %arg3: memref<256x128xbf16, #tpu.memory_space<vmem>>, %arg4: memref<128x128xbf16, #tpu.memory_space<vmem>>, %arg5: memref<1x128xf32, #tpu.memory_space<vmem>>, %arg6: memref<256x128xf32, #tpu.memory_space<vmem>>, %arg7: memref<256x128xf32, #tpu.memory_space<vmem>>) attributes {dimension_semantics = [#tpu.dimension_semantics<parallel>, #tpu.dimension_semantics<parallel>, #tpu.dimension_semantics<arbitrary>], iteration_bounds = array<i64: 16, 1, 1>, scalar_prefetch = 0 : i64, scratch_operands = 1 : i64, tpu.core_type = #tpu.core_type<tc>, window_params = [{transform_indices = @transform_0, window_bounds = array<i64: 256, 128>}, {transform_indices = @transform_1, window_bounds = array<i64: 128, 128>}, {transform_indices = @transform_2, window_bounds = array<i64: 1, 128>}, {transform_indices = @transform_3, window_bounds = array<i64: 256, 128>}]} {
    %c0_i32 = arith.constant 0 : i32
    %0 = arith.cmpi eq, %arg2, %c0_i32 : i32
    %1 = arith.extui %0 : i1 to i32
    %c0_i32_0 = arith.constant 0 : i32
    %2 = arith.cmpi ne, %1, %c0_i32_0 : i32
    scf.if %2 {
      %cst_10 = arith.constant 0.000000e+00 : f32
      %12 = vector.broadcast %cst_10 : f32 to vector<256x128xf32>
      %c0_11 = arith.constant 0 : index
      %c0_12 = arith.constant 0 : index
      %13 = vector.load %arg7[%c0_11, %c0_12] : memref<256x128xf32, #tpu.memory_space<vmem>>, vector<256x128xf32>
      tpu.vector_store %arg7[%c0_11, %c0_12], %12 {strides = array<i32>} : memref<256x128xf32, #tpu.memory_space<vmem>>, vector<256x128xf32>,
    } else {
    }
    %c0 = arith.constant 0 : index
    %c0_1 = arith.constant 0 : index
    %3 = vector.load %arg7[%c0, %c0_1] : memref<256x128xf32, #tpu.memory_space<vmem>>, vector<256x128xf32>
    %c0_2 = arith.constant 0 : index
    %c0_3 = arith.constant 0 : index
    %4 = vector.load %arg3[%c0_2, %c0_3] : memref<256x128xbf16, #tpu.memory_space<vmem>>, vector<256x128xbf16>
    %c0_4 = arith.constant 0 : index
    %c0_5 = arith.constant 0 : index
    %5 = vector.load %arg4[%c0_4, %c0_5] : memref<128x128xbf16, #tpu.memory_space<vmem>>, vector<128x128xbf16>
    %cst = arith.constant dense<0.000000e+00> : vector<256x128xf32>
    %6 = tpu.matmul %4, %5, %cst {dimension_numbers = #tpu.dot_dimension_numbers<[1], [0], [0], [1], [0, 0, 1, 1], [], []>} : vector<256x128xbf16>, vector<128x128xbf16>, vector<256x128xf32> -> vector<256x128xf32>
    %7 = arith.addf %3, %6 : vector<256x128xf32>
    %c0_6 = arith.constant 0 : index
    %c0_7 = arith.constant 0 : index
    %8 = vector.load %arg7[%c0_6, %c0_7] : memref<256x128xf32, #tpu.memory_space<vmem>>, vector<256x128xf32>
    tpu.vector_store %arg7[%c0_6, %c0_7], %7 {strides = array<i32>} : memref<256x128xf32, #tpu.memory_space<vmem>>, vector<256x128xf32>,
    %c0_i32_8 = arith.constant 0 : i32
    %9 = arith.cmpi eq, %arg2, %c0_i32_8 : i32
    %10 = arith.extui %9 : i1 to i32
    %c0_i32_9 = arith.constant 0 : i32
    %11 = arith.cmpi ne, %10, %c0_i32_9 : i32
    scf.if %11 {
      %c0_10 = arith.constant 0 : index
      %c0_11 = arith.constant 0 : index
      %12 = vector.load %arg7[%c0_10, %c0_11] : memref<256x128xf32, #tpu.memory_space<vmem>>, vector<256x128xf32>
      %c0_12 = arith.constant 0 : index
      %c0_13 = arith.constant 0 : index
      %13 = vector.load %arg5[%c0_12, %c0_13] : memref<1x128xf32, #tpu.memory_space<vmem>>, vector<1x128xf32>
      %14 = vector.broadcast %13 : vector<1x128xf32> to vector<256x128xf32>
      %15 = arith.addf %12, %14 : vector<256x128xf32>
      %cst_14 = arith.constant 0.000000e+00 : f32
      %16 = vector.broadcast %cst_14 : f32 to vector<256x128xf32>
      %17 = arith.maximumf %15, %16 : vector<256x128xf32>
      %c0_15 = arith.constant 0 : index
      %c0_16 = arith.constant 0 : index
      %18 = vector.load %arg6[%c0_15, %c0_16] : memref<256x128xf32, #tpu.memory_space<vmem>>, vector<256x128xf32>
      tpu.vector_store %arg6[%c0_15, %c0_16], %17 {strides = array<i32>} : memref<256x128xf32, #tpu.memory_space<vmem>>, vector<256x128xf32>,
    } else {
    }
    return
  }
  func.func @transform_0(%arg0: i32, %arg1: i32, %arg2: i32) -> (i32, i32) {
    %c0_i32 = arith.constant 0 : i32
    return %arg0, %arg2 : i32, i32
  }
  func.func @transform_1(%arg0: i32, %arg1: i32, %arg2: i32) -> (i32, i32) {
    %c0_i32 = arith.constant 0 : i32
    return %arg2, %arg1 : i32, i32
  }
  func.func @transform_2(%arg0: i32, %arg1: i32, %arg2: i32) -> (i32, i32) {
    %c0_i32 = arith.constant 0 : i32
    %c0_i32_0 = arith.constant 0 : i32
    return %c0_i32, %arg1 : i32, i32
  }
  func.func @transform_3(%arg0: i32, %arg1: i32, %arg2: i32) -> (i32, i32) {
    %c0_i32 = arith.constant 0 : i32
    return %arg0, %arg1 : i32, i32
  }
}

module attributes {stable_mosaic.version = 11 : i64} {
  func.func @_matmul_bias_kernel(%arg0: i32, %arg1: i32, %arg2: i32, %arg3: memref<256x128xbf16, #tpu.memory_space<vmem>>, %arg4: memref<128x128xbf16, #tpu.memory_space<vmem>>, %arg5: memref<1x128xf32, #tpu.memory_space<vmem>>, %arg6: memref<256x128xf32, #tpu.memory_space<vmem>>, %arg7: memref<256x128xf32, #tpu.memory_space<vmem>>) attributes {dimension_semantics = [#tpu.dimension_semantics<parallel>, #tpu.dimension_semantics<parallel>, #tpu.dimension_semantics<arbitrary>], iteration_bounds = array<i64: 4, 1, 1>, scalar_prefetch = 0 : i64, scratch_operands = 1 : i64, tpu.core_type = #tpu.core_type<tc>, window_params = [{transform_indices = @transform_0, window_bounds = array<i64: 256, 128>}, {transform_indices = @transform_1, window_bounds = array<i64: 128, 128>}, {transform_indices = @transform_2, window_bounds = array<i64: 1, 128>}, {transform_indices = @transform_3, window_bounds = array<i64: 256, 128>}]} {
    %c0_i32 = arith.constant 0 : i32
    %0 = arith.cmpi eq, %arg2, %c0_i32 : i32
    %1 = arith.extui %0 : i1 to i32
    %c0_i32_0 = arith.constant 0 : i32
    %2 = arith.cmpi ne, %1, %c0_i32_0 : i32
    scf.if %2 {
      %cst_10 = arith.constant 0.000000e+00 : f32
      %12 = vector.broadcast %cst_10 : f32 to vector<256x128xf32>
      %c0_11 = arith.constant 0 : index
      %c0_12 = arith.constant 0 : index
      %13 = vector.load %arg7[%c0_11, %c0_12] : memref<256x128xf32, #tpu.memory_space<vmem>>, vector<256x128xf32>
      tpu.vector_store %arg7[%c0_11, %c0_12], %12 {strides = array<i32>} : memref<256x128xf32, #tpu.memory_space<vmem>>, vector<256x128xf32>,
    } else {
    }
    %c0 = arith.constant 0 : index
    %c0_1 = arith.constant 0 : index
    %3 = vector.load %arg7[%c0, %c0_1] : memref<256x128xf32, #tpu.memory_space<vmem>>, vector<256x128xf32>
    %c0_2 = arith.constant 0 : index
    %c0_3 = arith.constant 0 : index
    %4 = vector.load %arg3[%c0_2, %c0_3] : memref<256x128xbf16, #tpu.memory_space<vmem>>, vector<256x128xbf16>
    %c0_4 = arith.constant 0 : index
    %c0_5 = arith.constant 0 : index
    %5 = vector.load %arg4[%c0_4, %c0_5] : memref<128x128xbf16, #tpu.memory_space<vmem>>, vector<128x128xbf16>
    %cst = arith.constant dense<0.000000e+00> : vector<256x128xf32>
    %6 = tpu.matmul %4, %5, %cst {dimension_numbers = #tpu.dot_dimension_numbers<[1], [0], [0], [1], [0, 0, 1, 1], [], []>} : vector<256x128xbf16>, vector<128x128xbf16>, vector<256x128xf32> -> vector<256x128xf32>
    %7 = arith.addf %3, %6 : vector<256x128xf32>
    %c0_6 = arith.constant 0 : index
    %c0_7 = arith.constant 0 : index
    %8 = vector.load %arg7[%c0_6, %c0_7] : memref<256x128xf32, #tpu.memory_space<vmem>>, vector<256x128xf32>
    tpu.vector_store %arg7[%c0_6, %c0_7], %7 {strides = array<i32>} : memref<256x128xf32, #tpu.memory_space<vmem>>, vector<256x128xf32>,
    %c0_i32_8 = arith.constant 0 : i32
    %9 = arith.cmpi eq, %arg2, %c0_i32_8 : i32
    %10 = arith.extui %9 : i1 to i32
    %c0_i32_9 = arith.constant 0 : i32
    %11 = arith.cmpi ne, %10, %c0_i32_9 : i32
    scf.if %11 {
      %c0_10 = arith.constant 0 : index
      %c0_11 = arith.constant 0 : index
      %12 = vector.load %arg7[%c0_10, %c0_11] : memref<256x128xf32, #tpu.memory_space<vmem>>, vector<256x128xf32>
      %c0_12 = arith.constant 0 : index
      %c0_13 = arith.constant 0 : index
      %13 = vector.load %arg5[%c0_12, %c0_13] : memref<1x128xf32, #tpu.memory_space<vmem>>, vector<1x128xf32>
      %14 = vector.broadcast %13 : vector<1x128xf32> to vector<256x128xf32>
      %15 = arith.addf %12, %14 : vector<256x128xf32>
      %cst_14 = arith.constant 0.000000e+00 : f32
      %16 = vector.broadcast %cst_14 : f32 to vector<256x128xf32>
      %17 = arith.maximumf %15, %16 : vector<256x128xf32>
      %c0_15 = arith.constant 0 : index
      %c0_16 = arith.constant 0 : index
      %18 = vector.load %arg6[%c0_15, %c0_16] : memref<256x128xf32, #tpu.memory_space<vmem>>, vector<256x128xf32>
      tpu.vector_store %arg6[%c0_15, %c0_16], %17 {strides = array<i32>} : memref<256x128xf32, #tpu.memory_space<vmem>>, vector<256x128xf32>,
    } else {
    }
    return
  }
  func.func @transform_0(%arg0: i32, %arg1: i32, %arg2: i32) -> (i32, i32) {
    %c0_i32 = arith.constant 0 : i32
    return %arg0, %arg2 : i32, i32
  }
  func.func @transform_1(%arg0: i32, %arg1: i32, %arg2: i32) -> (i32, i32) {
    %c0_i32 = arith.constant 0 : i32
    return %arg2, %arg1 : i32, i32
  }
  func.func @transform_2(%arg0: i32, %arg1: i32, %arg2: i32) -> (i32, i32) {
    %c0_i32 = arith.constant 0 : i32
    %c0_i32_0 = arith.constant 0 : i32
    return %c0_i32, %arg1 : i32, i32
  }
  func.func @transform_3(%arg0: i32, %arg1: i32, %arg2: i32) -> (i32, i32) {
    %c0_i32 = arith.constant 0 : i32
    return %arg0, %arg1 : i32, i32
  }
}

module attributes {stable_mosaic.version = 11 : i64} {
  func.func @_matmul_bias_kernel(%arg0: i32, %arg1: i32, %arg2: i32, %arg3: memref<256x128xbf16, #tpu.memory_space<vmem>>, %arg4: memref<128x128xbf16, #tpu.memory_space<vmem>>, %arg5: memref<1x128xf32, #tpu.memory_space<vmem>>, %arg6: memref<256x128xf32, #tpu.memory_space<vmem>>, %arg7: memref<256x128xf32, #tpu.memory_space<vmem>>) attributes {dimension_semantics = [#tpu.dimension_semantics<parallel>, #tpu.dimension_semantics<parallel>, #tpu.dimension_semantics<arbitrary>], iteration_bounds = array<i64: 1, 1, 1>, scalar_prefetch = 0 : i64, scratch_operands = 1 : i64, tpu.core_type = #tpu.core_type<tc>, window_params = [{transform_indices = @transform_0, window_bounds = array<i64: 256, 128>}, {transform_indices = @transform_1, window_bounds = array<i64: 128, 128>}, {transform_indices = @transform_2, window_bounds = array<i64: 1, 128>}, {transform_indices = @transform_3, window_bounds = array<i64: 256, 128>}]} {
    %c0_i32 = arith.constant 0 : i32
    %0 = arith.cmpi eq, %arg2, %c0_i32 : i32
    %1 = arith.extui %0 : i1 to i32
    %c0_i32_0 = arith.constant 0 : i32
    %2 = arith.cmpi ne, %1, %c0_i32_0 : i32
    scf.if %2 {
      %cst_10 = arith.constant 0.000000e+00 : f32
      %12 = vector.broadcast %cst_10 : f32 to vector<256x128xf32>
      %c0_11 = arith.constant 0 : index
      %c0_12 = arith.constant 0 : index
      %13 = vector.load %arg7[%c0_11, %c0_12] : memref<256x128xf32, #tpu.memory_space<vmem>>, vector<256x128xf32>
      tpu.vector_store %arg7[%c0_11, %c0_12], %12 {strides = array<i32>} : memref<256x128xf32, #tpu.memory_space<vmem>>, vector<256x128xf32>,
    } else {
    }
    %c0 = arith.constant 0 : index
    %c0_1 = arith.constant 0 : index
    %3 = vector.load %arg7[%c0, %c0_1] : memref<256x128xf32, #tpu.memory_space<vmem>>, vector<256x128xf32>
    %c0_2 = arith.constant 0 : index
    %c0_3 = arith.constant 0 : index
    %4 = vector.load %arg3[%c0_2, %c0_3] : memref<256x128xbf16, #tpu.memory_space<vmem>>, vector<256x128xbf16>
    %c0_4 = arith.constant 0 : index
    %c0_5 = arith.constant 0 : index
    %5 = vector.load %arg4[%c0_4, %c0_5] : memref<128x128xbf16, #tpu.memory_space<vmem>>, vector<128x128xbf16>
    %cst = arith.constant dense<0.000000e+00> : vector<256x128xf32>
    %6 = tpu.matmul %4, %5, %cst {dimension_numbers = #tpu.dot_dimension_numbers<[1], [0], [0], [1], [0, 0, 1, 1], [], []>} : vector<256x128xbf16>, vector<128x128xbf16>, vector<256x128xf32> -> vector<256x128xf32>
    %7 = arith.addf %3, %6 : vector<256x128xf32>
    %c0_6 = arith.constant 0 : index
    %c0_7 = arith.constant 0 : index
    %8 = vector.load %arg7[%c0_6, %c0_7] : memref<256x128xf32, #tpu.memory_space<vmem>>, vector<256x128xf32>
    tpu.vector_store %arg7[%c0_6, %c0_7], %7 {strides = array<i32>} : memref<256x128xf32, #tpu.memory_space<vmem>>, vector<256x128xf32>,
    %c0_i32_8 = arith.constant 0 : i32
    %9 = arith.cmpi eq, %arg2, %c0_i32_8 : i32
    %10 = arith.extui %9 : i1 to i32
    %c0_i32_9 = arith.constant 0 : i32
    %11 = arith.cmpi ne, %10, %c0_i32_9 : i32
    scf.if %11 {
      %c0_10 = arith.constant 0 : index
      %c0_11 = arith.constant 0 : index
      %12 = vector.load %arg7[%c0_10, %c0_11] : memref<256x128xf32, #tpu.memory_space<vmem>>, vector<256x128xf32>
      %c0_12 = arith.constant 0 : index
      %c0_13 = arith.constant 0 : index
      %13 = vector.load %arg5[%c0_12, %c0_13] : memref<1x128xf32, #tpu.memory_space<vmem>>, vector<1x128xf32>
      %14 = vector.broadcast %13 : vector<1x128xf32> to vector<256x128xf32>
      %15 = arith.addf %12, %14 : vector<256x128xf32>
      %cst_14 = arith.constant 0.000000e+00 : f32
      %16 = vector.broadcast %cst_14 : f32 to vector<256x128xf32>
      %17 = arith.maximumf %15, %16 : vector<256x128xf32>
      %c0_15 = arith.constant 0 : index
      %c0_16 = arith.constant 0 : index
      %18 = vector.load %arg6[%c0_15, %c0_16] : memref<256x128xf32, #tpu.memory_space<vmem>>, vector<256x128xf32>
      tpu.vector_store %arg6[%c0_15, %c0_16], %17 {strides = array<i32>} : memref<256x128xf32, #tpu.memory_space<vmem>>, vector<256x128xf32>,
    } else {
    }
    return
  }
  func.func @transform_0(%arg0: i32, %arg1: i32, %arg2: i32) -> (i32, i32) {
    %c0_i32 = arith.constant 0 : i32
    return %arg0, %arg2 : i32, i32
  }
  func.func @transform_1(%arg0: i32, %arg1: i32, %arg2: i32) -> (i32, i32) {
    %c0_i32 = arith.constant 0 : i32
    return %arg2, %arg1 : i32, i32
  }
  func.func @transform_2(%arg0: i32, %arg1: i32, %arg2: i32) -> (i32, i32) {
    %c0_i32 = arith.constant 0 : i32
    %c0_i32_0 = arith.constant 0 : i32
    return %c0_i32, %arg1 : i32, i32
  }
  func.func @transform_3(%arg0: i32, %arg1: i32, %arg2: i32) -> (i32, i32) {
    %c0_i32 = arith.constant 0 : i32
    return %arg0, %arg1 : i32, i32
  }
}

module attributes {stable_mosaic.version = 11 : i64} {
  func.func @_matmul_bias_kernel(%arg0: i32, %arg1: i32, %arg2: i32, %arg3: memref<256x256xbf16, #tpu.memory_space<vmem>>, %arg4: memref<256x128xbf16, #tpu.memory_space<vmem>>, %arg5: memref<1x128xf32, #tpu.memory_space<vmem>>, %arg6: memref<256x128xf32, #tpu.memory_space<vmem>>, %arg7: memref<256x128xf32, #tpu.memory_space<vmem>>) attributes {dimension_semantics = [#tpu.dimension_semantics<parallel>, #tpu.dimension_semantics<parallel>, #tpu.dimension_semantics<arbitrary>], iteration_bounds = array<i64: 1, 1, 1>, scalar_prefetch = 0 : i64, scratch_operands = 1 : i64, tpu.core_type = #tpu.core_type<tc>, window_params = [{transform_indices = @transform_0, window_bounds = array<i64: 256, 256>}, {transform_indices = @transform_1, window_bounds = array<i64: 256, 128>}, {transform_indices = @transform_2, window_bounds = array<i64: 1, 128>}, {transform_indices = @transform_3, window_bounds = array<i64: 256, 128>}]} {
    %c0_i32 = arith.constant 0 : i32
    %0 = arith.cmpi eq, %arg2, %c0_i32 : i32
    %1 = arith.extui %0 : i1 to i32
    %c0_i32_0 = arith.constant 0 : i32
    %2 = arith.cmpi ne, %1, %c0_i32_0 : i32
    scf.if %2 {
      %cst_10 = arith.constant 0.000000e+00 : f32
      %12 = vector.broadcast %cst_10 : f32 to vector<256x128xf32>
      %c0_11 = arith.constant 0 : index
      %c0_12 = arith.constant 0 : index
      %13 = vector.load %arg7[%c0_11, %c0_12] : memref<256x128xf32, #tpu.memory_space<vmem>>, vector<256x128xf32>
      tpu.vector_store %arg7[%c0_11, %c0_12], %12 {strides = array<i32>} : memref<256x128xf32, #tpu.memory_space<vmem>>, vector<256x128xf32>,
    } else {
    }
    %c0 = arith.constant 0 : index
    %c0_1 = arith.constant 0 : index
    %3 = vector.load %arg7[%c0, %c0_1] : memref<256x128xf32, #tpu.memory_space<vmem>>, vector<256x128xf32>
    %c0_2 = arith.constant 0 : index
    %c0_3 = arith.constant 0 : index
    %4 = vector.load %arg3[%c0_2, %c0_3] : memref<256x256xbf16, #tpu.memory_space<vmem>>, vector<256x256xbf16>
    %c0_4 = arith.constant 0 : index
    %c0_5 = arith.constant 0 : index
    %5 = vector.load %arg4[%c0_4, %c0_5] : memref<256x128xbf16, #tpu.memory_space<vmem>>, vector<256x128xbf16>
    %cst = arith.constant dense<0.000000e+00> : vector<256x128xf32>
    %6 = tpu.matmul %4, %5, %cst {dimension_numbers = #tpu.dot_dimension_numbers<[1], [0], [0], [1], [0, 0, 1, 1], [], []>} : vector<256x256xbf16>, vector<256x128xbf16>, vector<256x128xf32> -> vector<256x128xf32>
    %7 = arith.addf %3, %6 : vector<256x128xf32>
    %c0_6 = arith.constant 0 : index
    %c0_7 = arith.constant 0 : index
    %8 = vector.load %arg7[%c0_6, %c0_7] : memref<256x128xf32, #tpu.memory_space<vmem>>, vector<256x128xf32>
    tpu.vector_store %arg7[%c0_6, %c0_7], %7 {strides = array<i32>} : memref<256x128xf32, #tpu.memory_space<vmem>>, vector<256x128xf32>,
    %c0_i32_8 = arith.constant 0 : i32
    %9 = arith.cmpi eq, %arg2, %c0_i32_8 : i32
    %10 = arith.extui %9 : i1 to i32
    %c0_i32_9 = arith.constant 0 : i32
    %11 = arith.cmpi ne, %10, %c0_i32_9 : i32
    scf.if %11 {
      %c0_10 = arith.constant 0 : index
      %c0_11 = arith.constant 0 : index
      %12 = vector.load %arg7[%c0_10, %c0_11] : memref<256x128xf32, #tpu.memory_space<vmem>>, vector<256x128xf32>
      %c0_12 = arith.constant 0 : index
      %c0_13 = arith.constant 0 : index
      %13 = vector.load %arg5[%c0_12, %c0_13] : memref<1x128xf32, #tpu.memory_space<vmem>>, vector<1x128xf32>
      %14 = vector.broadcast %13 : vector<1x128xf32> to vector<256x128xf32>
      %15 = arith.addf %12, %14 : vector<256x128xf32>
      %cst_14 = arith.constant 0.000000e+00 : f32
      %16 = vector.broadcast %cst_14 : f32 to vector<256x128xf32>
      %17 = arith.maximumf %15, %16 : vector<256x128xf32>
      %c0_15 = arith.constant 0 : index
      %c0_16 = arith.constant 0 : index
      %18 = vector.load %arg6[%c0_15, %c0_16] : memref<256x128xf32, #tpu.memory_space<vmem>>, vector<256x128xf32>
      tpu.vector_store %arg6[%c0_15, %c0_16], %17 {strides = array<i32>} : memref<256x128xf32, #tpu.memory_space<vmem>>, vector<256x128xf32>,
    } else {
    }
    return
  }
  func.func @transform_0(%arg0: i32, %arg1: i32, %arg2: i32) -> (i32, i32) {
    %c0_i32 = arith.constant 0 : i32
    return %arg0, %arg2 : i32, i32
  }
  func.func @transform_1(%arg0: i32, %arg1: i32, %arg2: i32) -> (i32, i32) {
    %c0_i32 = arith.constant 0 : i32
    return %arg2, %arg1 : i32, i32
  }
  func.func @transform_2(%arg0: i32, %arg1: i32, %arg2: i32) -> (i32, i32) {
    %c0_i32 = arith.constant 0 : i32
    %c0_i32_0 = arith.constant 0 : i32
    return %c0_i32, %arg1 : i32, i32
  }
  func.func @transform_3(%arg0: i32, %arg1: i32, %arg2: i32) -> (i32, i32) {
    %c0_i32 = arith.constant 0 : i32
    return %arg0, %arg1 : i32, i32
  }
}

module attributes {stable_mosaic.version = 11 : i64} {
  func.func @_matmul_bias_kernel(%arg0: i32, %arg1: i32, %arg2: i32, %arg3: memref<128x256xbf16, #tpu.memory_space<vmem>>, %arg4: memref<256x128xbf16, #tpu.memory_space<vmem>>, %arg5: memref<1x128xf32, #tpu.memory_space<vmem>>, %arg6: memref<128x128xf32, #tpu.memory_space<vmem>>, %arg7: memref<128x128xf32, #tpu.memory_space<vmem>>) attributes {dimension_semantics = [#tpu.dimension_semantics<parallel>, #tpu.dimension_semantics<parallel>, #tpu.dimension_semantics<arbitrary>], iteration_bounds = array<i64: 1, 1, 1>, scalar_prefetch = 0 : i64, scratch_operands = 1 : i64, tpu.core_type = #tpu.core_type<tc>, window_params = [{transform_indices = @transform_0, window_bounds = array<i64: 128, 256>}, {transform_indices = @transform_1, window_bounds = array<i64: 256, 128>}, {transform_indices = @transform_2, window_bounds = array<i64: 1, 128>}, {transform_indices = @transform_3, window_bounds = array<i64: 128, 128>}]} {
    %c0_i32 = arith.constant 0 : i32
    %0 = arith.cmpi eq, %arg2, %c0_i32 : i32
    %1 = arith.extui %0 : i1 to i32
    %c0_i32_0 = arith.constant 0 : i32
    %2 = arith.cmpi ne, %1, %c0_i32_0 : i32
    scf.if %2 {
      %cst_10 = arith.constant 0.000000e+00 : f32
      %12 = vector.broadcast %cst_10 : f32 to vector<128x128xf32>
      %c0_11 = arith.constant 0 : index
      %c0_12 = arith.constant 0 : index
      %13 = vector.load %arg7[%c0_11, %c0_12] : memref<128x128xf32, #tpu.memory_space<vmem>>, vector<128x128xf32>
      tpu.vector_store %arg7[%c0_11, %c0_12], %12 {strides = array<i32>} : memref<128x128xf32, #tpu.memory_space<vmem>>, vector<128x128xf32>,
    } else {
    }
    %c0 = arith.constant 0 : index
    %c0_1 = arith.constant 0 : index
    %3 = vector.load %arg7[%c0, %c0_1] : memref<128x128xf32, #tpu.memory_space<vmem>>, vector<128x128xf32>
    %c0_2 = arith.constant 0 : index
    %c0_3 = arith.constant 0 : index
    %4 = vector.load %arg3[%c0_2, %c0_3] : memref<128x256xbf16, #tpu.memory_space<vmem>>, vector<128x256xbf16>
    %c0_4 = arith.constant 0 : index
    %c0_5 = arith.constant 0 : index
    %5 = vector.load %arg4[%c0_4, %c0_5] : memref<256x128xbf16, #tpu.memory_space<vmem>>, vector<256x128xbf16>
    %cst = arith.constant dense<0.000000e+00> : vector<128x128xf32>
    %6 = tpu.matmul %4, %5, %cst {dimension_numbers = #tpu.dot_dimension_numbers<[1], [0], [0], [1], [0, 0, 1, 1], [], []>} : vector<128x256xbf16>, vector<256x128xbf16>, vector<128x128xf32> -> vector<128x128xf32>
    %7 = arith.addf %3, %6 : vector<128x128xf32>
    %c0_6 = arith.constant 0 : index
    %c0_7 = arith.constant 0 : index
    %8 = vector.load %arg7[%c0_6, %c0_7] : memref<128x128xf32, #tpu.memory_space<vmem>>, vector<128x128xf32>
    tpu.vector_store %arg7[%c0_6, %c0_7], %7 {strides = array<i32>} : memref<128x128xf32, #tpu.memory_space<vmem>>, vector<128x128xf32>,
    %c0_i32_8 = arith.constant 0 : i32
    %9 = arith.cmpi eq, %arg2, %c0_i32_8 : i32
    %10 = arith.extui %9 : i1 to i32
    %c0_i32_9 = arith.constant 0 : i32
    %11 = arith.cmpi ne, %10, %c0_i32_9 : i32
    scf.if %11 {
      %c0_10 = arith.constant 0 : index
      %c0_11 = arith.constant 0 : index
      %12 = vector.load %arg7[%c0_10, %c0_11] : memref<128x128xf32, #tpu.memory_space<vmem>>, vector<128x128xf32>
      %c0_12 = arith.constant 0 : index
      %c0_13 = arith.constant 0 : index
      %13 = vector.load %arg5[%c0_12, %c0_13] : memref<1x128xf32, #tpu.memory_space<vmem>>, vector<1x128xf32>
      %14 = vector.broadcast %13 : vector<1x128xf32> to vector<128x128xf32>
      %15 = arith.addf %12, %14 : vector<128x128xf32>
      %cst_14 = arith.constant 0.000000e+00 : f32
      %16 = vector.broadcast %cst_14 : f32 to vector<128x128xf32>
      %17 = arith.maximumf %15, %16 : vector<128x128xf32>
      %c0_15 = arith.constant 0 : index
      %c0_16 = arith.constant 0 : index
      %18 = vector.load %arg6[%c0_15, %c0_16] : memref<128x128xf32, #tpu.memory_space<vmem>>, vector<128x128xf32>
      tpu.vector_store %arg6[%c0_15, %c0_16], %17 {strides = array<i32>} : memref<128x128xf32, #tpu.memory_space<vmem>>, vector<128x128xf32>,
    } else {
    }
    return
  }
  func.func @transform_0(%arg0: i32, %arg1: i32, %arg2: i32) -> (i32, i32) {
    %c0_i32 = arith.constant 0 : i32
    return %arg0, %arg2 : i32, i32
  }
  func.func @transform_1(%arg0: i32, %arg1: i32, %arg2: i32) -> (i32, i32) {
    %c0_i32 = arith.constant 0 : i32
    return %arg2, %arg1 : i32, i32
  }
  func.func @transform_2(%arg0: i32, %arg1: i32, %arg2: i32) -> (i32, i32) {
    %c0_i32 = arith.constant 0 : i32
    %c0_i32_0 = arith.constant 0 : i32
    return %c0_i32, %arg1 : i32, i32
  }
  func.func @transform_3(%arg0: i32, %arg1: i32, %arg2: i32) -> (i32, i32) {
    %c0_i32 = arith.constant 0 : i32
    return %arg0, %arg1 : i32, i32
  }
}

module attributes {stable_mosaic.version = 11 : i64} {
  func.func @_matmul_bias_kernel(%arg0: i32, %arg1: i32, %arg2: i32, %arg3: memref<128x256xbf16, #tpu.memory_space<vmem>>, %arg4: memref<256x128xbf16, #tpu.memory_space<vmem>>, %arg5: memref<1x128xf32, #tpu.memory_space<vmem>>, %arg6: memref<128x128xf32, #tpu.memory_space<vmem>>, %arg7: memref<128x128xf32, #tpu.memory_space<vmem>>) attributes {dimension_semantics = [#tpu.dimension_semantics<parallel>, #tpu.dimension_semantics<parallel>, #tpu.dimension_semantics<arbitrary>], iteration_bounds = array<i64: 1, 1, 2>, scalar_prefetch = 0 : i64, scratch_operands = 1 : i64, tpu.core_type = #tpu.core_type<tc>, window_params = [{transform_indices = @transform_0, window_bounds = array<i64: 128, 256>}, {transform_indices = @transform_1, window_bounds = array<i64: 256, 128>}, {transform_indices = @transform_2, window_bounds = array<i64: 1, 128>}, {transform_indices = @transform_3, window_bounds = array<i64: 128, 128>}]} {
    %c0_i32 = arith.constant 0 : i32
    %0 = arith.cmpi eq, %arg2, %c0_i32 : i32
    %1 = arith.extui %0 : i1 to i32
    %c0_i32_0 = arith.constant 0 : i32
    %2 = arith.cmpi ne, %1, %c0_i32_0 : i32
    scf.if %2 {
      %cst_9 = arith.constant 0.000000e+00 : f32
      %12 = vector.broadcast %cst_9 : f32 to vector<128x128xf32>
      %c0_10 = arith.constant 0 : index
      %c0_11 = arith.constant 0 : index
      %13 = vector.load %arg7[%c0_10, %c0_11] : memref<128x128xf32, #tpu.memory_space<vmem>>, vector<128x128xf32>
      tpu.vector_store %arg7[%c0_10, %c0_11], %12 {strides = array<i32>} : memref<128x128xf32, #tpu.memory_space<vmem>>, vector<128x128xf32>,
    } else {
    }
    %c0 = arith.constant 0 : index
    %c0_1 = arith.constant 0 : index
    %3 = vector.load %arg7[%c0, %c0_1] : memref<128x128xf32, #tpu.memory_space<vmem>>, vector<128x128xf32>
    %c0_2 = arith.constant 0 : index
    %c0_3 = arith.constant 0 : index
    %4 = vector.load %arg3[%c0_2, %c0_3] : memref<128x256xbf16, #tpu.memory_space<vmem>>, vector<128x256xbf16>
    %c0_4 = arith.constant 0 : index
    %c0_5 = arith.constant 0 : index
    %5 = vector.load %arg4[%c0_4, %c0_5] : memref<256x128xbf16, #tpu.memory_space<vmem>>, vector<256x128xbf16>
    %cst = arith.constant dense<0.000000e+00> : vector<128x128xf32>
    %6 = tpu.matmul %4, %5, %cst {dimension_numbers = #tpu.dot_dimension_numbers<[1], [0], [0], [1], [0, 0, 1, 1], [], []>} : vector<128x256xbf16>, vector<256x128xbf16>, vector<128x128xf32> -> vector<128x128xf32>
    %7 = arith.addf %3, %6 : vector<128x128xf32>
    %c0_6 = arith.constant 0 : index
    %c0_7 = arith.constant 0 : index
    %8 = vector.load %arg7[%c0_6, %c0_7] : memref<128x128xf32, #tpu.memory_space<vmem>>, vector<128x128xf32>
    tpu.vector_store %arg7[%c0_6, %c0_7], %7 {strides = array<i32>} : memref<128x128xf32, #tpu.memory_space<vmem>>, vector<128x128xf32>,
    %c1_i32 = arith.constant 1 : i32
    %9 = arith.cmpi eq, %arg2, %c1_i32 : i32
    %10 = arith.extui %9 : i1 to i32
    %c0_i32_8 = arith.constant 0 : i32
    %11 = arith.cmpi ne, %10, %c0_i32_8 : i32
    scf.if %11 {
      %c0_9 = arith.constant 0 : index
      %c0_10 = arith.constant 0 : index
      %12 = vector.load %arg7[%c0_9, %c0_10] : memref<128x128xf32, #tpu.memory_space<vmem>>, vector<128x128xf32>
      %c0_11 = arith.constant 0 : index
      %c0_12 = arith.constant 0 : index
      %13 = vector.load %arg5[%c0_11, %c0_12] : memref<1x128xf32, #tpu.memory_space<vmem>>, vector<1x128xf32>
      %14 = vector.broadcast %13 : vector<1x128xf32> to vector<128x128xf32>
      %15 = arith.addf %12, %14 : vector<128x128xf32>
      %cst_13 = arith.constant 0.000000e+00 : f32
      %16 = vector.broadcast %cst_13 : f32 to vector<128x128xf32>
      %17 = arith.maximumf %15, %16 : vector<128x128xf32>
      %c0_14 = arith.constant 0 : index
      %c0_15 = arith.constant 0 : index
      %18 = vector.load %arg6[%c0_14, %c0_15] : memref<128x128xf32, #tpu.memory_space<vmem>>, vector<128x128xf32>
      tpu.vector_store %arg6[%c0_14, %c0_15], %17 {strides = array<i32>} : memref<128x128xf32, #tpu.memory_space<vmem>>, vector<128x128xf32>,
    } else {
    }
    return
  }
  func.func @transform_0(%arg0: i32, %arg1: i32, %arg2: i32) -> (i32, i32) {
    %c0_i32 = arith.constant 0 : i32
    return %arg0, %arg2 : i32, i32
  }
  func.func @transform_1(%arg0: i32, %arg1: i32, %arg2: i32) -> (i32, i32) {
    %c0_i32 = arith.constant 0 : i32
    return %arg2, %arg1 : i32, i32
  }
  func.func @transform_2(%arg0: i32, %arg1: i32, %arg2: i32) -> (i32, i32) {
    %c0_i32 = arith.constant 0 : i32
    %c0_i32_0 = arith.constant 0 : i32
    return %c0_i32, %arg1 : i32, i32
  }
  func.func @transform_3(%arg0: i32, %arg1: i32, %arg2: i32) -> (i32, i32) {
    %c0_i32 = arith.constant 0 : i32
    return %arg0, %arg1 : i32, i32
  }
}

module attributes {stable_mosaic.version = 11 : i64} {
  func.func @_matmul_bias_kernel(%arg0: i32, %arg1: i32, %arg2: i32, %arg3: memref<48x128xbf16, #tpu.memory_space<vmem>>, %arg4: memref<128x128xbf16, #tpu.memory_space<vmem>>, %arg5: memref<1x128xf32, #tpu.memory_space<vmem>>, %arg6: memref<48x128xf32, #tpu.memory_space<vmem>>, %arg7: memref<48x128xf32, #tpu.memory_space<vmem>>) attributes {dimension_semantics = [#tpu.dimension_semantics<parallel>, #tpu.dimension_semantics<parallel>, #tpu.dimension_semantics<arbitrary>], iteration_bounds = array<i64: 1, 1, 1>, scalar_prefetch = 0 : i64, scratch_operands = 1 : i64, tpu.core_type = #tpu.core_type<tc>, window_params = [{transform_indices = @transform_0, window_bounds = array<i64: 48, 128>}, {transform_indices = @transform_1, window_bounds = array<i64: 128, 128>}, {transform_indices = @transform_2, window_bounds = array<i64: 1, 128>}, {transform_indices = @transform_3, window_bounds = array<i64: 48, 128>}]} {
    %c0_i32 = arith.constant 0 : i32
    %0 = arith.cmpi eq, %arg2, %c0_i32 : i32
    %1 = arith.extui %0 : i1 to i32
    %c0_i32_0 = arith.constant 0 : i32
    %2 = arith.cmpi ne, %1, %c0_i32_0 : i32
    scf.if %2 {
      %cst_10 = arith.constant 0.000000e+00 : f32
      %12 = vector.broadcast %cst_10 : f32 to vector<48x128xf32>
      %c0_11 = arith.constant 0 : index
      %c0_12 = arith.constant 0 : index
      %13 = vector.load %arg7[%c0_11, %c0_12] : memref<48x128xf32, #tpu.memory_space<vmem>>, vector<48x128xf32>
      tpu.vector_store %arg7[%c0_11, %c0_12], %12 {strides = array<i32>} : memref<48x128xf32, #tpu.memory_space<vmem>>, vector<48x128xf32>,
    } else {
    }
    %c0 = arith.constant 0 : index
    %c0_1 = arith.constant 0 : index
    %3 = vector.load %arg7[%c0, %c0_1] : memref<48x128xf32, #tpu.memory_space<vmem>>, vector<48x128xf32>
    %c0_2 = arith.constant 0 : index
    %c0_3 = arith.constant 0 : index
    %4 = vector.load %arg3[%c0_2, %c0_3] : memref<48x128xbf16, #tpu.memory_space<vmem>>, vector<48x128xbf16>
    %c0_4 = arith.constant 0 : index
    %c0_5 = arith.constant 0 : index
    %5 = vector.load %arg4[%c0_4, %c0_5] : memref<128x128xbf16, #tpu.memory_space<vmem>>, vector<128x128xbf16>
    %cst = arith.constant dense<0.000000e+00> : vector<48x128xf32>
    %6 = tpu.matmul %4, %5, %cst {dimension_numbers = #tpu.dot_dimension_numbers<[1], [0], [0], [1], [0, 0, 1, 1], [], []>} : vector<48x128xbf16>, vector<128x128xbf16>, vector<48x128xf32> -> vector<48x128xf32>
    %7 = arith.addf %3, %6 : vector<48x128xf32>
    %c0_6 = arith.constant 0 : index
    %c0_7 = arith.constant 0 : index
    %8 = vector.load %arg7[%c0_6, %c0_7] : memref<48x128xf32, #tpu.memory_space<vmem>>, vector<48x128xf32>
    tpu.vector_store %arg7[%c0_6, %c0_7], %7 {strides = array<i32>} : memref<48x128xf32, #tpu.memory_space<vmem>>, vector<48x128xf32>,
    %c0_i32_8 = arith.constant 0 : i32
    %9 = arith.cmpi eq, %arg2, %c0_i32_8 : i32
    %10 = arith.extui %9 : i1 to i32
    %c0_i32_9 = arith.constant 0 : i32
    %11 = arith.cmpi ne, %10, %c0_i32_9 : i32
    scf.if %11 {
      %c0_10 = arith.constant 0 : index
      %c0_11 = arith.constant 0 : index
      %12 = vector.load %arg7[%c0_10, %c0_11] : memref<48x128xf32, #tpu.memory_space<vmem>>, vector<48x128xf32>
      %c0_12 = arith.constant 0 : index
      %c0_13 = arith.constant 0 : index
      %13 = vector.load %arg5[%c0_12, %c0_13] : memref<1x128xf32, #tpu.memory_space<vmem>>, vector<1x128xf32>
      %14 = vector.broadcast %13 : vector<1x128xf32> to vector<48x128xf32>
      %15 = arith.addf %12, %14 : vector<48x128xf32>
      %cst_14 = arith.constant 0.000000e+00 : f32
      %16 = vector.broadcast %cst_14 : f32 to vector<48x128xf32>
      %17 = arith.maximumf %15, %16 : vector<48x128xf32>
      %c0_15 = arith.constant 0 : index
      %c0_16 = arith.constant 0 : index
      %18 = vector.load %arg6[%c0_15, %c0_16] : memref<48x128xf32, #tpu.memory_space<vmem>>, vector<48x128xf32>
      tpu.vector_store %arg6[%c0_15, %c0_16], %17 {strides = array<i32>} : memref<48x128xf32, #tpu.memory_space<vmem>>, vector<48x128xf32>,
    } else {
    }
    return
  }
  func.func @transform_0(%arg0: i32, %arg1: i32, %arg2: i32) -> (i32, i32) {
    %c0_i32 = arith.constant 0 : i32
    return %arg0, %arg2 : i32, i32
  }
  func.func @transform_1(%arg0: i32, %arg1: i32, %arg2: i32) -> (i32, i32) {
    %c0_i32 = arith.constant 0 : i32
    return %arg2, %arg1 : i32, i32
  }
  func.func @transform_2(%arg0: i32, %arg1: i32, %arg2: i32) -> (i32, i32) {
    %c0_i32 = arith.constant 0 : i32
    %c0_i32_0 = arith.constant 0 : i32
    return %c0_i32, %arg1 : i32, i32
  }
  func.func @transform_3(%arg0: i32, %arg1: i32, %arg2: i32) -> (i32, i32) {
    %c0_i32 = arith.constant 0 : i32
    return %arg0, %arg1 : i32, i32
  }
}

module attributes {stable_mosaic.version = 11 : i64} {
  func.func @_mean_h_kernel(%arg0: i32, %arg1: memref<16x3x128xf32, #tpu.memory_space<vmem>>, %arg2: memref<16x128xf32, #tpu.memory_space<vmem>>) attributes {dimension_semantics = [#tpu.dimension_semantics<parallel>], iteration_bounds = array<i64: 1>, scalar_prefetch = 0 : i64, scratch_operands = 0 : i64, tpu.core_type = #tpu.core_type<tc>, window_params = [{transform_indices = @transform_0, window_bounds = array<i64: 16, 3, 128>}, {transform_indices = @transform_1, window_bounds = array<i64: 16, 128>}]} {
    %c0 = arith.constant 0 : index
    %c0_0 = arith.constant 0 : index
    %c0_1 = arith.constant 0 : index
    %0 = vector.load %arg1[%c0, %c0_0, %c0_1] : memref<16x3x128xf32, #tpu.memory_space<vmem>>, vector<16x3x128xf32>
    %cst = arith.constant dense<0.000000e+00> : vector<16x128xf32>
    %1 = vector.multi_reduction <add>, %0, %cst [1] : vector<16x3x128xf32> to vector<16x128xf32>
    %cst_2 = arith.constant 0.333333343 : f32
    %2 = vector.broadcast %cst_2 : f32 to vector<16x128xf32>
    %3 = arith.mulf %1, %2 : vector<16x128xf32>
    %c0_3 = arith.constant 0 : index
    %c0_4 = arith.constant 0 : index
    %4 = vector.load %arg2[%c0_3, %c0_4] : memref<16x128xf32, #tpu.memory_space<vmem>>, vector<16x128xf32>
    tpu.vector_store %arg2[%c0_3, %c0_4], %3 {strides = array<i32>} : memref<16x128xf32, #tpu.memory_space<vmem>>, vector<16x128xf32>,
    return
  }
  func.func @transform_0(%arg0: i32) -> (i32, i32, i32) {
    %c0_i32 = arith.constant 0 : i32
    %c0_i32_0 = arith.constant 0 : i32
    %c0_i32_1 = arith.constant 0 : i32
    return %arg0, %c0_i32, %c0_i32_0 : i32, i32, i32
  }
  func.func @transform_1(%arg0: i32) -> (i32, i32) {
    %c0_i32 = arith.constant 0 : i32
    %c0_i32_0 = arith.constant 0 : i32
    return %arg0, %c0_i32 : i32, i32
  }
}

module attributes {stable_mosaic.version = 11 : i64} {
  func.func @_matmul_bias_kernel(%arg0: i32, %arg1: i32, %arg2: i32, %arg3: memref<56x128xbf16, #tpu.memory_space<vmem>>, %arg4: memref<128x256xbf16, #tpu.memory_space<vmem>>, %arg5: memref<1x256xf32, #tpu.memory_space<vmem>>, %arg6: memref<56x256xf32, #tpu.memory_space<vmem>>, %arg7: memref<56x256xf32, #tpu.memory_space<vmem>>) attributes {dimension_semantics = [#tpu.dimension_semantics<parallel>, #tpu.dimension_semantics<parallel>, #tpu.dimension_semantics<arbitrary>], iteration_bounds = array<i64: 1, 2, 1>, scalar_prefetch = 0 : i64, scratch_operands = 1 : i64, tpu.core_type = #tpu.core_type<tc>, window_params = [{transform_indices = @transform_0, window_bounds = array<i64: 56, 128>}, {transform_indices = @transform_1, window_bounds = array<i64: 128, 256>}, {transform_indices = @transform_2, window_bounds = array<i64: 1, 256>}, {transform_indices = @transform_3, window_bounds = array<i64: 56, 256>}]} {
    %c0_i32 = arith.constant 0 : i32
    %0 = arith.cmpi eq, %arg2, %c0_i32 : i32
    %1 = arith.extui %0 : i1 to i32
    %c0_i32_0 = arith.constant 0 : i32
    %2 = arith.cmpi ne, %1, %c0_i32_0 : i32
    scf.if %2 {
      %cst_10 = arith.constant 0.000000e+00 : f32
      %12 = vector.broadcast %cst_10 : f32 to vector<56x256xf32>
      %c0_11 = arith.constant 0 : index
      %c0_12 = arith.constant 0 : index
      %13 = vector.load %arg7[%c0_11, %c0_12] : memref<56x256xf32, #tpu.memory_space<vmem>>, vector<56x256xf32>
      tpu.vector_store %arg7[%c0_11, %c0_12], %12 {strides = array<i32>} : memref<56x256xf32, #tpu.memory_space<vmem>>, vector<56x256xf32>,
    } else {
    }
    %c0 = arith.constant 0 : index
    %c0_1 = arith.constant 0 : index
    %3 = vector.load %arg7[%c0, %c0_1] : memref<56x256xf32, #tpu.memory_space<vmem>>, vector<56x256xf32>
    %c0_2 = arith.constant 0 : index
    %c0_3 = arith.constant 0 : index
    %4 = vector.load %arg3[%c0_2, %c0_3] : memref<56x128xbf16, #tpu.memory_space<vmem>>, vector<56x128xbf16>
    %c0_4 = arith.constant 0 : index
    %c0_5 = arith.constant 0 : index
    %5 = vector.load %arg4[%c0_4, %c0_5] : memref<128x256xbf16, #tpu.memory_space<vmem>>, vector<128x256xbf16>
    %cst = arith.constant dense<0.000000e+00> : vector<56x256xf32>
    %6 = tpu.matmul %4, %5, %cst {dimension_numbers = #tpu.dot_dimension_numbers<[1], [0], [0], [1], [0, 0, 1, 1], [], []>} : vector<56x128xbf16>, vector<128x256xbf16>, vector<56x256xf32> -> vector<56x256xf32>
    %7 = arith.addf %3, %6 : vector<56x256xf32>
    %c0_6 = arith.constant 0 : index
    %c0_7 = arith.constant 0 : index
    %8 = vector.load %arg7[%c0_6, %c0_7] : memref<56x256xf32, #tpu.memory_space<vmem>>, vector<56x256xf32>
    tpu.vector_store %arg7[%c0_6, %c0_7], %7 {strides = array<i32>} : memref<56x256xf32, #tpu.memory_space<vmem>>, vector<56x256xf32>,
    %c0_i32_8 = arith.constant 0 : i32
    %9 = arith.cmpi eq, %arg2, %c0_i32_8 : i32
    %10 = arith.extui %9 : i1 to i32
    %c0_i32_9 = arith.constant 0 : i32
    %11 = arith.cmpi ne, %10, %c0_i32_9 : i32
    scf.if %11 {
      %c0_10 = arith.constant 0 : index
      %c0_11 = arith.constant 0 : index
      %12 = vector.load %arg7[%c0_10, %c0_11] : memref<56x256xf32, #tpu.memory_space<vmem>>, vector<56x256xf32>
      %c0_12 = arith.constant 0 : index
      %c0_13 = arith.constant 0 : index
      %13 = vector.load %arg5[%c0_12, %c0_13] : memref<1x256xf32, #tpu.memory_space<vmem>>, vector<1x256xf32>
      %14 = vector.broadcast %13 : vector<1x256xf32> to vector<56x256xf32>
      %15 = arith.addf %12, %14 : vector<56x256xf32>
      %c0_14 = arith.constant 0 : index
      %c0_15 = arith.constant 0 : index
      %16 = vector.load %arg6[%c0_14, %c0_15] : memref<56x256xf32, #tpu.memory_space<vmem>>, vector<56x256xf32>
      tpu.vector_store %arg6[%c0_14, %c0_15], %15 {strides = array<i32>} : memref<56x256xf32, #tpu.memory_space<vmem>>, vector<56x256xf32>,
    } else {
    }
    return
  }
  func.func @transform_0(%arg0: i32, %arg1: i32, %arg2: i32) -> (i32, i32) {
    %c0_i32 = arith.constant 0 : i32
    return %arg0, %arg2 : i32, i32
  }
  func.func @transform_1(%arg0: i32, %arg1: i32, %arg2: i32) -> (i32, i32) {
    %c0_i32 = arith.constant 0 : i32
    return %arg2, %arg1 : i32, i32
  }
  func.func @transform_2(%arg0: i32, %arg1: i32, %arg2: i32) -> (i32, i32) {
    %c0_i32 = arith.constant 0 : i32
    %c0_i32_0 = arith.constant 0 : i32
    return %c0_i32, %arg1 : i32, i32
  }
  func.func @transform_3(%arg0: i32, %arg1: i32, %arg2: i32) -> (i32, i32) {
    %c0_i32 = arith.constant 0 : i32
    return %arg0, %arg1 : i32, i32
  }
}

module attributes {stable_mosaic.version = 11 : i64} {
  func.func @_lstm_seq_kernel(%arg0: i32, %arg1: memref<1x8x512xf32, #tpu.memory_space<vmem>>, %arg2: memref<128x512xbf16, #tpu.memory_space<vmem>>, %arg3: memref<1x512xf32, #tpu.memory_space<vmem>>, %arg4: memref<1x8x128xf32, #tpu.memory_space<vmem>>, %arg5: memref<8x128xf32, #tpu.memory_space<vmem>>, %arg6: memref<8x128xf32, #tpu.memory_space<vmem>>) attributes {dimension_semantics = [#tpu.dimension_semantics<arbitrary>], iteration_bounds = array<i64: 7>, scalar_prefetch = 0 : i64, scratch_operands = 2 : i64, tpu.core_type = #tpu.core_type<tc>, window_params = [{transform_indices = @transform_0, window_bounds = array<i64: 1, 8, 512>}, {pipeline_mode = #tpu.pipeline_mode<synchronous>, transform_indices = @transform_1, window_bounds = array<i64: 128, 512>}, {pipeline_mode = #tpu.pipeline_mode<synchronous>, transform_indices = @transform_2, window_bounds = array<i64: 1, 512>}, {transform_indices = @transform_3, window_bounds = array<i64: 1, 8, 128>}]} {
    %c0_i32 = arith.constant 0 : i32
    %0 = arith.cmpi eq, %arg0, %c0_i32 : i32
    %1 = arith.extui %0 : i1 to i32
    %c0_i32_0 = arith.constant 0 : i32
    %2 = arith.cmpi ne, %1, %c0_i32_0 : i32
    scf.if %2 {
      %cst_21 = arith.constant 0.000000e+00 : f32
      %44 = vector.broadcast %cst_21 : f32 to vector<8x128xf32>
      %c0_22 = arith.constant 0 : index
      %c0_23 = arith.constant 0 : index
      %45 = vector.load %arg5[%c0_22, %c0_23] : memref<8x128xf32, #tpu.memory_space<vmem>>, vector<8x128xf32>
      tpu.vector_store %arg5[%c0_22, %c0_23], %44 {strides = array<i32>} : memref<8x128xf32, #tpu.memory_space<vmem>>, vector<8x128xf32>,
      %cst_24 = arith.constant 0.000000e+00 : f32
      %46 = vector.broadcast %cst_24 : f32 to vector<8x128xf32>
      %c0_25 = arith.constant 0 : index
      %c0_26 = arith.constant 0 : index
      %47 = vector.load %arg6[%c0_25, %c0_26] : memref<8x128xf32, #tpu.memory_space<vmem>>, vector<8x128xf32>
      tpu.vector_store %arg6[%c0_25, %c0_26], %46 {strides = array<i32>} : memref<8x128xf32, #tpu.memory_space<vmem>>, vector<8x128xf32>,
    } else {
    }
    %c0 = arith.constant 0 : index
    %c0_1 = arith.constant 0 : index
    %c0_2 = arith.constant 0 : index
    %3 = vector.load %arg1[%c0, %c0_1, %c0_2] : memref<1x8x512xf32, #tpu.memory_space<vmem>>, vector<1x8x512xf32>
    %4 = vector.shape_cast %3 : vector<1x8x512xf32> to vector<8x512xf32>
    %c0_3 = arith.constant 0 : index
    %c0_4 = arith.constant 0 : index
    %5 = vector.load %arg5[%c0_3, %c0_4] : memref<8x128xf32, #tpu.memory_space<vmem>>, vector<8x128xf32>
    %6 = arith.truncf %5 : vector<8x128xf32> to vector<8x128xbf16>
    %c0_5 = arith.constant 0 : index
    %c0_6 = arith.constant 0 : index
    %7 = vector.load %arg2[%c0_5, %c0_6] : memref<128x512xbf16, #tpu.memory_space<vmem>>, vector<128x512xbf16>
    %cst = arith.constant dense<0.000000e+00> : vector<8x512xf32>
    %8 = tpu.matmul %6, %7, %cst {dimension_numbers = #tpu.dot_dimension_numbers<[1], [0], [0], [1], [0, 0, 1, 1], [], []>} : vector<8x128xbf16>, vector<128x512xbf16>, vector<8x512xf32> -> vector<8x512xf32>
    %9 = arith.addf %4, %8 : vector<8x512xf32>
    %c0_7 = arith.constant 0 : index
    %c0_8 = arith.constant 0 : index
    %10 = vector.load %arg3[%c0_7, %c0_8] : memref<1x512xf32, #tpu.memory_space<vmem>>, vector<1x512xf32>
    %11 = vector.broadcast %10 : vector<1x512xf32> to vector<8x512xf32>
    %12 = arith.addf %9, %11 : vector<8x512xf32>
    %13 = vector.extract_strided_slice %12 {offsets = [0, 0], sizes = [8, 128], strides = [1, 1]} : vector<8x512xf32> to vector<8x128xf32>
    %14 = arith.negf %13 : vector<8x128xf32>
    %15 = math.exp %14 : vector<8x128xf32>
    %cst_9 = arith.constant 1.000000e+00 : f32
    %16 = vector.broadcast %cst_9 : f32 to vector<8x128xf32>
    %17 = arith.addf %16, %15 : vector<8x128xf32>
    %18 = arith.divf %16, %17 : vector<8x128xf32>
    %19 = vector.extract_strided_slice %12 {offsets = [0, 128], sizes = [8, 128], strides = [1, 1]} : vector<8x512xf32> to vector<8x128xf32>
    %20 = arith.negf %19 : vector<8x128xf32>
    %21 = math.exp %20 : vector<8x128xf32>
    %cst_10 = arith.constant 1.000000e+00 : f32
    %22 = vector.broadcast %cst_10 : f32 to vector<8x128xf32>
    %23 = arith.addf %22, %21 : vector<8x128xf32>
    %24 = arith.divf %22, %23 : vector<8x128xf32>
    %25 = vector.extract_strided_slice %12 {offsets = [0, 256], sizes = [8, 128], strides = [1, 1]} : vector<8x512xf32> to vector<8x128xf32>
    %26 = math.tanh %25 : vector<8x128xf32>
    %27 = vector.extract_strided_slice %12 {offsets = [0, 384], sizes = [8, 128], strides = [1, 1]} : vector<8x512xf32> to vector<8x128xf32>
    %28 = arith.negf %27 : vector<8x128xf32>
    %29 = math.exp %28 : vector<8x128xf32>
    %cst_11 = arith.constant 1.000000e+00 : f32
    %30 = vector.broadcast %cst_11 : f32 to vector<8x128xf32>
    %31 = arith.addf %30, %29 : vector<8x128xf32>
    %32 = arith.divf %30, %31 : vector<8x128xf32>
    %c0_12 = arith.constant 0 : index
    %c0_13 = arith.constant 0 : index
    %33 = vector.load %arg6[%c0_12, %c0_13] : memref<8x128xf32, #tpu.memory_space<vmem>>, vector<8x128xf32>
    %34 = arith.mulf %24, %33 : vector<8x128xf32>
    %35 = arith.mulf %18, %26 : vector<8x128xf32>
    %36 = arith.addf %34, %35 : vector<8x128xf32>
    %37 = math.tanh %36 : vector<8x128xf32>
    %38 = arith.mulf %32, %37 : vector<8x128xf32>
    %c0_14 = arith.constant 0 : index
    %c0_15 = arith.constant 0 : index
    %39 = vector.load %arg6[%c0_14, %c0_15] : memref<8x128xf32, #tpu.memory_space<vmem>>, vector<8x128xf32>
    tpu.vector_store %arg6[%c0_14, %c0_15], %36 {strides = array<i32>} : memref<8x128xf32, #tpu.memory_space<vmem>>, vector<8x128xf32>,
    %c0_16 = arith.constant 0 : index
    %c0_17 = arith.constant 0 : index
    %40 = vector.load %arg5[%c0_16, %c0_17] : memref<8x128xf32, #tpu.memory_space<vmem>>, vector<8x128xf32>
    tpu.vector_store %arg5[%c0_16, %c0_17], %38 {strides = array<i32>} : memref<8x128xf32, #tpu.memory_space<vmem>>, vector<8x128xf32>,
    %c0_18 = arith.constant 0 : index
    %c0_19 = arith.constant 0 : index
    %c0_20 = arith.constant 0 : index
    %41 = vector.load %arg4[%c0_18, %c0_19, %c0_20] : memref<1x8x128xf32, #tpu.memory_space<vmem>>, vector<1x8x128xf32>
    %42 = vector.shape_cast %41 : vector<1x8x128xf32> to vector<8x128xf32>
    %43 = vector.shape_cast %38 : vector<8x128xf32> to vector<1x8x128xf32>
    tpu.vector_store %arg4[%c0_18, %c0_19, %c0_20], %43 {strides = array<i32>} : memref<1x8x128xf32, #tpu.memory_space<vmem>>, vector<1x8x128xf32>,
    return
  }
  func.func @transform_0(%arg0: i32) -> (i32, i32, i32) {
    %c0_i32 = arith.constant 0 : i32
    %c0_i32_0 = arith.constant 0 : i32
    %c0_i32_1 = arith.constant 0 : i32
    return %arg0, %c0_i32, %c0_i32_0 : i32, i32, i32
  }
  func.func @transform_1(%arg0: i32) -> (i32, i32) {
    %c0_i32 = arith.constant 0 : i32
    %c0_i32_0 = arith.constant 0 : i32
    %c0_i32_1 = arith.constant 0 : i32
    return %c0_i32, %c0_i32_0 : i32, i32
  }
  func.func @transform_2(%arg0: i32) -> (i32, i32) {
    %c0_i32 = arith.constant 0 : i32
    %c0_i32_0 = arith.constant 0 : i32
    %c0_i32_1 = arith.constant 0 : i32
    return %c0_i32, %c0_i32_0 : i32, i32
  }
  func.func @transform_3(%arg0: i32) -> (i32, i32, i32) {
    %c0_i32 = arith.constant 0 : i32
    %c0_i32_0 = arith.constant 0 : i32
    %c0_i32_1 = arith.constant 0 : i32
    return %arg0, %c0_i32, %c0_i32_0 : i32, i32, i32
  }
}

module attributes {stable_mosaic.version = 11 : i64} {
  func.func @_matmul_bias_kernel(%arg0: i32, %arg1: i32, %arg2: i32, %arg3: memref<56x128xbf16, #tpu.memory_space<vmem>>, %arg4: memref<128x128xbf16, #tpu.memory_space<vmem>>, %arg5: memref<1x128xf32, #tpu.memory_space<vmem>>, %arg6: memref<56x128xf32, #tpu.memory_space<vmem>>, %arg7: memref<56x128xf32, #tpu.memory_space<vmem>>) attributes {dimension_semantics = [#tpu.dimension_semantics<parallel>, #tpu.dimension_semantics<parallel>, #tpu.dimension_semantics<arbitrary>], iteration_bounds = array<i64: 1, 1, 1>, scalar_prefetch = 0 : i64, scratch_operands = 1 : i64, tpu.core_type = #tpu.core_type<tc>, window_params = [{transform_indices = @transform_0, window_bounds = array<i64: 56, 128>}, {transform_indices = @transform_1, window_bounds = array<i64: 128, 128>}, {transform_indices = @transform_2, window_bounds = array<i64: 1, 128>}, {transform_indices = @transform_3, window_bounds = array<i64: 56, 128>}]} {
    %c0_i32 = arith.constant 0 : i32
    %0 = arith.cmpi eq, %arg2, %c0_i32 : i32
    %1 = arith.extui %0 : i1 to i32
    %c0_i32_0 = arith.constant 0 : i32
    %2 = arith.cmpi ne, %1, %c0_i32_0 : i32
    scf.if %2 {
      %cst_10 = arith.constant 0.000000e+00 : f32
      %12 = vector.broadcast %cst_10 : f32 to vector<56x128xf32>
      %c0_11 = arith.constant 0 : index
      %c0_12 = arith.constant 0 : index
      %13 = vector.load %arg7[%c0_11, %c0_12] : memref<56x128xf32, #tpu.memory_space<vmem>>, vector<56x128xf32>
      tpu.vector_store %arg7[%c0_11, %c0_12], %12 {strides = array<i32>} : memref<56x128xf32, #tpu.memory_space<vmem>>, vector<56x128xf32>,
    } else {
    }
    %c0 = arith.constant 0 : index
    %c0_1 = arith.constant 0 : index
    %3 = vector.load %arg7[%c0, %c0_1] : memref<56x128xf32, #tpu.memory_space<vmem>>, vector<56x128xf32>
    %c0_2 = arith.constant 0 : index
    %c0_3 = arith.constant 0 : index
    %4 = vector.load %arg3[%c0_2, %c0_3] : memref<56x128xbf16, #tpu.memory_space<vmem>>, vector<56x128xbf16>
    %c0_4 = arith.constant 0 : index
    %c0_5 = arith.constant 0 : index
    %5 = vector.load %arg4[%c0_4, %c0_5] : memref<128x128xbf16, #tpu.memory_space<vmem>>, vector<128x128xbf16>
    %cst = arith.constant dense<0.000000e+00> : vector<56x128xf32>
    %6 = tpu.matmul %4, %5, %cst {dimension_numbers = #tpu.dot_dimension_numbers<[1], [0], [0], [1], [0, 0, 1, 1], [], []>} : vector<56x128xbf16>, vector<128x128xbf16>, vector<56x128xf32> -> vector<56x128xf32>
    %7 = arith.addf %3, %6 : vector<56x128xf32>
    %c0_6 = arith.constant 0 : index
    %c0_7 = arith.constant 0 : index
    %8 = vector.load %arg7[%c0_6, %c0_7] : memref<56x128xf32, #tpu.memory_space<vmem>>, vector<56x128xf32>
    tpu.vector_store %arg7[%c0_6, %c0_7], %7 {strides = array<i32>} : memref<56x128xf32, #tpu.memory_space<vmem>>, vector<56x128xf32>,
    %c0_i32_8 = arith.constant 0 : i32
    %9 = arith.cmpi eq, %arg2, %c0_i32_8 : i32
    %10 = arith.extui %9 : i1 to i32
    %c0_i32_9 = arith.constant 0 : i32
    %11 = arith.cmpi ne, %10, %c0_i32_9 : i32
    scf.if %11 {
      %c0_10 = arith.constant 0 : index
      %c0_11 = arith.constant 0 : index
      %12 = vector.load %arg7[%c0_10, %c0_11] : memref<56x128xf32, #tpu.memory_space<vmem>>, vector<56x128xf32>
      %c0_12 = arith.constant 0 : index
      %c0_13 = arith.constant 0 : index
      %13 = vector.load %arg5[%c0_12, %c0_13] : memref<1x128xf32, #tpu.memory_space<vmem>>, vector<1x128xf32>
      %14 = vector.broadcast %13 : vector<1x128xf32> to vector<56x128xf32>
      %15 = arith.addf %12, %14 : vector<56x128xf32>
      %c0_14 = arith.constant 0 : index
      %c0_15 = arith.constant 0 : index
      %16 = vector.load %arg6[%c0_14, %c0_15] : memref<56x128xf32, #tpu.memory_space<vmem>>, vector<56x128xf32>
      tpu.vector_store %arg6[%c0_14, %c0_15], %15 {strides = array<i32>} : memref<56x128xf32, #tpu.memory_space<vmem>>, vector<56x128xf32>,
    } else {
    }
    return
  }
  func.func @transform_0(%arg0: i32, %arg1: i32, %arg2: i32) -> (i32, i32) {
    %c0_i32 = arith.constant 0 : i32
    return %arg0, %arg2 : i32, i32
  }
  func.func @transform_1(%arg0: i32, %arg1: i32, %arg2: i32) -> (i32, i32) {
    %c0_i32 = arith.constant 0 : i32
    return %arg2, %arg1 : i32, i32
  }
  func.func @transform_2(%arg0: i32, %arg1: i32, %arg2: i32) -> (i32, i32) {
    %c0_i32 = arith.constant 0 : i32
    %c0_i32_0 = arith.constant 0 : i32
    return %c0_i32, %arg1 : i32, i32
  }
  func.func @transform_3(%arg0: i32, %arg1: i32, %arg2: i32) -> (i32, i32) {
    %c0_i32 = arith.constant 0 : i32
    return %arg0, %arg1 : i32, i32
  }
}

</mosaic_0001>

<bundles_post_ra>
// kernel: ocr_forward.19
= control target key start
LH: loop header
LB: loop body
LE: loop exit
PB: predicated region body
PF: predicated region fallthrough
CT: control target
= control target key end

     0   :  { %s1212_s12 = smov 0   ;;  %s1214_s13 = smov 0   ;;  %s1362_s0 = inlined_call_operand.vmem [shape: bf16[4096,128], index: 0, kind: input, shape index: {}]   ;;  %s1363_s1 = inlined_call_operand.vmem [shape: bf16[128,128], index: 1, kind: input, shape index: {}]   ;;  %s1364_s2 = inlined_call_operand.vmem [shape: f32[1,128], index: 2, kind: input, shape index: {}]   ;;  %s1365_s3 = inlined_call_operand.vmem [shape: f32[4096,128], index: 3, kind: output, shape index: {}]  }
   0x1   :  { %s1216_s14 = smov 0  }
   0x2 LB: > { %s32_s15 = sadd.s32 1, %s1186_s13  ;;  %p1000_p0 = scmp.ge.s32.totalorder %s1190_s14, 1  ;;  %s1190_s14 = sphi %s1216_s14, %s13_s14   ;;  %s1186_s13 = sphi %s1214_s13, %s1367_s13   ;;  %s1182_s12 = sphi %s1212_s12, %s1366_s12  }
   0x3   : > { %p34_p1 = scmp.ge.s32.totalorder %s32_s15, 16  ;;  %p188_p2 = scmp.lt.s32.totalorder %s1190_s14, 17 }
   0x5   : > { %s1369_s15 = smov (%p34_p1, %s32_s15), 0  ;;  %p189_p3 = pnand %p1000_p0, %p188_p2 }
   0x6   : > { %v1144_v0 = vld [vmem:[%s1363_s1] sm:$0xff] (!%p189_p3)   ;;  %s1001_s18 = sshll.u32 (!%p189_p3), %s1182_s12, 5  ;;  %v1145_v1 = vld [vmem:[%s1363_s1 + $0x8] sm:$0xff] (!%p189_p3)   ;;  %v1146_v2 = vld [vmem:[%s1363_s1 + $0x10] sm:$0xff] (!%p189_p3)  }
   0x7   : > { %192 = sbr.rel (%p189_p3) target bundleno = 283 (0x11b), region = 32  ;;  %p230_p4 = scmp.lt.s32.totalorder (!%p189_p3), %s1001_s18, 511  ;;  %1056 = vmatprep.subr.bf16.mxu0 (!%p189_p3), %v1144_v0  ;;  %1104 = vmatprep.subr.bf16.mxu1 (!%p189_p3), %v1144_v0  ;;  %v1147_v3 = vld [vmem:[%s1363_s1 + $0x18] sm:$0xff] (!%p189_p3)   ;;  %v1148_v6 = vld [vmem:[%s1363_s1 + $0x20] sm:$0xff] (!%p189_p3)   ;;  %v1149_v7 = vld [vmem:[%s1363_s1 + $0x28] sm:$0xff] (!%p189_p3)  }
   0x8   : > { %1057 = vmatpush3.bf16.msra.mxu0 (!%p189_p3), %v1144_v0  ;;  %1112 = vmatpush3.bf16.msra.mxu1 (!%p189_p3), %v1144_v0  ;;  %v1150_v8 = vld [vmem:[%s1363_s1 + $0x30] sm:$0xff] (!%p189_p3)   ;;  %v1151_v9 = vld [vmem:[%s1363_s1 + $0x38] sm:$0xff] (!%p189_p3)   ;;  %v1281_v24 = vld [vmem:[%s1364_s2] ss:$0 sm:$0xff] (!%p189_p3) }
   0x9   : > { %1058 = vmatprep.subr.bf16.mxu0 (!%p189_p3), %v1145_v1  ;;  %1105 = vmatprep.subr.bf16.mxu1 (!%p189_p3), %v1145_v1 }
   0xc   : > { %1059 = vmatpush3.bf16.msra.mxu0 (!%p189_p3), %v1145_v1  ;;  %1113 = vmatpush3.bf16.msra.mxu1 (!%p189_p3), %v1145_v1 }
   0xd   : > { %1060 = vmatprep.subr.bf16.mxu0 (!%p189_p3), %v1146_v2  ;;  %1106 = vmatprep.subr.bf16.mxu1 (!%p189_p3), %v1146_v2 }
   0xe   : > { %s1371_s18 = smov (!%p230_p4, %s1001_s18), 511 }
   0xf   : > { %s1002_s23 = sshll.u32 %s1371_s18, 2  ;;  %s1004_s12 = sshll.u32 %s1371_s18, 3 }
  0x10   : > { %s1245_s26 = scalar_lea.vmem %s1362_s0, %s1002_s23  ;;  %1061 = vmatpush3.bf16.msra.mxu0 %v1146_v2  ;;  %1114 = vmatpush3.bf16.msra.mxu1 %v1146_v2  ;;  %s1289_s19 = scalar_lea.vmem %s1365_s3, %s1004_s12 }
  0x11   : > { %v1152_v4 = vld [vmem:[%s1245_s26] sm:$0xff]   ;;  %1062 = vmatprep.subr.bf16.mxu0 %v1147_v3  ;;  %1107 = vmatprep.subr.bf16.mxu1 %v1147_v3  ;;  %v1154_v10 = vld [vmem:[%s1245_s26 + $0x8] sm:$0xff]   ;;  %v1156_v12 = vld [vmem:[%s1245_s26 + $0x10] sm:$0xff]  }
  0x12   : > { %v1153_v5 = vld [vmem:[%s1245_s26 + $0x40] sm:$0xff]   ;;  %1072 = vmatprep.mubr.bf16.mxu0 %v1152_v4  ;;  %v1155_v11 = vld [vmem:[%s1245_s26 + $0x48] sm:$0xff]   ;;  %v1157_v13 = vld [vmem:[%s1245_s26 + $0x50] sm:$0xff]  }
  0x13   : > { %1088 = vmatprep.mubr.bf16.mxu1 %v1153_v5  ;;  %v1158_v14 = vld [vmem:[%s1245_s26 + $0x18] sm:$0xff]   ;;  %v1160_v16 = vld [vmem:[%s1245_s26 + $0x20] sm:$0xff]   ;;  %v1162_v18 = vld [vmem:[%s1245_s26 + $0x28] sm:$0xff]  }
  0x14   : > { %1063 = vmatpush3.bf16.msra.mxu0 %v1147_v3  ;;  %1115 = vmatpush3.bf16.msra.mxu1 %v1147_v3  ;;  %v1159_v15 = vld [vmem:[%s1245_s26 + $0x58] sm:$0xff]   ;;  %v1161_v17 = vld [vmem:[%s1245_s26 + $0x60] sm:$0xff]   ;;  %v1163_v19 = vld [vmem:[%s1245_s26 + $0x68] sm:$0xff]  }
  0x15   : > { %1064 = vmatprep.subr.bf16.mxu0 %v1148_v6  ;;  %1108 = vmatprep.subr.bf16.mxu1 %v1148_v6  ;;  %v1164_v20 = vld [vmem:[%s1245_s26 + $0x30] sm:$0xff]   ;;  %v1166_v22 = vld [vmem:[%s1245_s26 + $0x38] sm:$0xff]  }
  0x16   : > { %v1165_v21 = vld [vmem:[%s1245_s26 + $0x70] sm:$0xff]   ;;  %v1167_v23 = vld [vmem:[%s1245_s26 + $0x78] sm:$0xff]  }
  0x18   : > { %1065 = vmatpush3.bf16.msra.mxu0 %v1148_v6  ;;  %1116 = vmatpush3.bf16.msra.mxu1 %v1148_v6 }
  0x19   : > { %1066 = vmatprep.subr.bf16.mxu0 %v1149_v7  ;;  %1109 = vmatprep.subr.bf16.mxu1 %v1149_v7 }
  0x1c   : > { %1067 = vmatpush3.bf16.msra.mxu0 %v1149_v7  ;;  %1117 = vmatpush3.bf16.msra.mxu1 %v1149_v7 }
  0x1d   : > { %1068 = vmatprep.subr.bf16.mxu0 %v1150_v8  ;;  %1110 = vmatprep.subr.bf16.mxu1 %v1150_v8 }
  0x20   : > { %1069 = vmatpush3.bf16.msra.mxu0 %v1150_v8  ;;  %1118 = vmatpush3.bf16.msra.mxu1 %v1150_v8 }
  0x21   : > { %1070 = vmatprep.subr.bf16.mxu0 %v1151_v9  ;;  %1111 = vmatprep.subr.bf16.mxu1 %v1151_v9 }
  0x24   : > { %1071 = vmatpush3.bf16.msra.mxu0 %v1151_v9  ;;  %1119 = vmatpush3.bf16.msra.mxu1 %v1151_v9 }
  0x27   : > { %1073 = vmatmul.mubr.bf16.vlgmr.msra.gmra.mrb[0].mxu0 %v1154_v10  ;;  %1089 = vmatmul.mubr.bf16.vlgmr.msra.gmra.mrb[0].mxu1 %v1155_v11 }
  0x28   : > { %1076 = vmatprep.mubr.bf16.mxu0 %v1156_v12  ;;  %1092 = vmatprep.mubr.bf16.mxu1 %v1157_v13 }
  0x2f   : > { %1077 = vmatmul.mubr.bf16.gmra.mrb[4].mxu0 %v1158_v14  ;;  %1093 = vmatmul.mubr.bf16.gmra.mrb[4].mxu1 %v1159_v15 }
  0x30   : > { %1080 = vmatprep.mubr.bf16.mxu0 %v1160_v16  ;;  %1096 = vmatprep.mubr.bf16.mxu1 %v1161_v17 }
  0x37   : > { %1081 = vmatmul.mubr.bf16.gmra.mrb[8].mxu0 %v1162_v18  ;;  %1097 = vmatmul.mubr.bf16.gmra.mrb[8].mxu1 %v1163_v19 }
  0x38   : > { %1084 = vmatprep.mubr.bf16.mxu0 %v1164_v20  ;;  %1100 = vmatprep.mubr.bf16.mxu1 %v1165_v21 }
  0x3f   : > { %1085 = vmatmul.mubr.bf16.gmra.mrb[12].mxu0 %v1166_v22  ;;  %1101 = vmatmul.mubr.bf16.gmra.mrb[12].mxu1 %v1167_v23 }
  0xfa   : > { %v1074_v25 = vpop.f32.mrb[0].mxu0  ;;  %v1090_v26 = vpop.f32.mrb[0].mxu1 }
  0xfb   : > { %v789_v27 = vadd.f32 %v1074_v25, %v1281_v24  ;;  %v805_v28 = vadd.f32 %v1090_v26, %v1281_v24  ;;  %v554_v29 = vpop.f32.mrb[1].mxu0  ;;  %v618_v30 = vpop.f32.mrb[1].mxu1 }
  0xfc   : > { %v787_v31 = vadd.f32 %v1281_v24, %v554_v29  ;;  %v803_v32 = vadd.f32 %v1281_v24, %v618_v30  ;;  %v1075_v33 = vpop.f32.mrb[2].mxu0  ;;  %v1091_v34 = vpop.f32.mrb[2].mxu1 }
  0xfd   : > { %v821_v35 = vmax.f32 %v789_v27, 0.0  ;;  %v837_v36 = vmax.f32 %v805_v28, 0.0  ;;  %v790_v37 = vadd.f32 %v1075_v33, %v1281_v24  ;;  %v806_v38 = vadd.f32 %v1091_v34, %v1281_v24  ;;  %v557_v39 = vpop.f32.mrb[3].mxu0  ;;  %v621_v40 = vpop.f32.mrb[3].mxu1 }
  0xfe   : > { %v819_v41 = vmax.f32 %v787_v31, 0.0  ;;  %v835_v42 = vmax.f32 %v803_v32, 0.0  ;;  %v788_v43 = vadd.f32 %v1281_v24, %v557_v39  ;;  %v804_v44 = vadd.f32 %v1281_v24, %v621_v40 }
  0xff   : > { %853 = vst [vmem:[%s1289_s19 + $0x10] sm:$0xff] %v821_v35  ;;  %869 = vst [vmem:[%s1289_s19 + $0x90] sm:$0xff] %v837_v36  ;;  %v822_v45 = vmax.f32 %v790_v37, 0.0  ;;  %v838_v46 = vmax.f32 %v806_v38, 0.0 }
 0x100   : > { %851 = vst [vmem:[%s1289_s19] sm:$0xff] %v819_v41  ;;  %867 = vst [vmem:[%s1289_s19 + $0x80] sm:$0xff] %v835_v42  ;;  %v820_v47 = vmax.f32 %v788_v43, 0.0  ;;  %v836_v48 = vmax.f32 %v804_v44, 0.0 }
 0x101   : > { %854 = vst [vmem:[%s1289_s19 + $0x18] sm:$0xff] %v822_v45  ;;  %870 = vst [vmem:[%s1289_s19 + $0x98] sm:$0xff] %v838_v46 }
 0x102   : > { %852 = vst [vmem:[%s1289_s19 + $0x8] sm:$0xff] %v820_v47  ;;  %868 = vst [vmem:[%s1289_s19 + $0x88] sm:$0xff] %v836_v48  ;;  %v1078_v49 = vpop.f32.mrb[4].mxu0  ;;  %v1094_v50 = vpop.f32.mrb[4].mxu1 }
 0x103   : > { %v793_v51 = vadd.f32 %v1078_v49, %v1281_v24  ;;  %v809_v52 = vadd.f32 %v1094_v50, %v1281_v24  ;;  %v570_v53 = vpop.f32.mrb[5].mxu0  ;;  %v634_v54 = vpop.f32.mrb[5].mxu1 }
 0x104   : > { %v791_v55 = vadd.f32 %v1281_v24, %v570_v53  ;;  %v807_v56 = vadd.f32 %v1281_v24, %v634_v54  ;;  %v1079_v57 = vpop.f32.mrb[6].mxu0  ;;  %v1095_v58 = vpop.f32.mrb[6].mxu1 }
 0x105   : > { %v825_v59 = vmax.f32 %v793_v51, 0.0  ;;  %v841_v60 = vmax.f32 %v809_v52, 0.0  ;;  %v794_v61 = vadd.f32 %v1079_v57, %v1281_v24  ;;  %v810_v62 = vadd.f32 %v1095_v58, %v1281_v24  ;;  %v573_v63 = vpop.f32.mrb[7].mxu0  ;;  %v637_v0 = vpop.f32.mrb[7].mxu1 }
 0x106   : > { %v823_v1 = vmax.f32 %v791_v55, 0.0  ;;  %v839_v2 = vmax.f32 %v807_v56, 0.0  ;;  %v792_v3 = vadd.f32 %v1281_v24, %v573_v63  ;;  %v808_v4 = vadd.f32 %v1281_v24, %v637_v0 }
 0x107   : > { %857 = vst [vmem:[%s1289_s19 + $0x30] sm:$0xff] %v825_v59  ;;  %873 = vst [vmem:[%s1289_s19 + $0xb0] sm:$0xff] %v841_v60  ;;  %v826_v5 = vmax.f32 %v794_v61, 0.0  ;;  %v842_v6 = vmax.f32 %v810_v62, 0.0 }
 0x108   : > { %855 = vst [vmem:[%s1289_s19 + $0x20] sm:$0xff] %v823_v1  ;;  %871 = vst [vmem:[%s1289_s19 + $0xa0] sm:$0xff] %v839_v2  ;;  %v824_v7 = vmax.f32 %v792_v3, 0.0  ;;  %v840_v8 = vmax.f32 %v808_v4, 0.0 }
 0x109   : > { %858 = vst [vmem:[%s1289_s19 + $0x38] sm:$0xff] %v826_v5  ;;  %874 = vst [vmem:[%s1289_s19 + $0xb8] sm:$0xff] %v842_v6 }
 0x10a   : > { %856 = vst [vmem:[%s1289_s19 + $0x28] sm:$0xff] %v824_v7  ;;  %872 = vst [vmem:[%s1289_s19 + $0xa8] sm:$0xff] %v840_v8  ;;  %v1082_v9 = vpop.f32.mrb[8].mxu0  ;;  %v1098_v10 = vpop.f32.mrb[8].mxu1 }
 0x10b   : > { %v797_v11 = vadd.f32 %v1082_v9, %v1281_v24  ;;  %v813_v12 = vadd.f32 %v1098_v10, %v1281_v24  ;;  %v586_v13 = vpop.f32.mrb[9].mxu0  ;;  %v650_v14 = vpop.f32.mrb[9].mxu1 }
 0x10c   : > { %v795_v15 = vadd.f32 %v1281_v24, %v586_v13  ;;  %v811_v16 = vadd.f32 %v1281_v24, %v650_v14  ;;  %v1083_v17 = vpop.f32.mrb[10].mxu0  ;;  %v1099_v18 = vpop.f32.mrb[10].mxu1 }
 0x10d   : > { %v829_v19 = vmax.f32 %v797_v11, 0.0  ;;  %v845_v20 = vmax.f32 %v813_v12, 0.0  ;;  %v798_v21 = vadd.f32 %v1083_v17, %v1281_v24  ;;  %v814_v22 = vadd.f32 %v1099_v18, %v1281_v24  ;;  %v589_v23 = vpop.f32.mrb[11].mxu0  ;;  %v653_v25 = vpop.f32.mrb[11].mxu1 }
 0x10e   : > { %v827_v26 = vmax.f32 %v795_v15, 0.0  ;;  %v843_v27 = vmax.f32 %v811_v16, 0.0  ;;  %v796_v28 = vadd.f32 %v1281_v24, %v589_v23  ;;  %v812_v29 = vadd.f32 %v1281_v24, %v653_v25 }
 0x10f   : > { %861 = vst [vmem:[%s1289_s19 + $0x50] sm:$0xff] %v829_v19  ;;  %877 = vst [vmem:[%s1289_s19 + $0xd0] sm:$0xff] %v845_v20  ;;  %v830_v30 = vmax.f32 %v798_v21, 0.0  ;;  %v846_v31 = vmax.f32 %v814_v22, 0.0 }
 0x110   : > { %859 = vst [vmem:[%s1289_s19 + $0x40] sm:$0xff] %v827_v26  ;;  %875 = vst [vmem:[%s1289_s19 + $0xc0] sm:$0xff] %v843_v27  ;;  %v828_v32 = vmax.f32 %v796_v28, 0.0  ;;  %v844_v33 = vmax.f32 %v812_v29, 0.0 }
 0x111   : > { %862 = vst [vmem:[%s1289_s19 + $0x58] sm:$0xff] %v830_v30  ;;  %878 = vst [vmem:[%s1289_s19 + $0xd8] sm:$0xff] %v846_v31 }
 0x112   : > { %860 = vst [vmem:[%s1289_s19 + $0x48] sm:$0xff] %v828_v32  ;;  %876 = vst [vmem:[%s1289_s19 + $0xc8] sm:$0xff] %v844_v33  ;;  %v1086_v34 = vpop.f32.mrb[12].mxu0  ;;  %v1102_v35 = vpop.f32.mrb[12].mxu1 }
 0x113   : > { %v801_v36 = vadd.f32 %v1086_v34, %v1281_v24  ;;  %v817_v37 = vadd.f32 %v1102_v35, %v1281_v24  ;;  %v602_v38 = vpop.f32.mrb[13].mxu0  ;;  %v666_v39 = vpop.f32.mrb[13].mxu1 }
 0x114   : > { %v799_v40 = vadd.f32 %v1281_v24, %v602_v38  ;;  %v815_v41 = vadd.f32 %v1281_v24, %v666_v39  ;;  %v1087_v42 = vpop.f32.mrb[14].mxu0  ;;  %v1103_v43 = vpop.f32.mrb[14].mxu1 }
 0x115   : > { %v833_v44 = vmax.f32 %v801_v36, 0.0  ;;  %v849_v45 = vmax.f32 %v817_v37, 0.0  ;;  %v802_v46 = vadd.f32 %v1087_v42, %v1281_v24  ;;  %v818_v47 = vadd.f32 %v1103_v43, %v1281_v24  ;;  %v605_v48 = vpop.f32.mrb[15].mxu0  ;;  %v669_v49 = vpop.f32.mrb[15].mxu1 }
 0x116   : > { %v831_v50 = vmax.f32 %v799_v40, 0.0  ;;  %v847_v51 = vmax.f32 %v815_v41, 0.0  ;;  %v800_v52 = vadd.f32 %v1281_v24, %v605_v48  ;;  %v816_v53 = vadd.f32 %v1281_v24, %v669_v49 }
 0x117   : > { %865 = vst [vmem:[%s1289_s19 + $0x70] sm:$0xff] %v833_v44  ;;  %881 = vst [vmem:[%s1289_s19 + $0xf0] sm:$0xff] %v849_v45  ;;  %v834_v54 = vmax.f32 %v802_v46, 0.0  ;;  %v850_v55 = vmax.f32 %v818_v47, 0.0 }
 0x118   : > { %863 = vst [vmem:[%s1289_s19 + $0x60] sm:$0xff] %v831_v50  ;;  %879 = vst [vmem:[%s1289_s19 + $0xe0] sm:$0xff] %v847_v51  ;;  %v832_v56 = vmax.f32 %v800_v52, 0.0  ;;  %v848_v57 = vmax.f32 %v816_v53, 0.0 }
 0x119   : > { %866 = vst [vmem:[%s1289_s19 + $0x78] sm:$0xff] %v834_v54  ;;  %882 = vst [vmem:[%s1289_s19 + $0xf8] sm:$0xff] %v850_v55 }
 0x11a   : > { %864 = vst [vmem:[%s1289_s19 + $0x68] sm:$0xff] %v832_v56  ;;  %880 = vst [vmem:[%s1289_s19 + $0xe8] sm:$0xff] %v848_v57 }
 0x11b PF: > { %s13_s14 = sadd.s32 1, %s1190_s14   ;;  %s1366_s12 = smov %s1186_s13 }
 0x11c   : > { %p10_p5 = scmp.ge.s32.totalorder %s13_s14, 18   ;;  %s1367_s13 = smov %s1369_s15 }
 0x11e   :  { %12 = sbr.rel (!%p10_p5) target bundleno = 2 (0x2), region = 76 }

// kernel: ocr_forward.20
= control target key start
LH: loop header
LB: loop body
LE: loop exit
PB: predicated region body
PF: predicated region fallthrough
CT: control target
= control target key end

     0   :  { %s1212_s12 = smov 0   ;;  %s1214_s13 = smov 0   ;;  %s1362_s0 = inlined_call_operand.vmem [shape: bf16[1024,128], index: 0, kind: input, shape index: {}]   ;;  %s1363_s1 = inlined_call_operand.vmem [shape: bf16[128,128], index: 1, kind: input, shape index: {}]   ;;  %s1364_s2 = inlined_call_operand.vmem [shape: f32[1,128], index: 2, kind: input, shape index: {}]   ;;  %s1365_s3 = inlined_call_operand.vmem [shape: f32[1024,128], index: 3, kind: output, shape index: {}]  }
   0x1   :  { %s1216_s14 = smov 0  }
   0x2 LB: > { %s32_s15 = sadd.s32 1, %s1186_s13  ;;  %p1000_p0 = scmp.ge.s32.totalorder %s1190_s14, 1  ;;  %s1190_s14 = sphi %s1216_s14, %s13_s14   ;;  %s1186_s13 = sphi %s1214_s13, %s1367_s13   ;;  %s1182_s12 = sphi %s1212_s12, %s1366_s12  }
   0x3   : > { %p34_p1 = scmp.ge.s32.totalorder %s32_s15, 4  ;;  %p188_p2 = scmp.lt.s32.totalorder %s1190_s14, 5 }
   0x5   : > { %s1369_s15 = smov (%p34_p1, %s32_s15), 0  ;;  %p189_p3 = pnand %p1000_p0, %p188_p2 }
   0x6   : > { %v1144_v0 = vld [vmem:[%s1363_s1] sm:$0xff] (!%p189_p3)   ;;  %s1001_s18 = sshll.u32 (!%p189_p3), %s1182_s12, 5  ;;  %v1145_v1 = vld [vmem:[%s1363_s1 + $0x8] sm:$0xff] (!%p189_p3)   ;;  %v1146_v2 = vld [vmem:[%s1363_s1 + $0x10] sm:$0xff] (!%p189_p3)  }
   0x7   : > { %192 = sbr.rel (%p189_p3) target bundleno = 283 (0x11b), region = 32  ;;  %p230_p4 = scmp.lt.s32.totalorder (!%p189_p3), %s1001_s18, 127  ;;  %1056 = vmatprep.subr.bf16.mxu0 (!%p189_p3), %v1144_v0  ;;  %1104 = vmatprep.subr.bf16.mxu1 (!%p189_p3), %v1144_v0  ;;  %v1147_v3 = vld [vmem:[%s1363_s1 + $0x18] sm:$0xff] (!%p189_p3)   ;;  %v1148_v6 = vld [vmem:[%s1363_s1 + $0x20] sm:$0xff] (!%p189_p3)   ;;  %v1149_v7 = vld [vmem:[%s1363_s1 + $0x28] sm:$0xff] (!%p189_p3)  }
   0x8   : > { %1057 = vmatpush3.bf16.msra.mxu0 (!%p189_p3), %v1144_v0  ;;  %1112 = vmatpush3.bf16.msra.mxu1 (!%p189_p3), %v1144_v0  ;;  %v1150_v8 = vld [vmem:[%s1363_s1 + $0x30] sm:$0xff] (!%p189_p3)   ;;  %v1151_v9 = vld [vmem:[%s1363_s1 + $0x38] sm:$0xff] (!%p189_p3)   ;;  %v1281_v24 = vld [vmem:[%s1364_s2] ss:$0 sm:$0xff] (!%p189_p3) }
   0x9   : > { %1058 = vmatprep.subr.bf16.mxu0 (!%p189_p3), %v1145_v1  ;;  %1105 = vmatprep.subr.bf16.mxu1 (!%p189_p3), %v1145_v1 }
   0xc   : > { %1059 = vmatpush3.bf16.msra.mxu0 (!%p189_p3), %v1145_v1  ;;  %1113 = vmatpush3.bf16.msra.mxu1 (!%p189_p3), %v1145_v1 }
   0xd   : > { %1060 = vmatprep.subr.bf16.mxu0 (!%p189_p3), %v1146_v2  ;;  %1106 = vmatprep.subr.bf16.mxu1 (!%p189_p3), %v1146_v2 }
   0xe   : > { %s1371_s18 = smov (!%p230_p4, %s1001_s18), 127 }
   0xf   : > { %s1002_s23 = sshll.u32 %s1371_s18, 2  ;;  %s1004_s12 = sshll.u32 %s1371_s18, 3 }
  0x10   : > { %s1245_s26 = scalar_lea.vmem %s1362_s0, %s1002_s23  ;;  %1061 = vmatpush3.bf16.msra.mxu0 %v1146_v2  ;;  %1114 = vmatpush3.bf16.msra.mxu1 %v1146_v2  ;;  %s1289_s19 = scalar_lea.vmem %s1365_s3, %s1004_s12 }
  0x11   : > { %v1152_v4 = vld [vmem:[%s1245_s26] sm:$0xff]   ;;  %1062 = vmatprep.subr.bf16.mxu0 %v1147_v3  ;;  %1107 = vmatprep.subr.bf16.mxu1 %v1147_v3  ;;  %v1154_v10 = vld [vmem:[%s1245_s26 + $0x8] sm:$0xff]   ;;  %v1156_v12 = vld [vmem:[%s1245_s26 + $0x10] sm:$0xff]  }
  0x12   : > { %v1153_v5 = vld [vmem:[%s1245_s26 + $0x40] sm:$0xff]   ;;  %1072 = vmatprep.mubr.bf16.mxu0 %v1152_v4  ;;  %v1155_v11 = vld [vmem:[%s1245_s26 + $0x48] sm:$0xff]   ;;  %v1157_v13 = vld [vmem:[%s1245_s26 + $0x50] sm:$0xff]  }
  0x13   : > { %1088 = vmatprep.mubr.bf16.mxu1 %v1153_v5  ;;  %v1158_v14 = vld [vmem:[%s1245_s26 + $0x18] sm:$0xff]   ;;  %v1160_v16 = vld [vmem:[%s1245_s26 + $0x20] sm:$0xff]   ;;  %v1162_v18 = vld [vmem:[%s1245_s26 + $0x28] sm:$0xff]  }
  0x14   : > { %1063 = vmatpush3.bf16.msra.mxu0 %v1147_v3  ;;  %1115 = vmatpush3.bf16.msra.mxu1 %v1147_v3  ;;  %v1159_v15 = vld [vmem:[%s1245_s26 + $0x58] sm:$0xff]   ;;  %v1161_v17 = vld [vmem:[%s1245_s26 + $0x60] sm:$0xff]   ;;  %v1163_v19 = vld [vmem:[%s1245_s26 + $0x68] sm:$0xff]  }
  0x15   : > { %1064 = vmatprep.subr.bf16.mxu0 %v1148_v6  ;;  %1108 = vmatprep.subr.bf16.mxu1 %v1148_v6  ;;  %v1164_v20 = vld [vmem:[%s1245_s26 + $0x30] sm:$0xff]   ;;  %v1166_v22 = vld [vmem:[%s1245_s26 + $0x38] sm:$0xff]  }
  0x16   : > { %v1165_v21 = vld [vmem:[%s1245_s26 + $0x70] sm:$0xff]   ;;  %v1167_v23 = vld [vmem:[%s1245_s26 + $0x78] sm:$0xff]  }
  0x18   : > { %1065 = vmatpush3.bf16.msra.mxu0 %v1148_v6  ;;  %1116 = vmatpush3.bf16.msra.mxu1 %v1148_v6 }
  0x19   : > { %1066 = vmatprep.subr.bf16.mxu0 %v1149_v7  ;;  %1109 = vmatprep.subr.bf16.mxu1 %v1149_v7 }
  0x1c   : > { %1067 = vmatpush3.bf16.msra.mxu0 %v1149_v7  ;;  %1117 = vmatpush3.bf16.msra.mxu1 %v1149_v7 }
  0x1d   : > { %1068 = vmatprep.subr.bf16.mxu0 %v1150_v8  ;;  %1110 = vmatprep.subr.bf16.mxu1 %v1150_v8 }
  0x20   : > { %1069 = vmatpush3.bf16.msra.mxu0 %v1150_v8  ;;  %1118 = vmatpush3.bf16.msra.mxu1 %v1150_v8 }
  0x21   : > { %1070 = vmatprep.subr.bf16.mxu0 %v1151_v9  ;;  %1111 = vmatprep.subr.bf16.mxu1 %v1151_v9 }
  0x24   : > { %1071 = vmatpush3.bf16.msra.mxu0 %v1151_v9  ;;  %1119 = vmatpush3.bf16.msra.mxu1 %v1151_v9 }
  0x27   : > { %1073 = vmatmul.mubr.bf16.vlgmr.msra.gmra.mrb[0].mxu0 %v1154_v10  ;;  %1089 = vmatmul.mubr.bf16.vlgmr.msra.gmra.mrb[0].mxu1 %v1155_v11 }
  0x28   : > { %1076 = vmatprep.mubr.bf16.mxu0 %v1156_v12  ;;  %1092 = vmatprep.mubr.bf16.mxu1 %v1157_v13 }
  0x2f   : > { %1077 = vmatmul.mubr.bf16.gmra.mrb[4].mxu0 %v1158_v14  ;;  %1093 = vmatmul.mubr.bf16.gmra.mrb[4].mxu1 %v1159_v15 }
  0x30   : > { %1080 = vmatprep.mubr.bf16.mxu0 %v1160_v16  ;;  %1096 = vmatprep.mubr.bf16.mxu1 %v1161_v17 }
  0x37   : > { %1081 = vmatmul.mubr.bf16.gmra.mrb[8].mxu0 %v1162_v18  ;;  %1097 = vmatmul.mubr.bf16.gmra.mrb[8].mxu1 %v1163_v19 }
  0x38   : > { %1084 = vmatprep.mubr.bf16.mxu0 %v1164_v20  ;;  %1100 = vmatprep.mubr.bf16.mxu1 %v1165_v21 }
  0x3f   : > { %1085 = vmatmul.mubr.bf16.gmra.mrb[12].mxu0 %v1166_v22  ;;  %1101 = vmatmul.mubr.bf16.gmra.mrb[12].mxu1 %v1167_v23 }
  0xfa   : > { %v1074_v25 = vpop.f32.mrb[0].mxu0  ;;  %v1090_v26 = vpop.f32.mrb[0].mxu1 }
  0xfb   : > { %v789_v27 = vadd.f32 %v1074_v25, %v1281_v24  ;;  %v805_v28 = vadd.f32 %v1090_v26, %v1281_v24  ;;  %v554_v29 = vpop.f32.mrb[1].mxu0  ;;  %v618_v30 = vpop.f32.mrb[1].mxu1 }
  0xfc   : > { %v787_v31 = vadd.f32 %v1281_v24, %v554_v29  ;;  %v803_v32 = vadd.f32 %v1281_v24, %v618_v30  ;;  %v1075_v33 = vpop.f32.mrb[2].mxu0  ;;  %v1091_v34 = vpop.f32.mrb[2].mxu1 }
  0xfd   : > { %v821_v35 = vmax.f32 %v789_v27, 0.0  ;;  %v837_v36 = vmax.f32 %v805_v28, 0.0  ;;  %v790_v37 = vadd.f32 %v1075_v33, %v1281_v24  ;;  %v806_v38 = vadd.f32 %v1091_v34, %v1281_v24  ;;  %v557_v39 = vpop.f32.mrb[3].mxu0  ;;  %v621_v40 = vpop.f32.mrb[3].mxu1 }
  0xfe   : > { %v819_v41 = vmax.f32 %v787_v31, 0.0  ;;  %v835_v42 = vmax.f32 %v803_v32, 0.0  ;;  %v788_v43 = vadd.f32 %v1281_v24, %v557_v39  ;;  %v804_v44 = vadd.f32 %v1281_v24, %v621_v40 }
  0xff   : > { %853 = vst [vmem:[%s1289_s19 + $0x10] sm:$0xff] %v821_v35  ;;  %869 = vst [vmem:[%s1289_s19 + $0x90] sm:$0xff] %v837_v36  ;;  %v822_v45 = vmax.f32 %v790_v37, 0.0  ;;  %v838_v46 = vmax.f32 %v806_v38, 0.0 }
 0x100   : > { %851 = vst [vmem:[%s1289_s19] sm:$0xff] %v819_v41  ;;  %867 = vst [vmem:[%s1289_s19 + $0x80] sm:$0xff] %v835_v42  ;;  %v820_v47 = vmax.f32 %v788_v43, 0.0  ;;  %v836_v48 = vmax.f32 %v804_v44, 0.0 }
 0x101   : > { %854 = vst [vmem:[%s1289_s19 + $0x18] sm:$0xff] %v822_v45  ;;  %870 = vst [vmem:[%s1289_s19 + $0x98] sm:$0xff] %v838_v46 }
 0x102   : > { %852 = vst [vmem:[%s1289_s19 + $0x8] sm:$0xff] %v820_v47  ;;  %868 = vst [vmem:[%s1289_s19 + $0x88] sm:$0xff] %v836_v48  ;;  %v1078_v49 = vpop.f32.mrb[4].mxu0  ;;  %v1094_v50 = vpop.f32.mrb[4].mxu1 }
 0x103   : > { %v793_v51 = vadd.f32 %v1078_v49, %v1281_v24  ;;  %v809_v52 = vadd.f32 %v1094_v50, %v1281_v24  ;;  %v570_v53 = vpop.f32.mrb[5].mxu0  ;;  %v634_v54 = vpop.f32.mrb[5].mxu1 }
 0x104   : > { %v791_v55 = vadd.f32 %v1281_v24, %v570_v53  ;;  %v807_v56 = vadd.f32 %v1281_v24, %v634_v54  ;;  %v1079_v57 = vpop.f32.mrb[6].mxu0  ;;  %v1095_v58 = vpop.f32.mrb[6].mxu1 }
 0x105   : > { %v825_v59 = vmax.f32 %v793_v51, 0.0  ;;  %v841_v60 = vmax.f32 %v809_v52, 0.0  ;;  %v794_v61 = vadd.f32 %v1079_v57, %v1281_v24  ;;  %v810_v62 = vadd.f32 %v1095_v58, %v1281_v24  ;;  %v573_v63 = vpop.f32.mrb[7].mxu0  ;;  %v637_v0 = vpop.f32.mrb[7].mxu1 }
 0x106   : > { %v823_v1 = vmax.f32 %v791_v55, 0.0  ;;  %v839_v2 = vmax.f32 %v807_v56, 0.0  ;;  %v792_v3 = vadd.f32 %v1281_v24, %v573_v63  ;;  %v808_v4 = vadd.f32 %v1281_v24, %v637_v0 }
 0x107   : > { %857 = vst [vmem:[%s1289_s19 + $0x30] sm:$0xff] %v825_v59  ;;  %873 = vst [vmem:[%s1289_s19 + $0xb0] sm:$0xff] %v841_v60  ;;  %v826_v5 = vmax.f32 %v794_v61, 0.0  ;;  %v842_v6 = vmax.f32 %v810_v62, 0.0 }
 0x108   : > { %855 = vst [vmem:[%s1289_s19 + $0x20] sm:$0xff] %v823_v1  ;;  %871 = vst [vmem:[%s1289_s19 + $0xa0] sm:$0xff] %v839_v2  ;;  %v824_v7 = vmax.f32 %v792_v3, 0.0  ;;  %v840_v8 = vmax.f32 %v808_v4, 0.0 }
 0x109   : > { %858 = vst [vmem:[%s1289_s19 + $0x38] sm:$0xff] %v826_v5  ;;  %874 = vst [vmem:[%s1289_s19 + $0xb8] sm:$0xff] %v842_v6 }
 0x10a   : > { %856 = vst [vmem:[%s1289_s19 + $0x28] sm:$0xff] %v824_v7  ;;  %872 = vst [vmem:[%s1289_s19 + $0xa8] sm:$0xff] %v840_v8  ;;  %v1082_v9 = vpop.f32.mrb[8].mxu0  ;;  %v1098_v10 = vpop.f32.mrb[8].mxu1 }
 0x10b   : > { %v797_v11 = vadd.f32 %v1082_v9, %v1281_v24  ;;  %v813_v12 = vadd.f32 %v1098_v10, %v1281_v24  ;;  %v586_v13 = vpop.f32.mrb[9].mxu0  ;;  %v650_v14 = vpop.f32.mrb[9].mxu1 }
 0x10c   : > { %v795_v15 = vadd.f32 %v1281_v24, %v586_v13  ;;  %v811_v16 = vadd.f32 %v1281_v24, %v650_v14  ;;  %v1083_v17 = vpop.f32.mrb[10].mxu0  ;;  %v1099_v18 = vpop.f32.mrb[10].mxu1 }
 0x10d   : > { %v829_v19 = vmax.f32 %v797_v11, 0.0  ;;  %v845_v20 = vmax.f32 %v813_v12, 0.0  ;;  %v798_v21 = vadd.f32 %v1083_v17, %v1281_v24  ;;  %v814_v22 = vadd.f32 %v1099_v18, %v1281_v24  ;;  %v589_v23 = vpop.f32.mrb[11].mxu0  ;;  %v653_v25 = vpop.f32.mrb[11].mxu1 }
 0x10e   : > { %v827_v26 = vmax.f32 %v795_v15, 0.0  ;;  %v843_v27 = vmax.f32 %v811_v16, 0.0  ;;  %v796_v28 = vadd.f32 %v1281_v24, %v589_v23  ;;  %v812_v29 = vadd.f32 %v1281_v24, %v653_v25 }
 0x10f   : > { %861 = vst [vmem:[%s1289_s19 + $0x50] sm:$0xff] %v829_v19  ;;  %877 = vst [vmem:[%s1289_s19 + $0xd0] sm:$0xff] %v845_v20  ;;  %v830_v30 = vmax.f32 %v798_v21, 0.0  ;;  %v846_v31 = vmax.f32 %v814_v22, 0.0 }
 0x110   : > { %859 = vst [vmem:[%s1289_s19 + $0x40] sm:$0xff] %v827_v26  ;;  %875 = vst [vmem:[%s1289_s19 + $0xc0] sm:$0xff] %v843_v27  ;;  %v828_v32 = vmax.f32 %v796_v28, 0.0  ;;  %v844_v33 = vmax.f32 %v812_v29, 0.0 }
 0x111   : > { %862 = vst [vmem:[%s1289_s19 + $0x58] sm:$0xff] %v830_v30  ;;  %878 = vst [vmem:[%s1289_s19 + $0xd8] sm:$0xff] %v846_v31 }
 0x112   : > { %860 = vst [vmem:[%s1289_s19 + $0x48] sm:$0xff] %v828_v32  ;;  %876 = vst [vmem:[%s1289_s19 + $0xc8] sm:$0xff] %v844_v33  ;;  %v1086_v34 = vpop.f32.mrb[12].mxu0  ;;  %v1102_v35 = vpop.f32.mrb[12].mxu1 }
 0x113   : > { %v801_v36 = vadd.f32 %v1086_v34, %v1281_v24  ;;  %v817_v37 = vadd.f32 %v1102_v35, %v1281_v24  ;;  %v602_v38 = vpop.f32.mrb[13].mxu0  ;;  %v666_v39 = vpop.f32.mrb[13].mxu1 }
 0x114   : > { %v799_v40 = vadd.f32 %v1281_v24, %v602_v38  ;;  %v815_v41 = vadd.f32 %v1281_v24, %v666_v39  ;;  %v1087_v42 = vpop.f32.mrb[14].mxu0  ;;  %v1103_v43 = vpop.f32.mrb[14].mxu1 }
 0x115   : > { %v833_v44 = vmax.f32 %v801_v36, 0.0  ;;  %v849_v45 = vmax.f32 %v817_v37, 0.0  ;;  %v802_v46 = vadd.f32 %v1087_v42, %v1281_v24  ;;  %v818_v47 = vadd.f32 %v1103_v43, %v1281_v24  ;;  %v605_v48 = vpop.f32.mrb[15].mxu0  ;;  %v669_v49 = vpop.f32.mrb[15].mxu1 }
 0x116   : > { %v831_v50 = vmax.f32 %v799_v40, 0.0  ;;  %v847_v51 = vmax.f32 %v815_v41, 0.0  ;;  %v800_v52 = vadd.f32 %v1281_v24, %v605_v48  ;;  %v816_v53 = vadd.f32 %v1281_v24, %v669_v49 }
 0x117   : > { %865 = vst [vmem:[%s1289_s19 + $0x70] sm:$0xff] %v833_v44  ;;  %881 = vst [vmem:[%s1289_s19 + $0xf0] sm:$0xff] %v849_v45  ;;  %v834_v54 = vmax.f32 %v802_v46, 0.0  ;;  %v850_v55 = vmax.f32 %v818_v47, 0.0 }
 0x118   : > { %863 = vst [vmem:[%s1289_s19 + $0x60] sm:$0xff] %v831_v50  ;;  %879 = vst [vmem:[%s1289_s19 + $0xe0] sm:$0xff] %v847_v51  ;;  %v832_v56 = vmax.f32 %v800_v52, 0.0  ;;  %v848_v57 = vmax.f32 %v816_v53, 0.0 }
 0x119   : > { %866 = vst [vmem:[%s1289_s19 + $0x78] sm:$0xff] %v834_v54  ;;  %882 = vst [vmem:[%s1289_s19 + $0xf8] sm:$0xff] %v850_v55 }
 0x11a   : > { %864 = vst [vmem:[%s1289_s19 + $0x68] sm:$0xff] %v832_v56  ;;  %880 = vst [vmem:[%s1289_s19 + $0xe8] sm:$0xff] %v848_v57 }
 0x11b PF: > { %s13_s14 = sadd.s32 1, %s1190_s14   ;;  %s1366_s12 = smov %s1186_s13 }
 0x11c   : > { %p10_p5 = scmp.ge.s32.totalorder %s13_s14, 6   ;;  %s1367_s13 = smov %s1369_s15 }
 0x11e   :  { %12 = sbr.rel (!%p10_p5) target bundleno = 2 (0x2), region = 76 }

// kernel: ocr_forward.21
= control target key start
LH: loop header
LB: loop body
LE: loop exit
PB: predicated region body
PF: predicated region fallthrough
CT: control target
= control target key end

     0   :  { %s1004_s1 = inlined_call_operand.vmem [shape: bf16[128,128], index: 1, kind: input, shape index: {}]   ;;  %s1005_s0 = inlined_call_operand.vmem [shape: bf16[256,128], index: 0, kind: input, shape index: {}]   ;;  %s1006_s2 = inlined_call_operand.vmem [shape: f32[1,128], index: 2, kind: input, shape index: {}]   ;;  %s1007_s3 = inlined_call_operand.vmem [shape: f32[256,128], index: 3, kind: output, shape index: {}]  }
   0x1   :  { %v755_v0 = vld [vmem:[%s1004_s1] sm:$0xff]   ;;  %v756_v1 = vld [vmem:[%s1004_s1 + $0x8] sm:$0xff]   ;;  %v757_v2 = vld [vmem:[%s1004_s1 + $0x10] sm:$0xff]  }
   0x2   :  { %691 = vmatprep.subr.bf16.mxu0 %v755_v0  ;;  %739 = vmatprep.subr.bf16.mxu1 %v755_v0  ;;  %v758_v3 = vld [vmem:[%s1004_s1 + $0x18] sm:$0xff]   ;;  %v763_v4 = vld [vmem:[%s1005_s0] sm:$0xff]   ;;  %v760_v7 = vld [vmem:[%s1004_s1 + $0x28] sm:$0xff]  }
   0x3   :  { %692 = vmatpush3.bf16.msra.mxu0 %v755_v0  ;;  %747 = vmatpush3.bf16.msra.mxu1 %v755_v0  ;;  %v764_v5 = vld [vmem:[%s1005_s0 + $0x40] sm:$0xff]   ;;  %v761_v8 = vld [vmem:[%s1004_s1 + $0x30] sm:$0xff]   ;;  %v762_v9 = vld [vmem:[%s1004_s1 + $0x38] sm:$0xff]  }
   0x4   :  { %693 = vmatprep.subr.bf16.mxu0 %v756_v1  ;;  %740 = vmatprep.subr.bf16.mxu1 %v756_v1  ;;  %v759_v6 = vld [vmem:[%s1004_s1 + $0x20] sm:$0xff]   ;;  %v765_v10 = vld [vmem:[%s1005_s0 + $0x8] sm:$0xff]   ;;  %v767_v12 = vld [vmem:[%s1005_s0 + $0x10] sm:$0xff]  }
   0x5   :  { %707 = vmatprep.mubr.bf16.mxu0 %v763_v4  ;;  %723 = vmatprep.mubr.bf16.mxu1 %v764_v5  ;;  %v766_v11 = vld [vmem:[%s1005_s0 + $0x48] sm:$0xff]   ;;  %v768_v13 = vld [vmem:[%s1005_s0 + $0x50] sm:$0xff]   ;;  %v769_v14 = vld [vmem:[%s1005_s0 + $0x18] sm:$0xff]  }
   0x6   :  { %v770_v15 = vld [vmem:[%s1005_s0 + $0x58] sm:$0xff]   ;;  %v771_v16 = vld [vmem:[%s1005_s0 + $0x20] sm:$0xff]   ;;  %v773_v18 = vld [vmem:[%s1005_s0 + $0x28] sm:$0xff]  }
   0x7   :  { %694 = vmatpush3.bf16.msra.mxu0 %v756_v1  ;;  %748 = vmatpush3.bf16.msra.mxu1 %v756_v1  ;;  %v772_v17 = vld [vmem:[%s1005_s0 + $0x60] sm:$0xff]   ;;  %v774_v19 = vld [vmem:[%s1005_s0 + $0x68] sm:$0xff]   ;;  %v775_v20 = vld [vmem:[%s1005_s0 + $0x30] sm:$0xff]  }
   0x8   :  { %695 = vmatprep.subr.bf16.mxu0 %v757_v2  ;;  %741 = vmatprep.subr.bf16.mxu1 %v757_v2  ;;  %v776_v21 = vld [vmem:[%s1005_s0 + $0x70] sm:$0xff]   ;;  %v777_v22 = vld [vmem:[%s1005_s0 + $0x38] sm:$0xff]   ;;  %v874_v24 = vld [vmem:[%s1006_s2] ss:$0 sm:$0xff] }
   0x9   :  { %v778_v23 = vld [vmem:[%s1005_s0 + $0x78] sm:$0xff]  }
   0xb   :  { %696 = vmatpush3.bf16.msra.mxu0 %v757_v2  ;;  %749 = vmatpush3.bf16.msra.mxu1 %v757_v2 }
   0xc   :  { %697 = vmatprep.subr.bf16.mxu0 %v758_v3  ;;  %742 = vmatprep.subr.bf16.mxu1 %v758_v3 }
   0xf   :  { %698 = vmatpush3.bf16.msra.mxu0 %v758_v3  ;;  %750 = vmatpush3.bf16.msra.mxu1 %v758_v3 }
  0x10   :  { %699 = vmatprep.subr.bf16.mxu0 %v759_v6  ;;  %743 = vmatprep.subr.bf16.mxu1 %v759_v6 }
  0x13   :  { %700 = vmatpush3.bf16.msra.mxu0 %v759_v6  ;;  %751 = vmatpush3.bf16.msra.mxu1 %v759_v6 }
  0x14   :  { %701 = vmatprep.subr.bf16.mxu0 %v760_v7  ;;  %744 = vmatprep.subr.bf16.mxu1 %v760_v7 }
  0x17   :  { %702 = vmatpush3.bf16.msra.mxu0 %v760_v7  ;;  %752 = vmatpush3.bf16.msra.mxu1 %v760_v7 }
  0x18   :  { %703 = vmatprep.subr.bf16.mxu0 %v761_v8  ;;  %745 = vmatprep.subr.bf16.mxu1 %v761_v8 }
  0x1b   :  { %704 = vmatpush3.bf16.msra.mxu0 %v761_v8  ;;  %753 = vmatpush3.bf16.msra.mxu1 %v761_v8 }
  0x1c   :  { %705 = vmatprep.subr.bf16.mxu0 %v762_v9  ;;  %746 = vmatprep.subr.bf16.mxu1 %v762_v9 }
  0x1f   :  { %706 = vmatpush3.bf16.msra.mxu0 %v762_v9  ;;  %754 = vmatpush3.bf16.msra.mxu1 %v762_v9 }
  0x22   :  { %708 = vmatmul.mubr.bf16.vlgmr.msra.gmra.mrb[0].mxu0 %v765_v10  ;;  %724 = vmatmul.mubr.bf16.vlgmr.msra.gmra.mrb[0].mxu1 %v766_v11 }
  0x23   :  { %711 = vmatprep.mubr.bf16.mxu0 %v767_v12  ;;  %727 = vmatprep.mubr.bf16.mxu1 %v768_v13 }
  0x2a   :  { %712 = vmatmul.mubr.bf16.gmra.mrb[4].mxu0 %v769_v14  ;;  %728 = vmatmul.mubr.bf16.gmra.mrb[4].mxu1 %v770_v15 }
  0x2b   :  { %715 = vmatprep.mubr.bf16.mxu0 %v771_v16  ;;  %731 = vmatprep.mubr.bf16.mxu1 %v772_v17 }
  0x32   :  { %716 = vmatmul.mubr.bf16.gmra.mrb[8].mxu0 %v773_v18  ;;  %732 = vmatmul.mubr.bf16.gmra.mrb[8].mxu1 %v774_v19 }
  0x33   :  { %719 = vmatprep.mubr.bf16.mxu0 %v775_v20  ;;  %735 = vmatprep.mubr.bf16.mxu1 %v776_v21 }
  0x3a   :  { %720 = vmatmul.mubr.bf16.gmra.mrb[12].mxu0 %v777_v22  ;;  %736 = vmatmul.mubr.bf16.gmra.mrb[12].mxu1 %v778_v23 }
  0xf5   :  { %v709_v25 = vpop.f32.mrb[0].mxu0  ;;  %v725_v26 = vpop.f32.mrb[0].mxu1 }
  0xf6   :  { %v544_v27 = vadd.f32 %v709_v25, %v874_v24  ;;  %v560_v28 = vadd.f32 %v725_v26, %v874_v24  ;;  %v309_v29 = vpop.f32.mrb[1].mxu0  ;;  %v373_v30 = vpop.f32.mrb[1].mxu1 }
  0xf7   :  { %v542_v31 = vadd.f32 %v874_v24, %v309_v29  ;;  %v558_v32 = vadd.f32 %v874_v24, %v373_v30  ;;  %v710_v33 = vpop.f32.mrb[2].mxu0  ;;  %v726_v34 = vpop.f32.mrb[2].mxu1 }
  0xf8   :  { %v576_v35 = vmax.f32 %v544_v27, 0.0  ;;  %v592_v36 = vmax.f32 %v560_v28, 0.0  ;;  %v545_v37 = vadd.f32 %v710_v33, %v874_v24  ;;  %v561_v38 = vadd.f32 %v726_v34, %v874_v24  ;;  %v312_v39 = vpop.f32.mrb[3].mxu0  ;;  %v376_v40 = vpop.f32.mrb[3].mxu1 }
  0xf9   :  { %v574_v41 = vmax.f32 %v542_v31, 0.0  ;;  %v590_v42 = vmax.f32 %v558_v32, 0.0  ;;  %v543_v43 = vadd.f32 %v874_v24, %v312_v39  ;;  %v559_v44 = vadd.f32 %v874_v24, %v376_v40 }
  0xfa   :  { %608 = vst [vmem:[%s1007_s3 + $0x10] sm:$0xff] %v576_v35  ;;  %624 = vst [vmem:[%s1007_s3 + $0x90] sm:$0xff] %v592_v36  ;;  %v577_v45 = vmax.f32 %v545_v37, 0.0  ;;  %v593_v46 = vmax.f32 %v561_v38, 0.0 }
  0xfb   :  { %606 = vst [vmem:[%s1007_s3] sm:$0xff] %v574_v41  ;;  %622 = vst [vmem:[%s1007_s3 + $0x80] sm:$0xff] %v590_v42  ;;  %v575_v47 = vmax.f32 %v543_v43, 0.0  ;;  %v591_v48 = vmax.f32 %v559_v44, 0.0 }
  0xfc   :  { %609 = vst [vmem:[%s1007_s3 + $0x18] sm:$0xff] %v577_v45  ;;  %625 = vst [vmem:[%s1007_s3 + $0x98] sm:$0xff] %v593_v46 }
  0xfd   :  { %607 = vst [vmem:[%s1007_s3 + $0x8] sm:$0xff] %v575_v47  ;;  %623 = vst [vmem:[%s1007_s3 + $0x88] sm:$0xff] %v591_v48  ;;  %v713_v49 = vpop.f32.mrb[4].mxu0  ;;  %v729_v50 = vpop.f32.mrb[4].mxu1 }
  0xfe   :  { %v548_v51 = vadd.f32 %v713_v49, %v874_v24  ;;  %v564_v52 = vadd.f32 %v729_v50, %v874_v24  ;;  %v325_v53 = vpop.f32.mrb[5].mxu0  ;;  %v389_v54 = vpop.f32.mrb[5].mxu1 }
  0xff   :  { %v546_v55 = vadd.f32 %v874_v24, %v325_v53  ;;  %v562_v56 = vadd.f32 %v874_v24, %v389_v54  ;;  %v714_v57 = vpop.f32.mrb[6].mxu0  ;;  %v730_v58 = vpop.f32.mrb[6].mxu1 }
 0x100   :  { %v580_v59 = vmax.f32 %v548_v51, 0.0  ;;  %v596_v60 = vmax.f32 %v564_v52, 0.0  ;;  %v549_v61 = vadd.f32 %v714_v57, %v874_v24  ;;  %v565_v62 = vadd.f32 %v730_v58, %v874_v24  ;;  %v328_v63 = vpop.f32.mrb[7].mxu0  ;;  %v392_v0 = vpop.f32.mrb[7].mxu1 }
 0x101   :  { %v578_v1 = vmax.f32 %v546_v55, 0.0  ;;  %v594_v2 = vmax.f32 %v562_v56, 0.0  ;;  %v547_v3 = vadd.f32 %v874_v24, %v328_v63  ;;  %v563_v4 = vadd.f32 %v874_v24, %v392_v0 }
 0x102   :  { %612 = vst [vmem:[%s1007_s3 + $0x30] sm:$0xff] %v580_v59  ;;  %628 = vst [vmem:[%s1007_s3 + $0xb0] sm:$0xff] %v596_v60  ;;  %v581_v5 = vmax.f32 %v549_v61, 0.0  ;;  %v597_v6 = vmax.f32 %v565_v62, 0.0 }
 0x103   :  { %610 = vst [vmem:[%s1007_s3 + $0x20] sm:$0xff] %v578_v1  ;;  %626 = vst [vmem:[%s1007_s3 + $0xa0] sm:$0xff] %v594_v2  ;;  %v579_v7 = vmax.f32 %v547_v3, 0.0  ;;  %v595_v8 = vmax.f32 %v563_v4, 0.0 }
 0x104   :  { %613 = vst [vmem:[%s1007_s3 + $0x38] sm:$0xff] %v581_v5  ;;  %629 = vst [vmem:[%s1007_s3 + $0xb8] sm:$0xff] %v597_v6 }
 0x105   :  { %611 = vst [vmem:[%s1007_s3 + $0x28] sm:$0xff] %v579_v7  ;;  %627 = vst [vmem:[%s1007_s3 + $0xa8] sm:$0xff] %v595_v8  ;;  %v717_v9 = vpop.f32.mrb[8].mxu0  ;;  %v733_v10 = vpop.f32.mrb[8].mxu1 }
 0x106   :  { %v552_v11 = vadd.f32 %v717_v9, %v874_v24  ;;  %v568_v12 = vadd.f32 %v733_v10, %v874_v24  ;;  %v341_v13 = vpop.f32.mrb[9].mxu0  ;;  %v405_v14 = vpop.f32.mrb[9].mxu1 }
 0x107   :  { %v550_v15 = vadd.f32 %v874_v24, %v341_v13  ;;  %v566_v16 = vadd.f32 %v874_v24, %v405_v14  ;;  %v718_v17 = vpop.f32.mrb[10].mxu0  ;;  %v734_v18 = vpop.f32.mrb[10].mxu1 }
 0x108   :  { %v584_v19 = vmax.f32 %v552_v11, 0.0  ;;  %v600_v20 = vmax.f32 %v568_v12, 0.0  ;;  %v553_v21 = vadd.f32 %v718_v17, %v874_v24  ;;  %v569_v22 = vadd.f32 %v734_v18, %v874_v24  ;;  %v344_v23 = vpop.f32.mrb[11].mxu0  ;;  %v408_v25 = vpop.f32.mrb[11].mxu1 }
 0x109   :  { %v582_v26 = vmax.f32 %v550_v15, 0.0  ;;  %v598_v27 = vmax.f32 %v566_v16, 0.0  ;;  %v551_v28 = vadd.f32 %v874_v24, %v344_v23  ;;  %v567_v29 = vadd.f32 %v874_v24, %v408_v25 }
 0x10a   :  { %616 = vst [vmem:[%s1007_s3 + $0x50] sm:$0xff] %v584_v19  ;;  %632 = vst [vmem:[%s1007_s3 + $0xd0] sm:$0xff] %v600_v20  ;;  %v585_v30 = vmax.f32 %v553_v21, 0.0  ;;  %v601_v31 = vmax.f32 %v569_v22, 0.0 }
 0x10b   :  { %614 = vst [vmem:[%s1007_s3 + $0x40] sm:$0xff] %v582_v26  ;;  %630 = vst [vmem:[%s1007_s3 + $0xc0] sm:$0xff] %v598_v27  ;;  %v583_v32 = vmax.f32 %v551_v28, 0.0  ;;  %v599_v33 = vmax.f32 %v567_v29, 0.0 }
 0x10c   :  { %617 = vst [vmem:[%s1007_s3 + $0x58] sm:$0xff] %v585_v30  ;;  %633 = vst [vmem:[%s1007_s3 + $0xd8] sm:$0xff] %v601_v31 }
 0x10d   :  { %615 = vst [vmem:[%s1007_s3 + $0x48] sm:$0xff] %v583_v32  ;;  %631 = vst [vmem:[%s1007_s3 + $0xc8] sm:$0xff] %v599_v33  ;;  %v721_v34 = vpop.f32.mrb[12].mxu0  ;;  %v737_v35 = vpop.f32.mrb[12].mxu1 }
 0x10e   :  { %v556_v36 = vadd.f32 %v721_v34, %v874_v24  ;;  %v572_v37 = vadd.f32 %v737_v35, %v874_v24  ;;  %v357_v38 = vpop.f32.mrb[13].mxu0  ;;  %v421_v39 = vpop.f32.mrb[13].mxu1 }
 0x10f   :  { %v554_v40 = vadd.f32 %v874_v24, %v357_v38  ;;  %v570_v41 = vadd.f32 %v874_v24, %v421_v39  ;;  %v722_v42 = vpop.f32.mrb[14].mxu0  ;;  %v738_v43 = vpop.f32.mrb[14].mxu1 }
 0x110   :  { %v588_v44 = vmax.f32 %v556_v36, 0.0  ;;  %v604_v45 = vmax.f32 %v572_v37, 0.0  ;;  %v557_v46 = vadd.f32 %v722_v42, %v874_v24  ;;  %v573_v47 = vadd.f32 %v738_v43, %v874_v24  ;;  %v360_v48 = vpop.f32.mrb[15].mxu0  ;;  %v424_v49 = vpop.f32.mrb[15].mxu1 }
 0x111   :  { %v586_v50 = vmax.f32 %v554_v40, 0.0  ;;  %v602_v51 = vmax.f32 %v570_v41, 0.0  ;;  %v555_v52 = vadd.f32 %v874_v24, %v360_v48  ;;  %v571_v53 = vadd.f32 %v874_v24, %v424_v49 }
 0x112   :  { %620 = vst [vmem:[%s1007_s3 + $0x70] sm:$0xff] %v588_v44  ;;  %636 = vst [vmem:[%s1007_s3 + $0xf0] sm:$0xff] %v604_v45  ;;  %v589_v54 = vmax.f32 %v557_v46, 0.0  ;;  %v605_v55 = vmax.f32 %v573_v47, 0.0 }
 0x113   :  { %618 = vst [vmem:[%s1007_s3 + $0x60] sm:$0xff] %v586_v50  ;;  %634 = vst [vmem:[%s1007_s3 + $0xe0] sm:$0xff] %v602_v51  ;;  %v587_v56 = vmax.f32 %v555_v52, 0.0  ;;  %v603_v24 = vmax.f32 %v571_v53, 0.0 }
 0x114   :  { %621 = vst [vmem:[%s1007_s3 + $0x78] sm:$0xff] %v589_v54  ;;  %637 = vst [vmem:[%s1007_s3 + $0xf8] sm:$0xff] %v605_v55 }
 0x115   :  { %619 = vst [vmem:[%s1007_s3 + $0x68] sm:$0xff] %v587_v56  ;;  %635 = vst [vmem:[%s1007_s3 + $0xe8] sm:$0xff] %v603_v24 }

// kernel: ocr_forward.22
= control target key start
LH: loop header
LB: loop body
LE: loop exit
PB: predicated region body
PF: predicated region fallthrough
CT: control target
= control target key end

     0   :  { %s1308_s1 = inlined_call_operand.vmem [shape: bf16[256,128], index: 1, kind: input, shape index: {}]   ;;  %s1309_s0 = inlined_call_operand.vmem [shape: bf16[256,256], index: 0, kind: input, shape index: {}]   ;;  %s1310_s2 = inlined_call_operand.vmem [shape: f32[1,128], index: 2, kind: input, shape index: {}]   ;;  %s1311_s3 = inlined_call_operand.vmem [shape: f32[256,128], index: 3, kind: output, shape index: {}]  }
   0x1   :  { %v947_v0 = vld [vmem:[%s1308_s1 + $0x40] sm:$0xff]   ;;  %v949_v2 = vld [vmem:[%s1308_s1 + $0x48] sm:$0xff]   ;;  %v951_v4 = vld [vmem:[%s1308_s1 + $0x50] sm:$0xff]  }
   0x2   :  { %v948_v1 = vld [vmem:[%s1308_s1] sm:$0xff]   ;;  %819 = vmatprep.subr.bf16.mxu0 %v947_v0  ;;  %931 = vmatprep.subr.bf16.mxu1 %v947_v0  ;;  %v950_v3 = vld [vmem:[%s1308_s1 + $0x8] sm:$0xff]   ;;  %v952_v5 = vld [vmem:[%s1308_s1 + $0x10] sm:$0xff]  }
   0x3   :  { %820 = vmatpush3.bf16.msra.mxu0 %v948_v1  ;;  %939 = vmatpush3.bf16.msra.mxu1 %v948_v1  ;;  %v953_v6 = vld [vmem:[%s1308_s1 + $0x58] sm:$0xff]   ;;  %v955_v8 = vld [vmem:[%s1308_s1 + $0x60] sm:$0xff]   ;;  %v957_v10 = vld [vmem:[%s1308_s1 + $0x68] sm:$0xff]  }
   0x4   :  { %821 = vmatprep.subr.bf16.mxu0 %v949_v2  ;;  %932 = vmatprep.subr.bf16.mxu1 %v949_v2  ;;  %v954_v7 = vld [vmem:[%s1308_s1 + $0x18] sm:$0xff]   ;;  %v956_v9 = vld [vmem:[%s1308_s1 + $0x20] sm:$0xff]   ;;  %v958_v13 = vld [vmem:[%s1308_s1 + $0x28] sm:$0xff]  }
   0x5   :  { %v965_v11 = vld [vmem:[%s1309_s0 + $0x4] ss:$8 sps:$4 sm:$0xff]   ;;  %v959_v14 = vld [vmem:[%s1308_s1 + $0x70] sm:$0xff]   ;;  %v961_v16 = vld [vmem:[%s1308_s1 + $0x78] sm:$0xff]  }
   0x6   :  { %v968_v12 = vld [vmem:[%s1309_s0 + $0x84] ss:$8 sps:$4 sm:$0xff]   ;;  %435 = vmatprep.mubr.bf16.mxu0 %v965_v11  ;;  %v960_v15 = vld [vmem:[%s1308_s1 + $0x30] sm:$0xff]   ;;  %v962_v17 = vld [vmem:[%s1308_s1 + $0x38] sm:$0xff]  }
   0x7   :  { %822 = vmatpush3.bf16.msra.mxu0 %v950_v3  ;;  %940 = vmatpush3.bf16.msra.mxu1 %v950_v3  ;;  %v963_v18 = vld [vmem:[%s1309_s0] ss:$8 sps:$4 sm:$0xff]   ;;  %v969_v20 = vld [vmem:[%s1309_s0 + $0x14] ss:$8 sps:$4 sm:$0xff]   ;;  %v973_v22 = vld [vmem:[%s1309_s0 + $0x10] ss:$8 sps:$4 sm:$0xff]  }
   0x8   :  { %823 = vmatprep.subr.bf16.mxu0 %v951_v4  ;;  %933 = vmatprep.subr.bf16.mxu1 %v951_v4  ;;  %v966_v19 = vld [vmem:[%s1309_s0 + $0x80] ss:$8 sps:$4 sm:$0xff]   ;;  %v971_v21 = vld [vmem:[%s1309_s0 + $0x94] ss:$8 sps:$4 sm:$0xff]   ;;  %v974_v23 = vld [vmem:[%s1309_s0 + $0x90] ss:$8 sps:$4 sm:$0xff]  }
   0x9   :  { %499 = vmatprep.mubr.bf16.mxu1 %v968_v12  ;;  %v975_v24 = vld [vmem:[%s1309_s0 + $0x24] ss:$8 sps:$4 sm:$0xff]   ;;  %v979_v26 = vld [vmem:[%s1309_s0 + $0x20] ss:$8 sps:$4 sm:$0xff]   ;;  %v981_v28 = vld [vmem:[%s1309_s0 + $0x34] ss:$8 sps:$4 sm:$0xff]  }
   0xa   :  { %v977_v25 = vld [vmem:[%s1309_s0 + $0xa4] ss:$8 sps:$4 sm:$0xff]   ;;  %v980_v27 = vld [vmem:[%s1309_s0 + $0xa0] ss:$8 sps:$4 sm:$0xff]   ;;  %v983_v29 = vld [vmem:[%s1309_s0 + $0xb4] ss:$8 sps:$4 sm:$0xff]  }
   0xb   :  { %824 = vmatpush3.bf16.msra.mxu0 %v952_v5  ;;  %941 = vmatpush3.bf16.msra.mxu1 %v952_v5  ;;  %v985_v30 = vld [vmem:[%s1309_s0 + $0x30] ss:$8 sps:$4 sm:$0xff]   ;;  %v987_v32 = vld [vmem:[%s1309_s0 + $0x44] ss:$8 sps:$4 sm:$0xff]   ;;  %v991_v34 = vld [vmem:[%s1309_s0 + $0x40] ss:$8 sps:$4 sm:$0xff]  }
   0xc   :  { %825 = vmatprep.subr.bf16.mxu0 %v953_v6  ;;  %934 = vmatprep.subr.bf16.mxu1 %v953_v6  ;;  %v986_v31 = vld [vmem:[%s1309_s0 + $0xb0] ss:$8 sps:$4 sm:$0xff]   ;;  %v989_v33 = vld [vmem:[%s1309_s0 + $0xc4] ss:$8 sps:$4 sm:$0xff]   ;;  %v992_v35 = vld [vmem:[%s1309_s0 + $0xc0] ss:$8 sps:$4 sm:$0xff]  }
   0xd   :  { %v993_v36 = vld [vmem:[%s1309_s0 + $0x54] ss:$8 sps:$4 sm:$0xff]   ;;  %v997_v38 = vld [vmem:[%s1309_s0 + $0x50] ss:$8 sps:$4 sm:$0xff]   ;;  %v999_v40 = vld [vmem:[%s1309_s0 + $0x64] ss:$8 sps:$4 sm:$0xff]  }
   0xe   :  { %v995_v37 = vld [vmem:[%s1309_s0 + $0xd4] ss:$8 sps:$4 sm:$0xff]   ;;  %v998_v39 = vld [vmem:[%s1309_s0 + $0xd0] ss:$8 sps:$4 sm:$0xff]   ;;  %v1001_v41 = vld [vmem:[%s1309_s0 + $0xe4] ss:$8 sps:$4 sm:$0xff]  }
   0xf   :  { %826 = vmatpush3.bf16.msra.mxu0 %v954_v7  ;;  %942 = vmatpush3.bf16.msra.mxu1 %v954_v7  ;;  %v1003_v42 = vld [vmem:[%s1309_s0 + $0x60] ss:$8 sps:$4 sm:$0xff]   ;;  %v1005_v44 = vld [vmem:[%s1309_s0 + $0x74] ss:$8 sps:$4 sm:$0xff]   ;;  %v1009_v46 = vld [vmem:[%s1309_s0 + $0x70] ss:$8 sps:$4 sm:$0xff]  }
  0x10   :  { %827 = vmatprep.subr.bf16.mxu0 %v955_v8  ;;  %935 = vmatprep.subr.bf16.mxu1 %v955_v8  ;;  %v1004_v43 = vld [vmem:[%s1309_s0 + $0xe0] ss:$8 sps:$4 sm:$0xff]   ;;  %v1007_v45 = vld [vmem:[%s1309_s0 + $0xf4] ss:$8 sps:$4 sm:$0xff]   ;;  %v1010_v47 = vld [vmem:[%s1309_s0 + $0xf0] ss:$8 sps:$4 sm:$0xff]  }
  0x11   :  { %v1178_v51 = vld [vmem:[%s1310_s2] ss:$0 sm:$0xff] }
  0x13   :  { %828 = vmatpush3.bf16.msra.mxu0 %v956_v9  ;;  %943 = vmatpush3.bf16.msra.mxu1 %v956_v9 }
  0x14   :  { %829 = vmatprep.subr.bf16.mxu0 %v957_v10  ;;  %936 = vmatprep.subr.bf16.mxu1 %v957_v10 }
  0x17   :  { %830 = vmatpush3.bf16.msra.mxu0 %v958_v13  ;;  %944 = vmatpush3.bf16.msra.mxu1 %v958_v13 }
  0x18   :  { %831 = vmatprep.subr.bf16.mxu0 %v959_v14  ;;  %937 = vmatprep.subr.bf16.mxu1 %v959_v14 }
  0x1b   :  { %832 = vmatpush3.bf16.msra.mxu0 %v960_v15  ;;  %945 = vmatpush3.bf16.msra.mxu1 %v960_v15 }
  0x1c   :  { %833 = vmatprep.subr.bf16.mxu0 %v961_v16  ;;  %938 = vmatprep.subr.bf16.mxu1 %v961_v16 }
  0x1f   :  { %834 = vmatpush3.bf16.msra.mxu0 %v962_v17  ;;  %946 = vmatpush3.bf16.msra.mxu1 %v962_v17 }
  0x22   :  { %436 = vmatmul.mubr.bf16.vlgmr.msra.gmra.mrb[0].mxu0 %v963_v18  ;;  %500 = vmatmul.mubr.bf16.vlgmr.msra.gmra.mrb[0].mxu1 %v966_v19 }
  0x23   :  { %443 = vmatprep.mubr.bf16.mxu0 %v969_v20  ;;  %507 = vmatprep.mubr.bf16.mxu1 %v971_v21 }
  0x2a   :  { %444 = vmatmul.mubr.bf16.gmra.mrb[4].mxu0 %v973_v22  ;;  %508 = vmatmul.mubr.bf16.gmra.mrb[4].mxu1 %v974_v23 }
  0x2b   :  { %451 = vmatprep.mubr.bf16.mxu0 %v975_v24  ;;  %515 = vmatprep.mubr.bf16.mxu1 %v977_v25 }
  0x32   :  { %452 = vmatmul.mubr.bf16.gmra.mrb[8].mxu0 %v979_v26  ;;  %516 = vmatmul.mubr.bf16.gmra.mrb[8].mxu1 %v980_v27 }
  0x33   :  { %459 = vmatprep.mubr.bf16.mxu0 %v981_v28  ;;  %523 = vmatprep.mubr.bf16.mxu1 %v983_v29 }
  0x3a   :  { %460 = vmatmul.mubr.bf16.gmra.mrb[12].mxu0 %v985_v30  ;;  %524 = vmatmul.mubr.bf16.gmra.mrb[12].mxu1 %v986_v31 }
  0x3b   :  { %467 = vmatprep.mubr.bf16.mxu0 %v987_v32  ;;  %531 = vmatprep.mubr.bf16.mxu1 %v989_v33 }
  0x42   :  { %468 = vmatmul.mubr.bf16.gmra.mrb[16].mxu0 %v991_v34  ;;  %532 = vmatmul.mubr.bf16.gmra.mrb[16].mxu1 %v992_v35 }
  0x43   :  { %475 = vmatprep.mubr.bf16.mxu0 %v993_v36  ;;  %539 = vmatprep.mubr.bf16.mxu1 %v995_v37 }
  0x4a   :  { %476 = vmatmul.mubr.bf16.gmra.mrb[20].mxu0 %v997_v38  ;;  %540 = vmatmul.mubr.bf16.gmra.mrb[20].mxu1 %v998_v39 }
  0x4b   :  { %483 = vmatprep.mubr.bf16.mxu0 %v999_v40  ;;  %547 = vmatprep.mubr.bf16.mxu1 %v1001_v41 }
  0x52   :  { %484 = vmatmul.mubr.bf16.gmra.mrb[24].mxu0 %v1003_v42  ;;  %548 = vmatmul.mubr.bf16.gmra.mrb[24].mxu1 %v1004_v43 }
  0x53   :  { %491 = vmatprep.mubr.bf16.mxu0 %v1005_v44  ;;  %555 = vmatprep.mubr.bf16.mxu1 %v1007_v45 }
  0x5a   :  { %492 = vmatmul.mubr.bf16.gmra.mrb[28].mxu0 %v1009_v46  ;;  %556 = vmatmul.mubr.bf16.gmra.mrb[28].mxu1 %v1010_v47 }
  0xf5   :  { %v835_v48 = vpop.f32.mrb[0].mxu0  ;;  %v883_v49 = vpop.f32.mrb[0].mxu1 }
  0xf6   :  { %v836_v50 = vpop.f32.mrb[1].mxu0  ;;  %v884_v52 = vpop.f32.mrb[1].mxu1 }
  0xf7   :  { %v837_v53 = vadd.f32 %v836_v50, %v835_v48  ;;  %v885_v54 = vadd.f32 %v884_v52, %v883_v49  ;;  %v838_v55 = vpop.f32.mrb[2].mxu0  ;;  %v886_v56 = vpop.f32.mrb[2].mxu1 }
  0xf8   :  { %v839_v57 = vpop.f32.mrb[3].mxu0  ;;  %v887_v58 = vpop.f32.mrb[3].mxu1 }
  0xf9   :  { %v670_v59 = vadd.f32 %v837_v53, %v1178_v51  ;;  %v686_v60 = vadd.f32 %v885_v54, %v1178_v51  ;;  %v840_v61 = vadd.f32 %v839_v57, %v838_v55  ;;  %v888_v62 = vadd.f32 %v887_v58, %v886_v56 }
  0xfb   :  { %v702_v63 = vmax.f32 %v670_v59, 0.0  ;;  %v718_v0 = vmax.f32 %v686_v60, 0.0  ;;  %v671_v1 = vadd.f32 %v840_v61, %v1178_v51  ;;  %v687_v2 = vadd.f32 %v888_v62, %v1178_v51 }
  0xfd   :  { %734 = vst [vmem:[%s1311_s3] sm:$0xff] %v702_v63  ;;  %750 = vst [vmem:[%s1311_s3 + $0x80] sm:$0xff] %v718_v0  ;;  %v703_v3 = vmax.f32 %v671_v1, 0.0  ;;  %v719_v4 = vmax.f32 %v687_v2, 0.0  ;;  %v841_v5 = vpop.f32.mrb[4].mxu0  ;;  %v889_v6 = vpop.f32.mrb[4].mxu1 }
  0xfe   :  { %v842_v7 = vpop.f32.mrb[5].mxu0  ;;  %v890_v8 = vpop.f32.mrb[5].mxu1 }
  0xff   :  { %735 = vst [vmem:[%s1311_s3 + $0x8] sm:$0xff] %v703_v3  ;;  %751 = vst [vmem:[%s1311_s3 + $0x88] sm:$0xff] %v719_v4  ;;  %v843_v9 = vadd.f32 %v842_v7, %v841_v5  ;;  %v891_v10 = vadd.f32 %v890_v8, %v889_v6  ;;  %v844_v11 = vpop.f32.mrb[6].mxu0  ;;  %v892_v12 = vpop.f32.mrb[6].mxu1 }
 0x100   :  { %v845_v13 = vpop.f32.mrb[7].mxu0  ;;  %v893_v14 = vpop.f32.mrb[7].mxu1 }
 0x101   :  { %v672_v15 = vadd.f32 %v843_v9, %v1178_v51  ;;  %v688_v16 = vadd.f32 %v891_v10, %v1178_v51  ;;  %v846_v17 = vadd.f32 %v845_v13, %v844_v11  ;;  %v894_v18 = vadd.f32 %v893_v14, %v892_v12 }
 0x103   :  { %v704_v19 = vmax.f32 %v672_v15, 0.0  ;;  %v720_v20 = vmax.f32 %v688_v16, 0.0  ;;  %v673_v21 = vadd.f32 %v846_v17, %v1178_v51  ;;  %v689_v22 = vadd.f32 %v894_v18, %v1178_v51 }
 0x105   :  { %736 = vst [vmem:[%s1311_s3 + $0x10] sm:$0xff] %v704_v19  ;;  %752 = vst [vmem:[%s1311_s3 + $0x90] sm:$0xff] %v720_v20  ;;  %v705_v23 = vmax.f32 %v673_v21, 0.0  ;;  %v721_v24 = vmax.f32 %v689_v22, 0.0  ;;  %v847_v25 = vpop.f32.mrb[8].mxu0  ;;  %v895_v26 = vpop.f32.mrb[8].mxu1 }
 0x106   :  { %v848_v27 = vpop.f32.mrb[9].mxu0  ;;  %v896_v28 = vpop.f32.mrb[9].mxu1 }
 0x107   :  { %737 = vst [vmem:[%s1311_s3 + $0x18] sm:$0xff] %v705_v23  ;;  %753 = vst [vmem:[%s1311_s3 + $0x98] sm:$0xff] %v721_v24  ;;  %v849_v29 = vadd.f32 %v848_v27, %v847_v25  ;;  %v897_v30 = vadd.f32 %v896_v28, %v895_v26  ;;  %v850_v31 = vpop.f32.mrb[10].mxu0  ;;  %v898_v32 = vpop.f32.mrb[10].mxu1 }
 0x108   :  { %v851_v33 = vpop.f32.mrb[11].mxu0  ;;  %v899_v34 = vpop.f32.mrb[11].mxu1 }
 0x109   :  { %v674_v35 = vadd.f32 %v849_v29, %v1178_v51  ;;  %v690_v36 = vadd.f32 %v897_v30, %v1178_v51  ;;  %v852_v37 = vadd.f32 %v851_v33, %v850_v31  ;;  %v900_v38 = vadd.f32 %v899_v34, %v898_v32 }
 0x10b   :  { %v706_v39 = vmax.f32 %v674_v35, 0.0  ;;  %v722_v40 = vmax.f32 %v690_v36, 0.0  ;;  %v675_v41 = vadd.f32 %v852_v37, %v1178_v51  ;;  %v691_v42 = vadd.f32 %v900_v38, %v1178_v51 }
 0x10d   :  { %738 = vst [vmem:[%s1311_s3 + $0x20] sm:$0xff] %v706_v39  ;;  %754 = vst [vmem:[%s1311_s3 + $0xa0] sm:$0xff] %v722_v40  ;;  %v707_v43 = vmax.f32 %v675_v41, 0.0  ;;  %v723_v44 = vmax.f32 %v691_v42, 0.0  ;;  %v853_v45 = vpop.f32.mrb[12].mxu0  ;;  %v901_v46 = vpop.f32.mrb[12].mxu1 }
 0x10e   :  { %v854_v47 = vpop.f32.mrb[13].mxu0  ;;  %v902_v48 = vpop.f32.mrb[13].mxu1 }
 0x10f   :  { %739 = vst [vmem:[%s1311_s3 + $0x28] sm:$0xff] %v707_v43  ;;  %755 = vst [vmem:[%s1311_s3 + $0xa8] sm:$0xff] %v723_v44  ;;  %v855_v49 = vadd.f32 %v854_v47, %v853_v45  ;;  %v903_v50 = vadd.f32 %v902_v48, %v901_v46  ;;  %v856_v52 = vpop.f32.mrb[14].mxu0  ;;  %v904_v53 = vpop.f32.mrb[14].mxu1 }
 0x110   :  { %v857_v54 = vpop.f32.mrb[15].mxu0  ;;  %v905_v55 = vpop.f32.mrb[15].mxu1 }
 0x111   :  { %v676_v56 = vadd.f32 %v855_v49, %v1178_v51  ;;  %v692_v57 = vadd.f32 %v903_v50, %v1178_v51  ;;  %v858_v58 = vadd.f32 %v857_v54, %v856_v52  ;;  %v906_v59 = vadd.f32 %v905_v55, %v904_v53 }
 0x113   :  { %v708_v60 = vmax.f32 %v676_v56, 0.0  ;;  %v724_v61 = vmax.f32 %v692_v57, 0.0  ;;  %v677_v62 = vadd.f32 %v858_v58, %v1178_v51  ;;  %v693_v63 = vadd.f32 %v906_v59, %v1178_v51 }
 0x115   :  { %740 = vst [vmem:[%s1311_s3 + $0x30] sm:$0xff] %v708_v60  ;;  %756 = vst [vmem:[%s1311_s3 + $0xb0] sm:$0xff] %v724_v61  ;;  %v709_v0 = vmax.f32 %v677_v62, 0.0  ;;  %v725_v1 = vmax.f32 %v693_v63, 0.0  ;;  %v859_v2 = vpop.f32.mrb[16].mxu0  ;;  %v907_v3 = vpop.f32.mrb[16].mxu1 }
 0x116   :  { %v860_v4 = vpop.f32.mrb[17].mxu0  ;;  %v908_v5 = vpop.f32.mrb[17].mxu1 }
 0x117   :  { %741 = vst [vmem:[%s1311_s3 + $0x38] sm:$0xff] %v709_v0  ;;  %757 = vst [vmem:[%s1311_s3 + $0xb8] sm:$0xff] %v725_v1  ;;  %v861_v6 = vadd.f32 %v860_v4, %v859_v2  ;;  %v909_v7 = vadd.f32 %v908_v5, %v907_v3  ;;  %v862_v8 = vpop.f32.mrb[18].mxu0  ;;  %v910_v9 = vpop.f32.mrb[18].mxu1 }
 0x118   :  { %v863_v10 = vpop.f32.mrb[19].mxu0  ;;  %v911_v11 = vpop.f32.mrb[19].mxu1 }
 0x119   :  { %v678_v12 = vadd.f32 %v861_v6, %v1178_v51  ;;  %v694_v13 = vadd.f32 %v909_v7, %v1178_v51  ;;  %v864_v14 = vadd.f32 %v863_v10, %v862_v8  ;;  %v912_v15 = vadd.f32 %v911_v11, %v910_v9 }
 0x11b   :  { %v710_v16 = vmax.f32 %v678_v12, 0.0  ;;  %v726_v17 = vmax.f32 %v694_v13, 0.0  ;;  %v679_v18 = vadd.f32 %v864_v14, %v1178_v51  ;;  %v695_v19 = vadd.f32 %v912_v15, %v1178_v51 }
 0x11d   :  { %742 = vst [vmem:[%s1311_s3 + $0x40] sm:$0xff] %v710_v16  ;;  %758 = vst [vmem:[%s1311_s3 + $0xc0] sm:$0xff] %v726_v17  ;;  %v711_v20 = vmax.f32 %v679_v18, 0.0  ;;  %v727_v21 = vmax.f32 %v695_v19, 0.0  ;;  %v865_v22 = vpop.f32.mrb[20].mxu0  ;;  %v913_v23 = vpop.f32.mrb[20].mxu1 }
 0x11e   :  { %v866_v24 = vpop.f32.mrb[21].mxu0  ;;  %v914_v25 = vpop.f32.mrb[21].mxu1 }
 0x11f   :  { %743 = vst [vmem:[%s1311_s3 + $0x48] sm:$0xff] %v711_v20  ;;  %759 = vst [vmem:[%s1311_s3 + $0xc8] sm:$0xff] %v727_v21  ;;  %v867_v26 = vadd.f32 %v866_v24, %v865_v22  ;;  %v915_v27 = vadd.f32 %v914_v25, %v913_v23  ;;  %v868_v28 = vpop.f32.mrb[22].mxu0  ;;  %v916_v29 = vpop.f32.mrb[22].mxu1 }
 0x120   :  { %v869_v30 = vpop.f32.mrb[23].mxu0  ;;  %v917_v31 = vpop.f32.mrb[23].mxu1 }
 0x121   :  { %v680_v32 = vadd.f32 %v867_v26, %v1178_v51  ;;  %v696_v33 = vadd.f32 %v915_v27, %v1178_v51  ;;  %v870_v34 = vadd.f32 %v869_v30, %v868_v28  ;;  %v918_v35 = vadd.f32 %v917_v31, %v916_v29 }
 0x123   :  { %v712_v36 = vmax.f32 %v680_v32, 0.0  ;;  %v728_v37 = vmax.f32 %v696_v33, 0.0  ;;  %v681_v38 = vadd.f32 %v870_v34, %v1178_v51  ;;  %v697_v39 = vadd.f32 %v918_v35, %v1178_v51 }
 0x125   :  { %744 = vst [vmem:[%s1311_s3 + $0x50] sm:$0xff] %v712_v36  ;;  %760 = vst [vmem:[%s1311_s3 + $0xd0] sm:$0xff] %v728_v37  ;;  %v713_v40 = vmax.f32 %v681_v38, 0.0  ;;  %v729_v41 = vmax.f32 %v697_v39, 0.0  ;;  %v871_v42 = vpop.f32.mrb[24].mxu0  ;;  %v919_v43 = vpop.f32.mrb[24].mxu1 }
 0x126   :  { %v872_v44 = vpop.f32.mrb[25].mxu0  ;;  %v920_v45 = vpop.f32.mrb[25].mxu1 }
 0x127   :  { %745 = vst [vmem:[%s1311_s3 + $0x58] sm:$0xff] %v713_v40  ;;  %761 = vst [vmem:[%s1311_s3 + $0xd8] sm:$0xff] %v729_v41  ;;  %v873_v46 = vadd.f32 %v872_v44, %v871_v42  ;;  %v921_v47 = vadd.f32 %v920_v45, %v919_v43  ;;  %v874_v48 = vpop.f32.mrb[26].mxu0  ;;  %v922_v49 = vpop.f32.mrb[26].mxu1 }
 0x128   :  { %v875_v50 = vpop.f32.mrb[27].mxu0  ;;  %v923_v52 = vpop.f32.mrb[27].mxu1 }
 0x129   :  { %v682_v53 = vadd.f32 %v873_v46, %v1178_v51  ;;  %v698_v54 = vadd.f32 %v921_v47, %v1178_v51  ;;  %v876_v55 = vadd.f32 %v875_v50, %v874_v48  ;;  %v924_v56 = vadd.f32 %v923_v52, %v922_v49 }
 0x12b   :  { %v714_v57 = vmax.f32 %v682_v53, 0.0  ;;  %v730_v58 = vmax.f32 %v698_v54, 0.0  ;;  %v683_v59 = vadd.f32 %v876_v55, %v1178_v51  ;;  %v699_v60 = vadd.f32 %v924_v56, %v1178_v51 }
 0x12d   :  { %746 = vst [vmem:[%s1311_s3 + $0x60] sm:$0xff] %v714_v57  ;;  %762 = vst [vmem:[%s1311_s3 + $0xe0] sm:$0xff] %v730_v58  ;;  %v715_v61 = vmax.f32 %v683_v59, 0.0  ;;  %v731_v62 = vmax.f32 %v699_v60, 0.0  ;;  %v877_v63 = vpop.f32.mrb[28].mxu0  ;;  %v925_v0 = vpop.f32.mrb[28].mxu1 }
 0x12e   :  { %v878_v1 = vpop.f32.mrb[29].mxu0  ;;  %v926_v2 = vpop.f32.mrb[29].mxu1 }
 0x12f   :  { %747 = vst [vmem:[%s1311_s3 + $0x68] sm:$0xff] %v715_v61  ;;  %763 = vst [vmem:[%s1311_s3 + $0xe8] sm:$0xff] %v731_v62  ;;  %v879_v3 = vadd.f32 %v878_v1, %v877_v63  ;;  %v927_v4 = vadd.f32 %v926_v2, %v925_v0  ;;  %v880_v5 = vpop.f32.mrb[30].mxu0  ;;  %v928_v6 = vpop.f32.mrb[30].mxu1 }
 0x130   :  { %v881_v7 = vpop.f32.mrb[31].mxu0  ;;  %v929_v8 = vpop.f32.mrb[31].mxu1 }
 0x131   :  { %v684_v9 = vadd.f32 %v879_v3, %v1178_v51  ;;  %v700_v10 = vadd.f32 %v927_v4, %v1178_v51  ;;  %v882_v11 = vadd.f32 %v881_v7, %v880_v5  ;;  %v930_v12 = vadd.f32 %v929_v8, %v928_v6 }
 0x133   :  { %v716_v13 = vmax.f32 %v684_v9, 0.0  ;;  %v732_v14 = vmax.f32 %v700_v10, 0.0  ;;  %v685_v15 = vadd.f32 %v882_v11, %v1178_v51  ;;  %v701_v16 = vadd.f32 %v930_v12, %v1178_v51 }
 0x135   :  { %748 = vst [vmem:[%s1311_s3 + $0x70] sm:$0xff] %v716_v13  ;;  %764 = vst [vmem:[%s1311_s3 + $0xf0] sm:$0xff] %v732_v14  ;;  %v717_v17 = vmax.f32 %v685_v15, 0.0  ;;  %v733_v18 = vmax.f32 %v701_v16, 0.0 }
 0x137   :  { %749 = vst [vmem:[%s1311_s3 + $0x78] sm:$0xff] %v717_v17  ;;  %765 = vst [vmem:[%s1311_s3 + $0xf8] sm:$0xff] %v733_v18 }

// kernel: ocr_forward.23
= control target key start
LH: loop header
LB: loop body
LE: loop exit
PB: predicated region body
PF: predicated region fallthrough
CT: control target
= control target key end

     0   :  { %s820_s1 = inlined_call_operand.vmem [shape: bf16[256,128], index: 1, kind: input, shape index: {}]   ;;  %s821_s0 = inlined_call_operand.vmem [shape: bf16[128,256], index: 0, kind: input, shape index: {}]   ;;  %s822_s2 = inlined_call_operand.vmem [shape: f32[1,128], index: 2, kind: input, shape index: {}]   ;;  %s823_s3 = inlined_call_operand.vmem [shape: f32[128,128], index: 3, kind: output, shape index: {}]  }
   0x1   :  { %v595_v0 = vld [vmem:[%s820_s1 + $0x40] sm:$0xff]   ;;  %v597_v2 = vld [vmem:[%s820_s1 + $0x48] sm:$0xff]   ;;  %v599_v4 = vld [vmem:[%s820_s1 + $0x50] sm:$0xff]  }
   0x2   :  { %v596_v1 = vld [vmem:[%s820_s1] sm:$0xff]   ;;  %515 = vmatprep.subr.bf16.mxu0 %v595_v0  ;;  %579 = vmatprep.subr.bf16.mxu1 %v595_v0  ;;  %v598_v3 = vld [vmem:[%s820_s1 + $0x8] sm:$0xff]   ;;  %v600_v5 = vld [vmem:[%s820_s1 + $0x10] sm:$0xff]  }
   0x3   :  { %516 = vmatpush3.bf16.msra.mxu0 %v596_v1  ;;  %587 = vmatpush3.bf16.msra.mxu1 %v596_v1  ;;  %v601_v6 = vld [vmem:[%s820_s1 + $0x58] sm:$0xff]   ;;  %v603_v8 = vld [vmem:[%s820_s1 + $0x60] sm:$0xff]   ;;  %v605_v10 = vld [vmem:[%s820_s1 + $0x68] sm:$0xff]  }
   0x4   :  { %517 = vmatprep.subr.bf16.mxu0 %v597_v2  ;;  %580 = vmatprep.subr.bf16.mxu1 %v597_v2  ;;  %v602_v7 = vld [vmem:[%s820_s1 + $0x18] sm:$0xff]   ;;  %v604_v9 = vld [vmem:[%s820_s1 + $0x20] sm:$0xff]   ;;  %v606_v13 = vld [vmem:[%s820_s1 + $0x28] sm:$0xff]  }
   0x5   :  { %v613_v11 = vld [vmem:[%s821_s0 + $0x4] ss:$8 sps:$4 sm:$0xff]   ;;  %v607_v14 = vld [vmem:[%s820_s1 + $0x70] sm:$0xff]   ;;  %v609_v16 = vld [vmem:[%s820_s1 + $0x78] sm:$0xff]  }
   0x6   :  { %v616_v12 = vld [vmem:[%s821_s0 + $0x44] ss:$8 sps:$4 sm:$0xff]   ;;  %307 = vmatprep.mubr.bf16.mxu0 %v613_v11  ;;  %v608_v15 = vld [vmem:[%s820_s1 + $0x30] sm:$0xff]   ;;  %v610_v17 = vld [vmem:[%s820_s1 + $0x38] sm:$0xff]  }
   0x7   :  { %518 = vmatpush3.bf16.msra.mxu0 %v598_v3  ;;  %588 = vmatpush3.bf16.msra.mxu1 %v598_v3  ;;  %v611_v18 = vld [vmem:[%s821_s0] ss:$8 sps:$4 sm:$0xff]   ;;  %v617_v20 = vld [vmem:[%s821_s0 + $0x14] ss:$8 sps:$4 sm:$0xff]   ;;  %v621_v22 = vld [vmem:[%s821_s0 + $0x10] ss:$8 sps:$4 sm:$0xff]  }
   0x8   :  { %519 = vmatprep.subr.bf16.mxu0 %v599_v4  ;;  %581 = vmatprep.subr.bf16.mxu1 %v599_v4  ;;  %v614_v19 = vld [vmem:[%s821_s0 + $0x40] ss:$8 sps:$4 sm:$0xff]   ;;  %v619_v21 = vld [vmem:[%s821_s0 + $0x54] ss:$8 sps:$4 sm:$0xff]   ;;  %v622_v23 = vld [vmem:[%s821_s0 + $0x50] ss:$8 sps:$4 sm:$0xff]  }
   0x9   :  { %339 = vmatprep.mubr.bf16.mxu1 %v616_v12  ;;  %v623_v24 = vld [vmem:[%s821_s0 + $0x24] ss:$8 sps:$4 sm:$0xff]   ;;  %v627_v26 = vld [vmem:[%s821_s0 + $0x20] ss:$8 sps:$4 sm:$0xff]   ;;  %v629_v28 = vld [vmem:[%s821_s0 + $0x34] ss:$8 sps:$4 sm:$0xff]  }
   0xa   :  { %v625_v25 = vld [vmem:[%s821_s0 + $0x64] ss:$8 sps:$4 sm:$0xff]   ;;  %v628_v27 = vld [vmem:[%s821_s0 + $0x60] ss:$8 sps:$4 sm:$0xff]   ;;  %v631_v29 = vld [vmem:[%s821_s0 + $0x74] ss:$8 sps:$4 sm:$0xff]  }
   0xb   :  { %520 = vmatpush3.bf16.msra.mxu0 %v600_v5  ;;  %589 = vmatpush3.bf16.msra.mxu1 %v600_v5  ;;  %v633_v30 = vld [vmem:[%s821_s0 + $0x30] ss:$8 sps:$4 sm:$0xff]   ;;  %v754_v35 = vld [vmem:[%s822_s2] ss:$0 sm:$0xff] }
   0xc   :  { %521 = vmatprep.subr.bf16.mxu0 %v601_v6  ;;  %582 = vmatprep.subr.bf16.mxu1 %v601_v6  ;;  %v634_v31 = vld [vmem:[%s821_s0 + $0x70] ss:$8 sps:$4 sm:$0xff]  }
   0xf   :  { %522 = vmatpush3.bf16.msra.mxu0 %v602_v7  ;;  %590 = vmatpush3.bf16.msra.mxu1 %v602_v7 }
  0x10   :  { %523 = vmatprep.subr.bf16.mxu0 %v603_v8  ;;  %583 = vmatprep.subr.bf16.mxu1 %v603_v8 }
  0x13   :  { %524 = vmatpush3.bf16.msra.mxu0 %v604_v9  ;;  %591 = vmatpush3.bf16.msra.mxu1 %v604_v9 }
  0x14   :  { %525 = vmatprep.subr.bf16.mxu0 %v605_v10  ;;  %584 = vmatprep.subr.bf16.mxu1 %v605_v10 }
  0x17   :  { %526 = vmatpush3.bf16.msra.mxu0 %v606_v13  ;;  %592 = vmatpush3.bf16.msra.mxu1 %v606_v13 }
  0x18   :  { %527 = vmatprep.subr.bf16.mxu0 %v607_v14  ;;  %585 = vmatprep.subr.bf16.mxu1 %v607_v14 }
  0x1b   :  { %528 = vmatpush3.bf16.msra.mxu0 %v608_v15  ;;  %593 = vmatpush3.bf16.msra.mxu1 %v608_v15 }
  0x1c   :  { %529 = vmatprep.subr.bf16.mxu0 %v609_v16  ;;  %586 = vmatprep.subr.bf16.mxu1 %v609_v16 }
  0x1f   :  { %530 = vmatpush3.bf16.msra.mxu0 %v610_v17  ;;  %594 = vmatpush3.bf16.msra.mxu1 %v610_v17 }
  0x22   :  { %308 = vmatmul.mubr.bf16.vlgmr.msra.gmra.mrb[0].mxu0 %v611_v18  ;;  %340 = vmatmul.mubr.bf16.vlgmr.msra.gmra.mrb[0].mxu1 %v614_v19 }
  0x23   :  { %315 = vmatprep.mubr.bf16.mxu0 %v617_v20  ;;  %347 = vmatprep.mubr.bf16.mxu1 %v619_v21 }
  0x2a   :  { %316 = vmatmul.mubr.bf16.gmra.mrb[4].mxu0 %v621_v22  ;;  %348 = vmatmul.mubr.bf16.gmra.mrb[4].mxu1 %v622_v23 }
  0x2b   :  { %323 = vmatprep.mubr.bf16.mxu0 %v623_v24  ;;  %355 = vmatprep.mubr.bf16.mxu1 %v625_v25 }
  0x32   :  { %324 = vmatmul.mubr.bf16.gmra.mrb[8].mxu0 %v627_v26  ;;  %356 = vmatmul.mubr.bf16.gmra.mrb[8].mxu1 %v628_v27 }
  0x33   :  { %331 = vmatprep.mubr.bf16.mxu0 %v629_v28  ;;  %363 = vmatprep.mubr.bf16.mxu1 %v631_v29 }
  0x3a   :  { %332 = vmatmul.mubr.bf16.gmra.mrb[12].mxu0 %v633_v30  ;;  %364 = vmatmul.mubr.bf16.gmra.mrb[12].mxu1 %v634_v31 }
  0xf5   :  { %v531_v32 = vpop.f32.mrb[0].mxu0  ;;  %v555_v33 = vpop.f32.mrb[0].mxu1 }
  0xf6   :  { %v532_v34 = vpop.f32.mrb[1].mxu0  ;;  %v556_v36 = vpop.f32.mrb[1].mxu1 }
  0xf7   :  { %v533_v37 = vadd.f32 %v532_v34, %v531_v32  ;;  %v557_v38 = vadd.f32 %v556_v36, %v555_v33  ;;  %v534_v39 = vpop.f32.mrb[2].mxu0  ;;  %v558_v40 = vpop.f32.mrb[2].mxu1 }
  0xf8   :  { %v535_v41 = vpop.f32.mrb[3].mxu0  ;;  %v559_v42 = vpop.f32.mrb[3].mxu1 }
  0xf9   :  { %v430_v43 = vadd.f32 %v533_v37, %v754_v35  ;;  %v438_v44 = vadd.f32 %v557_v38, %v754_v35  ;;  %v536_v45 = vadd.f32 %v535_v41, %v534_v39  ;;  %v560_v46 = vadd.f32 %v559_v42, %v558_v40 }
  0xfb   :  { %v446_v47 = vmax.f32 %v430_v43, 0.0  ;;  %v454_v48 = vmax.f32 %v438_v44, 0.0  ;;  %v431_v49 = vadd.f32 %v536_v45, %v754_v35  ;;  %v439_v50 = vadd.f32 %v560_v46, %v754_v35 }
  0xfd   :  { %462 = vst [vmem:[%s823_s3] sm:$0xff] %v446_v47  ;;  %470 = vst [vmem:[%s823_s3 + $0x40] sm:$0xff] %v454_v48  ;;  %v447_v51 = vmax.f32 %v431_v49, 0.0  ;;  %v455_v52 = vmax.f32 %v439_v50, 0.0  ;;  %v537_v53 = vpop.f32.mrb[4].mxu0  ;;  %v561_v54 = vpop.f32.mrb[4].mxu1 }
  0xfe   :  { %v538_v55 = vpop.f32.mrb[5].mxu0  ;;  %v562_v56 = vpop.f32.mrb[5].mxu1 }
  0xff   :  { %463 = vst [vmem:[%s823_s3 + $0x8] sm:$0xff] %v447_v51  ;;  %471 = vst [vmem:[%s823_s3 + $0x48] sm:$0xff] %v455_v52  ;;  %v539_v57 = vadd.f32 %v538_v55, %v537_v53  ;;  %v563_v58 = vadd.f32 %v562_v56, %v561_v54  ;;  %v540_v59 = vpop.f32.mrb[6].mxu0  ;;  %v564_v60 = vpop.f32.mrb[6].mxu1 }
 0x100   :  { %v541_v61 = vpop.f32.mrb[7].mxu0  ;;  %v565_v62 = vpop.f32.mrb[7].mxu1 }
 0x101   :  { %v432_v63 = vadd.f32 %v539_v57, %v754_v35  ;;  %v440_v0 = vadd.f32 %v563_v58, %v754_v35  ;;  %v542_v1 = vadd.f32 %v541_v61, %v540_v59  ;;  %v566_v2 = vadd.f32 %v565_v62, %v564_v60 }
 0x103   :  { %v448_v3 = vmax.f32 %v432_v63, 0.0  ;;  %v456_v4 = vmax.f32 %v440_v0, 0.0  ;;  %v433_v5 = vadd.f32 %v542_v1, %v754_v35  ;;  %v441_v6 = vadd.f32 %v566_v2, %v754_v35 }
 0x105   :  { %464 = vst [vmem:[%s823_s3 + $0x10] sm:$0xff] %v448_v3  ;;  %472 = vst [vmem:[%s823_s3 + $0x50] sm:$0xff] %v456_v4  ;;  %v449_v7 = vmax.f32 %v433_v5, 0.0  ;;  %v457_v8 = vmax.f32 %v441_v6, 0.0  ;;  %v543_v9 = vpop.f32.mrb[8].mxu0  ;;  %v567_v10 = vpop.f32.mrb[8].mxu1 }
 0x106   :  { %v544_v11 = vpop.f32.mrb[9].mxu0  ;;  %v568_v12 = vpop.f32.mrb[9].mxu1 }
 0x107   :  { %465 = vst [vmem:[%s823_s3 + $0x18] sm:$0xff] %v449_v7  ;;  %473 = vst [vmem:[%s823_s3 + $0x58] sm:$0xff] %v457_v8  ;;  %v545_v13 = vadd.f32 %v544_v11, %v543_v9  ;;  %v569_v14 = vadd.f32 %v568_v12, %v567_v10  ;;  %v546_v15 = vpop.f32.mrb[10].mxu0  ;;  %v570_v16 = vpop.f32.mrb[10].mxu1 }
 0x108   :  { %v547_v17 = vpop.f32.mrb[11].mxu0  ;;  %v571_v18 = vpop.f32.mrb[11].mxu1 }
 0x109   :  { %v434_v19 = vadd.f32 %v545_v13, %v754_v35  ;;  %v442_v20 = vadd.f32 %v569_v14, %v754_v35  ;;  %v548_v21 = vadd.f32 %v547_v17, %v546_v15  ;;  %v572_v22 = vadd.f32 %v571_v18, %v570_v16 }
 0x10b   :  { %v450_v23 = vmax.f32 %v434_v19, 0.0  ;;  %v458_v24 = vmax.f32 %v442_v20, 0.0  ;;  %v435_v25 = vadd.f32 %v548_v21, %v754_v35  ;;  %v443_v26 = vadd.f32 %v572_v22, %v754_v35 }
 0x10d   :  { %466 = vst [vmem:[%s823_s3 + $0x20] sm:$0xff] %v450_v23  ;;  %474 = vst [vmem:[%s823_s3 + $0x60] sm:$0xff] %v458_v24  ;;  %v451_v27 = vmax.f32 %v435_v25, 0.0  ;;  %v459_v28 = vmax.f32 %v443_v26, 0.0  ;;  %v549_v29 = vpop.f32.mrb[12].mxu0  ;;  %v573_v30 = vpop.f32.mrb[12].mxu1 }
 0x10e   :  { %v550_v31 = vpop.f32.mrb[13].mxu0  ;;  %v574_v32 = vpop.f32.mrb[13].mxu1 }
 0x10f   :  { %467 = vst [vmem:[%s823_s3 + $0x28] sm:$0xff] %v451_v27  ;;  %475 = vst [vmem:[%s823_s3 + $0x68] sm:$0xff] %v459_v28  ;;  %v551_v33 = vadd.f32 %v550_v31, %v549_v29  ;;  %v575_v34 = vadd.f32 %v574_v32, %v573_v30  ;;  %v552_v36 = vpop.f32.mrb[14].mxu0  ;;  %v576_v37 = vpop.f32.mrb[14].mxu1 }
 0x110   :  { %v553_v38 = vpop.f32.mrb[15].mxu0  ;;  %v577_v39 = vpop.f32.mrb[15].mxu1 }
 0x111   :  { %v436_v40 = vadd.f32 %v551_v33, %v754_v35  ;;  %v444_v41 = vadd.f32 %v575_v34, %v754_v35  ;;  %v554_v42 = vadd.f32 %v553_v38, %v552_v36  ;;  %v578_v43 = vadd.f32 %v577_v39, %v576_v37 }
 0x113   :  { %v452_v44 = vmax.f32 %v436_v40, 0.0  ;;  %v460_v45 = vmax.f32 %v444_v41, 0.0  ;;  %v437_v46 = vadd.f32 %v554_v42, %v754_v35  ;;  %v445_v47 = vadd.f32 %v578_v43, %v754_v35 }
 0x115   :  { %468 = vst [vmem:[%s823_s3 + $0x30] sm:$0xff] %v452_v44  ;;  %476 = vst [vmem:[%s823_s3 + $0x70] sm:$0xff] %v460_v45  ;;  %v453_v48 = vmax.f32 %v437_v46, 0.0  ;;  %v461_v49 = vmax.f32 %v445_v47, 0.0 }
 0x117   :  { %469 = vst [vmem:[%s823_s3 + $0x38] sm:$0xff] %v453_v48  ;;  %477 = vst [vmem:[%s823_s3 + $0x78] sm:$0xff] %v461_v49 }

// kernel: ocr_forward.24
= control target key start
LH: loop header
LB: loop body
LE: loop exit
PB: predicated region body
PF: predicated region fallthrough
CT: control target
= control target key end

     0   :  { %s1197_s12 = smov 0   ;;  %s1199_s13 = smov 0   ;;  %s1369_s0 = inlined_call_operand.vmem [shape: bf16[128,512], index: 0, kind: input, shape index: {}]   ;;  %s1370_s1 = inlined_call_operand.vmem [shape: bf16[512,128], index: 1, kind: input, shape index: {}]   ;;  %s1371_s2 = inlined_call_operand.vmem [shape: f32[1,128], index: 2, kind: input, shape index: {}]   ;;  %s1372_s3 = inlined_call_operand.vmem [shape: f32[128,128], index: 3, kind: output, shape index: {}]  }
   0x1   :  { %s1201_s14 = smov 0   ;;  %s1203_s15 = smov 0  }
   0x2   :  { %s1205_s16 = smov 0  }
   0x3 LB: > { %s25_s17 = sadd.s32 1, %s1170_s15  ;;  %p48_p1 = scmp.ne.s32.totalorder %s1162_s13, %s1158_s12  ;;  %s1174_s16 = sphi %s1205_s16, %s13_s16   ;;  %s1170_s15 = sphi %s1203_s15, %s1376_s15   ;;  %s1166_s14 = sphi %s1201_s14, %s1375_s14   ;;  %s1162_s13 = sphi %s1199_s13, %s1374_s13   ;;  %s1158_s12 = sphi %s1197_s12, %s1373_s12  }
   0x4   : > { %p26_p0 = scmp.ge.s32.totalorder %s25_s17, 2  ;;  %p49_p2 = scmp.eq.s32.totalorder %s1174_s16, 0 }
   0x5   : > { %s41_s19 = sadd.s32 1, %s1162_s13  ;;  %p927_p5 = scmp.ge.s32.totalorder %s1174_s16, 2 }
   0x6   : > { %s1378_s17 = smov (%p26_p0, %s25_s17), 0  ;;  %p50_p3 = por %p49_p2, %p48_p1 }
   0x7   : > { %s37_s18 = ssub.s32 %s1170_s15, %s1378_s17  ;;  %162 = sbr.rel (%p927_p5) target bundleno = 26 (0x1a), region = 20 }
   0x8   : > { %p39_p4 = scmp.eq.s32.totalorder %s37_s18, 0 }
   0xa   : > { %s1232_s20 = scalar_select %p39_p4, %s1162_s13, %s41_s19  }
   0xe   : > { %165 = sbr.rel (!%p50_p3) target bundleno = 26 (0x1a), region = 24  ;;  %s167_s21 = sand.u32 (%p50_p3), 1, %s1162_s13  }
   0xf   : > { %s974_s22 = sshll.u32 (%p50_p3), %s1170_s15, 3  ;;  %s928_s23 = sshll.u32 (%p50_p3), %s167_s21, 7 }
  0x10   : > { %s1240_s26 = scalar_lea.vmem (%p50_p3), %s1369_s0, %s974_s22  ;;  %s169_s27 = scalar_lea.vmem (%p50_p3), [#allocation3], %s928_s23 }
  0x11   : > { %v233_v0 = vld [vmem:[%s1240_s26] sm:$0xff] (%p50_p3)  ;;  %v235_v1 = vld [vmem:[%s1240_s26 + $0x10] sm:$0xff] (%p50_p3) }
  0x12   : > { %v237_v2 = vld [vmem:[%s1240_s26 + $0x20] sm:$0xff] (%p50_p3)  ;;  %234 = vst [vmem:[%s169_s27] sm:$0xff] (%p50_p3), %v233_v0  ;;  %236 = vst [vmem:[%s169_s27 + $0x8] sm:$0xff] (%p50_p3), %v235_v1  ;;  %v239_v3 = vld [vmem:[%s1240_s26 + $0x30] sm:$0xff] (%p50_p3) }
  0x13   : > { %238 = vst [vmem:[%s169_s27 + $0x10] sm:$0xff] (%p50_p3), %v237_v2  ;;  %v241_v4 = vld [vmem:[%s1240_s26 + $0x40] sm:$0xff] (%p50_p3)  ;;  %v243_v5 = vld [vmem:[%s1240_s26 + $0x50] sm:$0xff] (%p50_p3)  ;;  %240 = vst [vmem:[%s169_s27 + $0x18] sm:$0xff] (%p50_p3), %v239_v3 }
  0x14   : > { %242 = vst [vmem:[%s169_s27 + $0x20] sm:$0xff] (%p50_p3), %v241_v4  ;;  %244 = vst [vmem:[%s169_s27 + $0x28] sm:$0xff] (%p50_p3), %v243_v5  ;;  %v245_v6 = vld [vmem:[%s1240_s26 + $0x60] sm:$0xff] (%p50_p3)  ;;  %v247_v7 = vld [vmem:[%s1240_s26 + $0x70] sm:$0xff] (%p50_p3) }
  0x15   : > { %v249_v8 = vld [vmem:[%s1240_s26 + $0x80] sm:$0xff]  ;;  %246 = vst [vmem:[%s169_s27 + $0x30] sm:$0xff] %v245_v6  ;;  %248 = vst [vmem:[%s169_s27 + $0x38] sm:$0xff] %v247_v7  ;;  %v251_v9 = vld [vmem:[%s1240_s26 + $0x90] sm:$0xff] }
  0x16   : > { %250 = vst [vmem:[%s169_s27 + $0x40] sm:$0xff] %v249_v8  ;;  %v253_v10 = vld [vmem:[%s1240_s26 + $0xa0] sm:$0xff]  ;;  %v255_v11 = vld [vmem:[%s1240_s26 + $0xb0] sm:$0xff]  ;;  %252 = vst [vmem:[%s169_s27 + $0x48] sm:$0xff] %v251_v9 }
  0x17   : > { %254 = vst [vmem:[%s169_s27 + $0x50] sm:$0xff] %v253_v10  ;;  %256 = vst [vmem:[%s169_s27 + $0x58] sm:$0xff] %v255_v11  ;;  %v257_v12 = vld [vmem:[%s1240_s26 + $0xc0] sm:$0xff]  ;;  %v259_v13 = vld [vmem:[%s1240_s26 + $0xd0] sm:$0xff] }
  0x18   : > { %v261_v14 = vld [vmem:[%s1240_s26 + $0xe0] sm:$0xff]  ;;  %258 = vst [vmem:[%s169_s27 + $0x60] sm:$0xff] %v257_v12  ;;  %260 = vst [vmem:[%s169_s27 + $0x68] sm:$0xff] %v259_v13  ;;  %v263_v15 = vld [vmem:[%s1240_s26 + $0xf0] sm:$0xff] }
  0x19   : > { %262 = vst [vmem:[%s169_s27 + $0x70] sm:$0xff] %v261_v14  ;;  %264 = vst [vmem:[%s169_s27 + $0x78] sm:$0xff] %v263_v15 }
  0x1a PF: > { %p931_p6 = scmp.ge.s32.totalorder %s1174_s16, 1  ;;  %p281_p7 = scmp.lt.s32.totalorder %s1174_s16, 3 }
  0x1c   : > { %p282_p8 = pnand %p931_p6, %p281_p7 }
  0x1d   : > { %s288_s28 = sand.u32 (!%p282_p8), 1, %s1158_s12   ;;  %s933_s29 = sshll.u32 (!%p282_p8), %s1166_s14, 5 }
  0x1e   : > { %285 = sbr.rel (%p282_p8) target bundleno = 337 (0x151), region = 66  ;;  %s932_s30 = sshll.u32 (!%p282_p8), %s288_s28, 7 }
  0x1f   : > { %p328_p9 = scmp.lt.s32.totalorder (!%p282_p8), %s933_s29, 63  ;;  %s1267_s8 = scalar_lea.vmem (!%p282_p8), [#allocation3], %s932_s30 }
  0x20   : > { %p935_p10 = scmp.ne.s32.totalorder (!%p282_p8), %s1166_s14, 0 }
  0x25   : > { %s1380_s29 = smov (!%p328_p9, %s933_s29), 63  ;;  %352 = sbr.rel (%p935_p10) target bundleno = 47 (0x2f), region = 74 }
  0x26   : > { %s934_s4 = sshll.u32 %s1380_s29, 2  ;;  %v1176_v16 = vmov (!%p935_p10), 0.0  }
  0x27   : > { %s1265_s7 = scalar_lea.vmem %s1370_s1, %s934_s4  ;;  %353 = vst [vmem:[#allocation2] sm:$0xff] (!%p935_p10), %v1176_v16  ;;  %354 = vst [vmem:[#allocation2 + $0x8] sm:$0xff] (!%p935_p10), %v1176_v16 }
  0x28   : > { %355 = vst [vmem:[#allocation2 + $0x10] sm:$0xff] (!%p935_p10), %v1176_v16  ;;  %356 = vst [vmem:[#allocation2 + $0x18] sm:$0xff] (!%p935_p10), %v1176_v16 }
  0x29   : > { %357 = vst [vmem:[#allocation2 + $0x20] sm:$0xff] (!%p935_p10), %v1176_v16  ;;  %358 = vst [vmem:[#allocation2 + $0x28] sm:$0xff] (!%p935_p10), %v1176_v16 }
  0x2a   : > { %359 = vst [vmem:[#allocation2 + $0x30] sm:$0xff] (!%p935_p10), %v1176_v16  ;;  %360 = vst [vmem:[#allocation2 + $0x38] sm:$0xff] (!%p935_p10), %v1176_v16 }
  0x2b   : > { %361 = vst [vmem:[#allocation2 + $0x40] sm:$0xff] (!%p935_p10), %v1176_v16  ;;  %362 = vst [vmem:[#allocation2 + $0x48] sm:$0xff] (!%p935_p10), %v1176_v16 }
  0x2c   : > { %363 = vst [vmem:[#allocation2 + $0x50] sm:$0xff] %v1176_v16  ;;  %364 = vst [vmem:[#allocation2 + $0x58] sm:$0xff] %v1176_v16 }
  0x2d   : > { %365 = vst [vmem:[#allocation2 + $0x60] sm:$0xff] %v1176_v16  ;;  %366 = vst [vmem:[#allocation2 + $0x68] sm:$0xff] %v1176_v16 }
  0x2e   : > { %367 = vst [vmem:[#allocation2 + $0x70] sm:$0xff] %v1176_v16  ;;  %368 = vst [vmem:[#allocation2 + $0x78] sm:$0xff] %v1176_v16 }
  0x2f PF: > { %v1096_v17 = vld [vmem:[%s1265_s7 + $0x40] sm:$0xff]   ;;  %v1098_v19 = vld [vmem:[%s1265_s7 + $0x48] sm:$0xff]   ;;  %v1100_v21 = vld [vmem:[%s1265_s7 + $0x50] sm:$0xff]   ;;  %p968_p11 = scmp.ne.s32.totalorder %s1166_s14, 1 }
  0x30   : > { %v1097_v18 = vld [vmem:[%s1265_s7] sm:$0xff]   ;;  %975 = vmatprep.subr.bf16.mxu0 %v1096_v17  ;;  %1039 = vmatprep.subr.bf16.mxu1 %v1096_v17  ;;  %v1099_v20 = vld [vmem:[%s1265_s7 + $0x8] sm:$0xff]   ;;  %v1101_v22 = vld [vmem:[%s1265_s7 + $0x10] sm:$0xff]  }
  0x31   : > { %976 = vmatpush3.bf16.msra.mxu0 %v1097_v18  ;;  %1047 = vmatpush3.bf16.msra.mxu1 %v1097_v18  ;;  %v1102_v23 = vld [vmem:[%s1265_s7 + $0x58] sm:$0xff]   ;;  %v1104_v25 = vld [vmem:[%s1265_s7 + $0x60] sm:$0xff]   ;;  %v1106_v27 = vld [vmem:[%s1265_s7 + $0x68] sm:$0xff]  }
  0x32   : > { %977 = vmatprep.subr.bf16.mxu0 %v1098_v19  ;;  %1040 = vmatprep.subr.bf16.mxu1 %v1098_v19  ;;  %v1103_v24 = vld [vmem:[%s1265_s7 + $0x18] sm:$0xff]   ;;  %v1105_v26 = vld [vmem:[%s1265_s7 + $0x20] sm:$0xff]   ;;  %v1107_v30 = vld [vmem:[%s1265_s7 + $0x28] sm:$0xff]  }
  0x33   : > { %v1114_v28 = vld [vmem:[%s1267_s8 + $0x4] ss:$8 sps:$4 sm:$0xff]   ;;  %v1108_v31 = vld [vmem:[%s1265_s7 + $0x70] sm:$0xff]   ;;  %v1110_v33 = vld [vmem:[%s1265_s7 + $0x78] sm:$0xff]  }
  0x34   : > { %v1117_v29 = vld [vmem:[%s1267_s8 + $0x44] ss:$8 sps:$4 sm:$0xff]   ;;  %641 = vmatprep.mubr.bf16.mxu0 %v1114_v28  ;;  %v1109_v32 = vld [vmem:[%s1265_s7 + $0x30] sm:$0xff]   ;;  %v1111_v34 = vld [vmem:[%s1265_s7 + $0x38] sm:$0xff]  }
  0x35   : > { %978 = vmatpush3.bf16.msra.mxu0 %v1099_v20  ;;  %1048 = vmatpush3.bf16.msra.mxu1 %v1099_v20  ;;  %v1112_v35 = vld [vmem:[%s1267_s8] ss:$8 sps:$4 sm:$0xff]   ;;  %v1118_v37 = vld [vmem:[%s1267_s8 + $0x14] ss:$8 sps:$4 sm:$0xff]   ;;  %v1122_v39 = vld [vmem:[%s1267_s8 + $0x10] ss:$8 sps:$4 sm:$0xff]  }
  0x36   : > { %979 = vmatprep.subr.bf16.mxu0 %v1100_v21  ;;  %1041 = vmatprep.subr.bf16.mxu1 %v1100_v21  ;;  %v1115_v36 = vld [vmem:[%s1267_s8 + $0x40] ss:$8 sps:$4 sm:$0xff]   ;;  %v1120_v38 = vld [vmem:[%s1267_s8 + $0x54] ss:$8 sps:$4 sm:$0xff]   ;;  %v1123_v40 = vld [vmem:[%s1267_s8 + $0x50] ss:$8 sps:$4 sm:$0xff]  }
  0x37   : > { %673 = vmatprep.mubr.bf16.mxu1 %v1117_v29  ;;  %v1124_v41 = vld [vmem:[%s1267_s8 + $0x24] ss:$8 sps:$4 sm:$0xff]   ;;  %v1128_v43 = vld [vmem:[%s1267_s8 + $0x20] ss:$8 sps:$4 sm:$0xff]   ;;  %v1130_v45 = vld [vmem:[%s1267_s8 + $0x34] ss:$8 sps:$4 sm:$0xff]  }
  0x38   : > { %v1126_v42 = vld [vmem:[%s1267_s8 + $0x64] ss:$8 sps:$4 sm:$0xff]   ;;  %v1129_v44 = vld [vmem:[%s1267_s8 + $0x60] ss:$8 sps:$4 sm:$0xff]   ;;  %v1132_v46 = vld [vmem:[%s1267_s8 + $0x74] ss:$8 sps:$4 sm:$0xff]  }
  0x39   : > { %980 = vmatpush3.bf16.msra.mxu0 %v1101_v22  ;;  %1049 = vmatpush3.bf16.msra.mxu1 %v1101_v22  ;;  %v1134_v47 = vld [vmem:[%s1267_s8 + $0x30] ss:$8 sps:$4 sm:$0xff]   ;;  %v369_v51 = vld [vmem:[#allocation2] sm:$0xff]  ;;  %v370_v59 = vld [vmem:[#allocation2 + $0x8] sm:$0xff] }
  0x3a   : > { %981 = vmatprep.subr.bf16.mxu0 %v1102_v23  ;;  %1042 = vmatprep.subr.bf16.mxu1 %v1102_v23  ;;  %v1135_v48 = vld [vmem:[%s1267_s8 + $0x70] ss:$8 sps:$4 sm:$0xff]   ;;  %v377_v53 = vld [vmem:[#allocation2 + $0x40] sm:$0xff]  ;;  %v378_v61 = vld [vmem:[#allocation2 + $0x48] sm:$0xff] }
  0x3b   : > { %v371_v7 = vld [vmem:[#allocation2 + $0x10] sm:$0xff]  ;;  %v372_v15 = vld [vmem:[#allocation2 + $0x18] sm:$0xff]  ;;  %v381_v29 = vld [vmem:[#allocation2 + $0x60] sm:$0xff] }
  0x3c   : > { %v379_v9 = vld [vmem:[#allocation2 + $0x50] sm:$0xff]  ;;  %v380_v17 = vld [vmem:[#allocation2 + $0x58] sm:$0xff] }
  0x3d   : > { %982 = vmatpush3.bf16.msra.mxu0 %v1103_v24  ;;  %1050 = vmatpush3.bf16.msra.mxu1 %v1103_v24 }
  0x3e   : > { %983 = vmatprep.subr.bf16.mxu0 %v1104_v25  ;;  %1043 = vmatprep.subr.bf16.mxu1 %v1104_v25 }
  0x41   : > { %984 = vmatpush3.bf16.msra.mxu0 %v1105_v26  ;;  %1051 = vmatpush3.bf16.msra.mxu1 %v1105_v26 }
  0x42   : > { %985 = vmatprep.subr.bf16.mxu0 %v1106_v27  ;;  %1044 = vmatprep.subr.bf16.mxu1 %v1106_v27  ;;  %v373_v27 = vld [vmem:[#allocation2 + $0x20] sm:$0xff] }
  0x45   : > { %986 = vmatpush3.bf16.msra.mxu0 %v1107_v30  ;;  %1052 = vmatpush3.bf16.msra.mxu1 %v1107_v30 }
  0x46   : > { %987 = vmatprep.subr.bf16.mxu0 %v1108_v31  ;;  %1045 = vmatprep.subr.bf16.mxu1 %v1108_v31 }
  0x49   : > { %988 = vmatpush3.bf16.msra.mxu0 %v1109_v32  ;;  %1053 = vmatpush3.bf16.msra.mxu1 %v1109_v32 }
  0x4a   : > { %989 = vmatprep.subr.bf16.mxu0 %v1110_v33  ;;  %1046 = vmatprep.subr.bf16.mxu1 %v1110_v33 }
  0x4d   : > { %990 = vmatpush3.bf16.msra.mxu0 %v1111_v34  ;;  %1054 = vmatpush3.bf16.msra.mxu1 %v1111_v34 }
  0x50   : > { %642 = vmatmul.mubr.bf16.vlgmr.msra.gmra.mrb[0].mxu0 %v1112_v35  ;;  %674 = vmatmul.mubr.bf16.vlgmr.msra.gmra.mrb[0].mxu1 %v1115_v36  ;;  %v374_v35 = vld [vmem:[#allocation2 + $0x28] sm:$0xff] }
  0x51   : > { %649 = vmatprep.mubr.bf16.mxu0 %v1118_v37  ;;  %681 = vmatprep.mubr.bf16.mxu1 %v1120_v38  ;;  %v382_v37 = vld [vmem:[#allocation2 + $0x68] sm:$0xff] }
  0x58   : > { %650 = vmatmul.mubr.bf16.gmra.mrb[4].mxu0 %v1122_v39  ;;  %682 = vmatmul.mubr.bf16.gmra.mrb[4].mxu1 %v1123_v40 }
  0x59   : > { %657 = vmatprep.mubr.bf16.mxu0 %v1124_v41  ;;  %689 = vmatprep.mubr.bf16.mxu1 %v1126_v42 }
  0x60   : > { %658 = vmatmul.mubr.bf16.gmra.mrb[8].mxu0 %v1128_v43  ;;  %690 = vmatmul.mubr.bf16.gmra.mrb[8].mxu1 %v1129_v44 }
  0x61   : > { %665 = vmatprep.mubr.bf16.mxu0 %v1130_v45  ;;  %697 = vmatprep.mubr.bf16.mxu1 %v1132_v46 }
  0x68   : > { %666 = vmatmul.mubr.bf16.gmra.mrb[12].mxu0 %v1134_v47  ;;  %698 = vmatmul.mubr.bf16.gmra.mrb[12].mxu1 %v1135_v48  ;;  %v375_v47 = vld [vmem:[#allocation2 + $0x30] sm:$0xff] }
 0x123   : > { %v991_v49 = vpop.f32.mrb[0].mxu0  ;;  %v1015_v50 = vpop.f32.mrb[0].mxu1 }
 0x124   : > { %v992_v52 = vpop.f32.mrb[1].mxu0  ;;  %v1016_v54 = vpop.f32.mrb[1].mxu1 }
 0x125   : > { %v993_v55 = vadd.f32 %v992_v52, %v991_v49  ;;  %v1017_v56 = vadd.f32 %v1016_v54, %v1015_v50  ;;  %v994_v57 = vpop.f32.mrb[2].mxu0  ;;  %v1018_v58 = vpop.f32.mrb[2].mxu1  ;;  %v383_v49 = vld [vmem:[#allocation2 + $0x70] sm:$0xff] }
 0x126   : > { %v995_v60 = vpop.f32.mrb[3].mxu0  ;;  %v1019_v62 = vpop.f32.mrb[3].mxu1 }
 0x127   : > { %v706_v63 = vadd.f32 %v993_v55, %v369_v51  ;;  %v714_v0 = vadd.f32 %v1017_v56, %v377_v53  ;;  %v996_v1 = vadd.f32 %v995_v60, %v994_v57  ;;  %v1020_v2 = vadd.f32 %v1019_v62, %v1018_v58  ;;  %v376_v55 = vld [vmem:[#allocation2 + $0x38] sm:$0xff] }
 0x128   : > { %v384_v57 = vld [vmem:[#allocation2 + $0x78] sm:$0xff] }
 0x129   : > { %722 = vst [vmem:[#allocation2] sm:$0xff] %v706_v63  ;;  %730 = vst [vmem:[#allocation2 + $0x40] sm:$0xff] %v714_v0  ;;  %v707_v3 = vadd.f32 %v996_v1, %v370_v59  ;;  %v715_v4 = vadd.f32 %v1020_v2, %v378_v61  ;;  %v969_v2 = vld [vmem:[%s1371_s2] ss:$0 sm:$0xff] (!%p968_p11) }
 0x12b   : > { %723 = vst [vmem:[#allocation2 + $0x8] sm:$0xff] %v707_v3  ;;  %731 = vst [vmem:[#allocation2 + $0x48] sm:$0xff] %v715_v4  ;;  %v997_v5 = vpop.f32.mrb[4].mxu0  ;;  %v1021_v6 = vpop.f32.mrb[4].mxu1 }
 0x12c   : > { %v998_v8 = vpop.f32.mrb[5].mxu0  ;;  %v1022_v10 = vpop.f32.mrb[5].mxu1 }
 0x12d   : > { %v999_v11 = vadd.f32 %v998_v8, %v997_v5  ;;  %v1023_v12 = vadd.f32 %v1022_v10, %v1021_v6  ;;  %v1000_v13 = vpop.f32.mrb[6].mxu0  ;;  %v1024_v14 = vpop.f32.mrb[6].mxu1 }
 0x12e   : > { %v1001_v16 = vpop.f32.mrb[7].mxu0  ;;  %v1025_v18 = vpop.f32.mrb[7].mxu1 }
 0x12f   : > { %v708_v19 = vadd.f32 %v999_v11, %v371_v7  ;;  %v716_v20 = vadd.f32 %v1023_v12, %v379_v9  ;;  %v1002_v21 = vadd.f32 %v1001_v16, %v1000_v13  ;;  %v1026_v22 = vadd.f32 %v1025_v18, %v1024_v14 }
 0x130   : > { %v742_v1 = vld [vmem:[#allocation2] sm:$0xff] (!%p968_p11) }
 0x131   : > { %724 = vst [vmem:[#allocation2 + $0x10] sm:$0xff] %v708_v19  ;;  %732 = vst [vmem:[#allocation2 + $0x50] sm:$0xff] %v716_v20  ;;  %v709_v23 = vadd.f32 %v1002_v21, %v372_v15  ;;  %v717_v24 = vadd.f32 %v1026_v22, %v380_v17  ;;  %v765_v4 = vadd.f32 (!%p968_p11), %v969_v2, %v742_v1  ;;  %v750_v19 = vld [vmem:[#allocation2 + $0x40] sm:$0xff] (!%p968_p11) }
 0x132   : > { %v743_v3 = vld [vmem:[#allocation2 + $0x8] sm:$0xff] (!%p968_p11) }
 0x133   : > { %725 = vst [vmem:[#allocation2 + $0x18] sm:$0xff] %v709_v23  ;;  %733 = vst [vmem:[#allocation2 + $0x58] sm:$0xff] %v717_v24  ;;  %v1003_v25 = vpop.f32.mrb[8].mxu0  ;;  %v1027_v26 = vpop.f32.mrb[8].mxu1  ;;  %v766_v5 = vadd.f32 (!%p968_p11), %v969_v2, %v743_v3  ;;  %v781_v15 = vmax.f32 (!%p968_p11), %v765_v4, 0.0  ;;  %v751_v20 = vld [vmem:[#allocation2 + $0x48] sm:$0xff] (!%p968_p11) }
 0x134   : > { %v1004_v28 = vpop.f32.mrb[9].mxu0  ;;  %v1028_v30 = vpop.f32.mrb[9].mxu1 }
 0x135   : > { %v1005_v31 = vadd.f32 %v1004_v28, %v1003_v25  ;;  %v1029_v32 = vadd.f32 %v1028_v30, %v1027_v26  ;;  %v1006_v33 = vpop.f32.mrb[10].mxu0  ;;  %v1030_v34 = vpop.f32.mrb[10].mxu1  ;;  %v782_v16 = vmax.f32 (!%p968_p11), %v766_v5, 0.0  ;;  %797 = vst [vmem:[%s1372_s3] sm:$0xff] (!%p968_p11), %v781_v15 }
 0x136   : > { %v1007_v36 = vpop.f32.mrb[11].mxu0  ;;  %v1031_v38 = vpop.f32.mrb[11].mxu1 }
 0x137   : > { %v710_v39 = vadd.f32 %v1005_v31, %v373_v27  ;;  %v718_v40 = vadd.f32 %v1029_v32, %v381_v29  ;;  %v1008_v41 = vadd.f32 %v1007_v36, %v1006_v33  ;;  %v1032_v42 = vadd.f32 %v1031_v38, %v1030_v34  ;;  %798 = vst [vmem:[%s1372_s3 + $0x8] sm:$0xff] (!%p968_p11), %v782_v16 }
 0x138   : > { %v744_v6 = vld [vmem:[#allocation2 + $0x10] sm:$0xff] (!%p968_p11)  ;;  %v773_v31 = vadd.f32 (!%p968_p11), %v969_v2, %v750_v19  ;;  %v774_v32 = vadd.f32 (!%p968_p11), %v969_v2, %v751_v20 }
 0x139   : > { %726 = vst [vmem:[#allocation2 + $0x20] sm:$0xff] %v710_v39  ;;  %734 = vst [vmem:[#allocation2 + $0x60] sm:$0xff] %v718_v40  ;;  %v711_v43 = vadd.f32 %v1008_v41, %v374_v35  ;;  %v719_v44 = vadd.f32 %v1032_v42, %v382_v37  ;;  %v767_v9 = vadd.f32 (!%p968_p11), %v969_v2, %v744_v6  ;;  %v752_v21 = vld [vmem:[#allocation2 + $0x50] sm:$0xff] (!%p968_p11) }
 0x13a   : > { %v745_v7 = vld [vmem:[#allocation2 + $0x18] sm:$0xff] (!%p968_p11)  ;;  %v775_v36 = vadd.f32 (!%p968_p11), %v969_v2, %v752_v21  ;;  %v789_v39 = vmax.f32 (!%p968_p11), %v773_v31, 0.0  ;;  %v790_v40 = vmax.f32 (!%p968_p11), %v774_v32, 0.0 }
 0x13b   : > { %727 = vst [vmem:[#allocation2 + $0x28] sm:$0xff] %v711_v43  ;;  %735 = vst [vmem:[#allocation2 + $0x68] sm:$0xff] %v719_v44  ;;  %v1009_v45 = vpop.f32.mrb[12].mxu0  ;;  %v1033_v46 = vpop.f32.mrb[12].mxu1  ;;  %v768_v10 = vadd.f32 (!%p968_p11), %v969_v2, %v745_v7  ;;  %v783_v22 = vmax.f32 (!%p968_p11), %v767_v9, 0.0  ;;  %v753_v26 = vld [vmem:[#allocation2 + $0x58] sm:$0xff] (!%p968_p11) }
 0x13c   : > { %v1010_v48 = vpop.f32.mrb[13].mxu0  ;;  %v1034_v50 = vpop.f32.mrb[13].mxu1  ;;  %v776_v37 = vadd.f32 (!%p968_p11), %v969_v2, %v753_v26  ;;  %v791_v43 = vmax.f32 (!%p968_p11), %v775_v36, 0.0  ;;  %805 = vst [vmem:[%s1372_s3 + $0x40] sm:$0xff] (!%p968_p11), %v789_v39  ;;  %806 = vst [vmem:[%s1372_s3 + $0x48] sm:$0xff] (!%p968_p11), %v790_v40 }
 0x13d   : > { %v1011_v51 = vadd.f32 %v1010_v48, %v1009_v45  ;;  %v1035_v52 = vadd.f32 %v1034_v50, %v1033_v46  ;;  %v1012_v53 = vpop.f32.mrb[14].mxu0  ;;  %v1036_v54 = vpop.f32.mrb[14].mxu1  ;;  %741 = sbr.rel (%p968_p11) target bundleno = 337 (0x151), region = 78  ;;  %v784_v23 = vmax.f32 (!%p968_p11), %v768_v10, 0.0  ;;  %799 = vst [vmem:[%s1372_s3 + $0x10] sm:$0xff] (!%p968_p11), %v783_v22 }
 0x13e   : > { %v1013_v56 = vpop.f32.mrb[15].mxu0  ;;  %v1037_v58 = vpop.f32.mrb[15].mxu1  ;;  %v792_v44 = vmax.f32 (!%p968_p11), %v776_v37, 0.0  ;;  %807 = vst [vmem:[%s1372_s3 + $0x50] sm:$0xff] (!%p968_p11), %v791_v43 }
 0x13f   : > { %v712_v59 = vadd.f32 %v1011_v51, %v375_v47  ;;  %v720_v60 = vadd.f32 %v1035_v52, %v383_v49  ;;  %v1014_v61 = vadd.f32 %v1013_v56, %v1012_v53  ;;  %v1038_v62 = vadd.f32 %v1037_v58, %v1036_v54  ;;  %800 = vst [vmem:[%s1372_s3 + $0x18] sm:$0xff] (!%p968_p11), %v784_v23 }
 0x140   : > { %v746_v8 = vld [vmem:[#allocation2 + $0x20] sm:$0xff] (!%p968_p11)  ;;  %808 = vst [vmem:[%s1372_s3 + $0x58] sm:$0xff] (!%p968_p11), %v792_v44 }
 0x141   : > { %728 = vst [vmem:[#allocation2 + $0x30] sm:$0xff] %v712_v59  ;;  %736 = vst [vmem:[#allocation2 + $0x70] sm:$0xff] %v720_v60  ;;  %v713_v63 = vadd.f32 %v1014_v61, %v376_v55  ;;  %v721_v0 = vadd.f32 %v1038_v62, %v384_v57  ;;  %v769_v11 = vadd.f32 (!%p968_p11), %v969_v2, %v746_v8  ;;  %v754_v27 = vld [vmem:[#allocation2 + $0x60] sm:$0xff] (!%p968_p11) }
 0x142   : > { %v747_v12 = vld [vmem:[#allocation2 + $0x28] sm:$0xff] (!%p968_p11)  ;;  %v777_v38 = vadd.f32 (!%p968_p11), %v969_v2, %v754_v27 }
 0x143   : > { %729 = vst [vmem:[#allocation2 + $0x38] sm:$0xff] %v713_v63  ;;  %737 = vst [vmem:[#allocation2 + $0x78] sm:$0xff] %v721_v0  ;;  %v770_v17 = vadd.f32 (!%p968_p11), %v969_v2, %v747_v12  ;;  %v785_v24 = vmax.f32 (!%p968_p11), %v769_v11, 0.0  ;;  %v755_v28 = vld [vmem:[#allocation2 + $0x68] sm:$0xff] (!%p968_p11) }
 0x144   : > { %v778_v41 = vadd.f32 %v969_v2, %v755_v28  ;;  %v793_v45 = vmax.f32 %v777_v38, 0.0 }
 0x145   : > { %v786_v29 = vmax.f32 %v770_v17, 0.0  ;;  %801 = vst [vmem:[%s1372_s3 + $0x20] sm:$0xff] %v785_v24 }
 0x146   : > { %v794_v47 = vmax.f32 %v778_v41, 0.0  ;;  %809 = vst [vmem:[%s1372_s3 + $0x60] sm:$0xff] %v793_v45 }
 0x147   : > { %802 = vst [vmem:[%s1372_s3 + $0x28] sm:$0xff] %v786_v29 }
 0x148   : > { %v748_v13 = vld [vmem:[#allocation2 + $0x30] sm:$0xff]  ;;  %810 = vst [vmem:[%s1372_s3 + $0x68] sm:$0xff] %v794_v47 }
 0x149   : > { %v771_v18 = vadd.f32 %v969_v2, %v748_v13  ;;  %v756_v33 = vld [vmem:[#allocation2 + $0x70] sm:$0xff] }
 0x14a   : > { %v749_v14 = vld [vmem:[#allocation2 + $0x38] sm:$0xff]  ;;  %v779_v42 = vadd.f32 %v969_v2, %v756_v33 }
 0x14b   : > { %v772_v25 = vadd.f32 %v969_v2, %v749_v14  ;;  %v787_v30 = vmax.f32 %v771_v18, 0.0  ;;  %v757_v34 = vld [vmem:[#allocation2 + $0x78] sm:$0xff] }
 0x14c   : > { %v780_v46 = vadd.f32 %v969_v2, %v757_v34  ;;  %v795_v48 = vmax.f32 %v779_v42, 0.0 }
 0x14d   : > { %v788_v35 = vmax.f32 %v772_v25, 0.0  ;;  %803 = vst [vmem:[%s1372_s3 + $0x30] sm:$0xff] %v787_v30 }
 0x14e   : > { %v796_v49 = vmax.f32 %v780_v46, 0.0  ;;  %811 = vst [vmem:[%s1372_s3 + $0x70] sm:$0xff] %v795_v48 }
 0x14f   : > { %804 = vst [vmem:[%s1372_s3 + $0x38] sm:$0xff] %v788_v35 }
 0x150   : > { %812 = vst [vmem:[%s1372_s3 + $0x78] sm:$0xff] %v796_v49 }
 0x151 PF: > { %s13_s16 = sadd.s32 1, %s1174_s16   ;;  %s1373_s12 = smov %s1162_s13 }
 0x152   : > { %p10_p12 = scmp.ge.s32.totalorder %s13_s16, 4   ;;  %s1374_s13 = smov %s1232_s20 }
 0x153   : > { %s1375_s14 = smov %s1170_s15  ;;  %s1376_s15 = smov %s1378_s17 }
 0x154   :  { %12 = sbr.rel (!%p10_p12) target bundleno = 3 (0x3), region = 119 }

// kernel: ocr_forward.26
= control target key start
LH: loop header
LB: loop body
LE: loop exit
PB: predicated region body
PF: predicated region fallthrough
CT: control target
= control target key end

     0   :  { %vm24_vm0 = vcmask 1042432   ;;  %vm169_vm1 = vcmask 1041409   ;;  %vm171_vm2 = vcmask 1042434   ;;  %vm173_vm3 = vcmask 1043459   ;;  %s315_s0 = inlined_call_operand.vmem [shape: f32[16,3,128], index: 0, kind: input, shape index: {}]   ;;  %s316_s1 = inlined_call_operand.vmem [shape: f32[16,128], index: 1, kind: output, shape index: {}]  }
   0x1   :  { %v8_v0 = vld [vmem:[%s315_s0] sm:$0x7]  ;;  %v9_v1 = vld [vmem:[%s315_s0 + $0x4] sm:$0x7]  ;;  %v10_v2 = vld [vmem:[%s315_s0 + $0x8] sm:$0x7] }
   0x2   :  { %v11_v3 = vld [vmem:[%s315_s0 + $0xc] sm:$0x7]  ;;  %v12_v4 = vld [vmem:[%s315_s0 + $0x10] sm:$0x7]  ;;  %v13_v5 = vld [vmem:[%s315_s0 + $0x14] sm:$0x7] }
   0x3   :  { %v14_v6 = vld [vmem:[%s315_s0 + $0x18] sm:$0x7]  ;;  %v15_v7 = vld [vmem:[%s315_s0 + $0x1c] sm:$0x7]  ;;  %v25_v8 = vsel %vm24_vm0, %v8_v0, 0.0  ;;  %v32_v9 = vsel %vm24_vm0, %v9_v1, 0.0 }
   0x4   :  { %v39_v10 = vsel %vm24_vm0, %v10_v2, 0.0  ;;  %v46_v11 = vsel %vm24_vm0, %v11_v3, 0.0  ;;  %v26_v12 = vrot.slane %v25_v8, 4  ;;  %v33_v13 = vrot.slane %v32_v9, 4  ;;  %v16_v44 = vld [vmem:[%s315_s0 + $0x20] sm:$0x7] }
   0x5   :  { %v40_v14 = vrot.slane %v39_v10, 4  ;;  %v47_v15 = vrot.slane %v46_v11, 4  ;;  %v53_v16 = vsel %vm24_vm0, %v12_v4, 0.0  ;;  %v60_v17 = vsel %vm24_vm0, %v13_v5, 0.0  ;;  %v17_v48 = vld [vmem:[%s315_s0 + $0x24] sm:$0x7] }
   0x6   :  { %v67_v18 = vsel %vm24_vm0, %v14_v6, 0.0  ;;  %v74_v19 = vsel %vm24_vm0, %v15_v7, 0.0  ;;  %v27_v20 = vadd.f32 %v26_v12, %v25_v8  ;;  %v34_v21 = vadd.f32 %v33_v13, %v32_v9  ;;  %v18_v49 = vld [vmem:[%s315_s0 + $0x28] sm:$0x7]  ;;  %v19_v50 = vld [vmem:[%s315_s0 + $0x2c] sm:$0x7] }
   0x7   :  { %v41_v22 = vadd.f32 %v40_v14, %v39_v10  ;;  %v48_v23 = vadd.f32 %v47_v15, %v46_v11  ;;  %v54_v24 = vrot.slane %v53_v16, 4  ;;  %v61_v25 = vrot.slane %v60_v17, 4  ;;  %v20_v55 = vld [vmem:[%s315_s0 + $0x30] sm:$0x7]  ;;  %v21_v56 = vld [vmem:[%s315_s0 + $0x34] sm:$0x7] }
   0x8   :  { %v68_v26 = vrot.slane %v67_v18, 4  ;;  %v75_v27 = vrot.slane %v74_v19, 4  ;;  %v28_v28 = vrot.slane %v27_v20, 2  ;;  %v35_v29 = vrot.slane %v34_v21, 2  ;;  %v22_v57 = vld [vmem:[%s315_s0 + $0x38] sm:$0x7] }
   0x9   :  { %v42_v30 = vrot.slane %v41_v22, 2  ;;  %v49_v31 = vrot.slane %v48_v23, 2  ;;  %v55_v32 = vadd.f32 %v54_v24, %v53_v16  ;;  %v62_v33 = vadd.f32 %v61_v25, %v60_v17  ;;  %v23_v62 = vld [vmem:[%s315_s0 + $0x3c] sm:$0x7] }
   0xa   :  { %v69_v34 = vadd.f32 %v68_v26, %v67_v18  ;;  %v76_v35 = vadd.f32 %v75_v27, %v74_v19  ;;  %v29_v36 = vadd.f32 %v28_v28, %v27_v20  ;;  %v36_v37 = vadd.f32 %v35_v29, %v34_v21 }
   0xb   :  { %v43_v38 = vadd.f32 %v42_v30, %v41_v22  ;;  %v240_v39 = vadd.f32 %v49_v31, %v48_v23  ;;  %v56_v40 = vrot.slane %v55_v32, 2  ;;  %v63_v41 = vrot.slane %v62_v33, 2 }
   0xc   :  { %v70_v42 = vrot.slane %v69_v34, 2  ;;  %v77_v43 = vrot.slane %v76_v35, 2  ;;  %v30_v45 = vrot.slane %v29_v36, 1  ;;  %v37_v46 = vrot.slane %v36_v37, 1 }
   0xd   :  { %v44_v47 = vrot.slane %v43_v38, 1  ;;  %v254_v51 = vadd.f32 %v56_v40, %v55_v32  ;;  %v256_v52 = vadd.f32 %v63_v41, %v62_v33  ;;  %v51_v61 = vrot.slane %v240_v39, 1 }
   0xe   :  { %v258_v53 = vadd.f32 %v70_v42, %v69_v34  ;;  %v260_v54 = vadd.f32 %v77_v43, %v76_v35  ;;  %v271_v58 = vadd.f32 %v30_v45, %v29_v36  ;;  %v273_v59 = vadd.f32 %v37_v46, %v36_v37 }
   0xf   :  { %v275_v60 = vadd.f32 %v44_v47, %v43_v38  ;;  %v81_v63 = vsel %vm24_vm0, %v16_v44, 0.0  ;;  %v88_v0 = vsel %vm24_vm0, %v17_v48, 0.0  ;;  %v95_v1 = vsel %vm24_vm0, %v18_v49, 0.0 }
  0x10   :  { %v102_v2 = vsel %vm24_vm0, %v19_v50, 0.0  ;;  %v58_v3 = vrot.slane %v254_v51, 1  ;;  %v65_v4 = vrot.slane %v256_v52, 1  ;;  %v72_v5 = vrot.slane %v258_v53, 1 }
  0x11   :  { %v79_v6 = vrot.slane %v260_v54, 1  ;;  %v82_v7 = vrot.slane %v81_v63, 4  ;;  %v89_v8 = vrot.slane %v88_v0, 4  ;;  %v96_v9 = vrot.slane %v95_v1, 4 }
  0x12   :  { %v103_v10 = vrot.slane %v102_v2, 4  ;;  %v109_v11 = vsel %vm24_vm0, %v20_v55, 0.0  ;;  %v116_v12 = vsel %vm24_vm0, %v21_v56, 0.0  ;;  %v123_v13 = vsel %vm24_vm0, %v22_v57, 0.0 }
  0x13   :  { %v130_v14 = vsel %vm24_vm0, %v23_v62, 0.0  ;;  %v83_v15 = vadd.f32 %v82_v7, %v81_v63  ;;  %v90_v16 = vadd.f32 %v89_v8, %v88_v0  ;;  %v97_v17 = vadd.f32 %v96_v9, %v95_v1 }
  0x14   :  { %v104_v18 = vadd.f32 %v103_v10, %v102_v2  ;;  %v110_v19 = vrot.slane %v109_v11, 4  ;;  %v117_v20 = vrot.slane %v116_v12, 4  ;;  %v124_v21 = vrot.slane %v123_v13, 4 }
  0x15   :  { %v131_v22 = vrot.slane %v130_v14, 4  ;;  %v84_v23 = vrot.slane %v83_v15, 2  ;;  %v91_v24 = vrot.slane %v90_v16, 2  ;;  %v98_v25 = vrot.slane %v97_v17, 2 }
  0x16   :  { %v105_v26 = vrot.slane %v104_v18, 2  ;;  %v111_v27 = vadd.f32 %v110_v19, %v109_v11  ;;  %v118_v28 = vadd.f32 %v117_v20, %v116_v12  ;;  %v125_v29 = vadd.f32 %v124_v21, %v123_v13 }
  0x17   :  { %v132_v30 = vadd.f32 %v131_v22, %v130_v14  ;;  %v85_v31 = vadd.f32 %v84_v23, %v83_v15  ;;  %v92_v32 = vadd.f32 %v91_v24, %v90_v16  ;;  %v99_v33 = vadd.f32 %v98_v25, %v97_v17 }
  0x18   :  { %v106_v34 = vadd.f32 %v105_v26, %v104_v18  ;;  %v112_v35 = vrot.slane %v111_v27, 2  ;;  %v119_v36 = vrot.slane %v118_v28, 2  ;;  %v126_v37 = vrot.slane %v125_v29, 2 }
  0x19   :  { %v133_v38 = vrot.slane %v132_v30, 2  ;;  %v86_v40 = vrot.slane %v85_v31, 1  ;;  %v93_v41 = vrot.slane %v92_v32, 1  ;;  %v100_v42 = vrot.slane %v99_v33, 1 }
  0x1a   :  { %v107_v43 = vrot.slane %v106_v34, 1  ;;  %v113_v44 = vadd.f32 %v112_v35, %v111_v27  ;;  %v120_v45 = vadd.f32 %v119_v36, %v118_v28  ;;  %v127_v46 = vadd.f32 %v126_v37, %v125_v29 }
  0x1b   :  { %v134_v47 = vadd.f32 %v133_v38, %v132_v30  ;;  %v52_v48 = vadd.f32 %v51_v61, %v240_v39  ;;  %v59_v49 = vadd.f32 %v58_v3, %v254_v51  ;;  %v66_v50 = vadd.f32 %v65_v4, %v256_v52 }
  0x1c   :  { %v87_v55 = vadd.f32 %v86_v40, %v85_v31  ;;  %v94_v56 = vadd.f32 %v93_v41, %v92_v32  ;;  %v114_v57 = vrot.slane %v113_v44, 1  ;;  %v121_v62 = vrot.slane %v120_v45, 1 }
  0x1d   :  { %v128_v63 = vrot.slane %v127_v46, 1  ;;  %v101_v0 = vadd.f32 %v100_v42, %v99_v33  ;;  %v137_v1 = vmul.f32 0.33333334, %v271_v58  ;;  %v138_v2 = vmul.f32 0.33333334, %v273_v59 }
  0x1e   :  { %v139_v7 = vmul.f32 0.33333334, %v275_v60  ;;  %v73_v8 = vadd.f32 %v72_v5, %v258_v53  ;;  %v80_v39 = vadd.f32 %v79_v6, %v260_v54  ;;  %v108_v61 = vadd.f32 %v107_v43, %v106_v34 }
  0x1f   :  { %v135_v51 = vrot.slane %v134_v47, 1  ;;  %v115_v3 = vadd.f32 %v114_v57, %v113_v44  ;;  %v122_v52 = vadd.f32 %v121_v62, %v120_v45  ;;  %v140_v4 = vmul.f32 0.33333334, %v52_v48 }
  0x20   :  { %v170_v9 = vsel %vm169_vm1, %v138_v2, %v137_v1  ;;  %v129_v10 = vadd.f32 %v128_v63, %v127_v46  ;;  %v141_v11 = vmul.f32 0.33333334, %v59_v49  ;;  %v145_v12 = vmul.f32 0.33333334, %v87_v55 }
  0x21   :  { %v172_v58 = vsel %vm171_vm2, %v139_v7, %v170_v9  ;;  %v142_v13 = vmul.f32 0.33333334, %v66_v50  ;;  %v146_v59 = vmul.f32 0.33333334, %v94_v56  ;;  %v147_v14 = vmul.f32 0.33333334, %v101_v0 }
  0x22   :  { %v174_v60 = vsel %vm173_vm3, %v140_v4, %v172_v58  ;;  %v136_v53 = vadd.f32 %v135_v51, %v134_v47  ;;  %v143_v5 = vmul.f32 0.33333334, %v73_v8  ;;  %v144_v54 = vmul.f32 0.33333334, %v80_v39 }
  0x23   :  { %v148_v6 = vmul.f32 0.33333334, %v108_v61  ;;  %v149_v15 = vmul.f32 0.33333334, %v115_v3  ;;  %vm175_vm4 = vcmask 1044484   ;;  %vm177_vm5 = vcmask 1045509  }
  0x24   :  { %vm179_vm6 = vcmask 1046534   ;;  %v150_v16 = vmul.f32 0.33333334, %v122_v52  ;;  %v176_v17 = vsel %vm175_vm4, %v141_v11, %v174_v60  ;;  %vm181_vm7 = vcmask 1047559  }
  0x25   :  { %v183_v18 = vsel %vm169_vm1, %v146_v59, %v145_v12  ;;  %v151_v19 = vmul.f32 0.33333334, %v129_v10  ;;  %v178_v20 = vsel %vm177_vm5, %v142_v13, %v176_v17  ;;  %v152_v22 = vmul.f32 0.33333334, %v136_v53 }
  0x26   :  { %v184_v21 = vsel %vm171_vm2, %v147_v14, %v183_v18  ;;  %v180_v23 = vsel %vm179_vm6, %v143_v5, %v178_v20 }
  0x27   :  { %v185_v24 = vsel %vm173_vm3, %v148_v6, %v184_v21  ;;  %v182_v25 = vsel %vm181_vm7, %v144_v54, %v180_v23 }
  0x28   :  { %v186_v26 = vsel %vm175_vm4, %v149_v15, %v185_v24  ;;  %192 = vst [vmem:[%s316_s1] sm:$0xff] %v182_v25 }
  0x29   :  { %v187_v27 = vsel %vm177_vm5, %v150_v16, %v186_v26 }
  0x2a   :  { %v188_v28 = vsel %vm179_vm6, %v151_v19, %v187_v27 }
  0x2b   :  { %v189_v29 = vsel %vm181_vm7, %v152_v22, %v188_v28 }
  0x2c   :  { %193 = vst [vmem:[%s316_s1 + $0x8] sm:$0xff] %v189_v29 }

// kernel: ocr_forward.25
= control target key start
LH: loop header
LB: loop body
LE: loop exit
PB: predicated region body
PF: predicated region fallthrough
CT: control target
= control target key end

     0   :  { %v306_v0 = vmov 0.0   ;;  %vm307_vm0 = vmmov 0   ;;  %s385_s1 = inlined_call_operand.vmem [shape: bf16[128,128], index: 1, kind: input, shape index: {}]   ;;  %s386_s0 = inlined_call_operand.vmem [shape: bf16[48,128], index: 0, kind: input, shape index: {}]   ;;  %s387_s2 = inlined_call_operand.vmem [shape: f32[1,128], index: 2, kind: input, shape index: {}]   ;;  %s388_s3 = inlined_call_operand.vmem [shape: f32[48,128], index: 3, kind: output, shape index: {}]  }
   0x1   :  { %277 = vmatprep.subr.bf16.mxu1 %v306_v0  ;;  %v295_v1 = vld [vmem:[%s385_s1] sm:$0xff]   ;;  %249 = vmatprep.subr.bf16.mxu0 %v306_v0  ;;  %v296_v2 = vld [vmem:[%s385_s1 + $0x8] sm:$0xff]   ;;  %v297_v3 = vld [vmem:[%s385_s1 + $0x10] sm:$0xff]  }
   0x2   :  { %269 = vmatprep.mubr.msk.bf16.mxu1 %vm307_vm0, %v306_v0  ;;  %265 = vmatprep.mubr.msk.bf16.mxu0 %vm307_vm0, %v306_v0  ;;  %v298_v4 = vld [vmem:[%s385_s1 + $0x18] sm:$0xff]   ;;  %v299_v5 = vld [vmem:[%s385_s1 + $0x20] sm:$0xff]   ;;  %v300_v6 = vld [vmem:[%s385_s1 + $0x28] sm:$0xff]  }
   0x3   :  { %285 = vmatpush3.bf16.msra.mxu1 %v295_v1  ;;  %250 = vmatpush3.bf16.msra.mxu0 %v295_v1  ;;  %v301_v7 = vld [vmem:[%s385_s1 + $0x30] sm:$0xff]   ;;  %v302_v8 = vld [vmem:[%s385_s1 + $0x38] sm:$0xff]   ;;  %v303_v9 = vld [vmem:[%s386_s0 + $0x8] sm:$0xff]  }
   0x4   :  { %278 = vmatprep.subr.bf16.mxu1 %v306_v0  ;;  %251 = vmatprep.subr.bf16.mxu0 %v306_v0  ;;  %v304_v10 = vld [vmem:[%s386_s0] sm:$0xff]   ;;  %v305_v11 = vld [vmem:[%s386_s0 + $0x10] sm:$0xff]  }
   0x5   :  { %v237_v12 = vld [vmem:[%s387_s2] ss:$0 sm:$0xff] }
   0x7   :  { %286 = vmatpush3.bf16.msra.mxu1 %v296_v2  ;;  %252 = vmatpush3.bf16.msra.mxu0 %v296_v2 }
   0x8   :  { %279 = vmatprep.subr.bf16.mxu1 %v306_v0  ;;  %253 = vmatprep.subr.bf16.mxu0 %v306_v0 }
   0xb   :  { %287 = vmatpush3.bf16.msra.mxu1 %v297_v3  ;;  %254 = vmatpush3.bf16.msra.mxu0 %v297_v3 }
   0xc   :  { %280 = vmatprep.subr.bf16.mxu1 %v306_v0  ;;  %255 = vmatprep.subr.bf16.mxu0 %v306_v0 }
   0xf   :  { %288 = vmatpush3.bf16.msra.mxu1 %v298_v4  ;;  %256 = vmatpush3.bf16.msra.mxu0 %v298_v4 }
  0x10   :  { %281 = vmatprep.subr.bf16.mxu1 %v306_v0  ;;  %257 = vmatprep.subr.bf16.mxu0 %v306_v0 }
  0x13   :  { %289 = vmatpush3.bf16.msra.mxu1 %v299_v5  ;;  %258 = vmatpush3.bf16.msra.mxu0 %v299_v5 }
  0x14   :  { %282 = vmatprep.subr.bf16.mxu1 %v306_v0  ;;  %259 = vmatprep.subr.bf16.mxu0 %v306_v0 }
  0x17   :  { %290 = vmatpush3.bf16.msra.mxu1 %v300_v6  ;;  %260 = vmatpush3.bf16.msra.mxu0 %v300_v6 }
  0x18   :  { %283 = vmatprep.subr.bf16.mxu1 %v306_v0  ;;  %261 = vmatprep.subr.bf16.mxu0 %v306_v0 }
  0x1b   :  { %291 = vmatpush3.bf16.msra.mxu1 %v301_v7  ;;  %262 = vmatpush3.bf16.msra.mxu0 %v301_v7 }
  0x1c   :  { %284 = vmatprep.subr.bf16.mxu1 %v306_v0  ;;  %263 = vmatprep.subr.bf16.mxu0 %v306_v0 }
  0x1f   :  { %292 = vmatpush3.bf16.msra.mxu1 %v302_v8  ;;  %264 = vmatpush3.bf16.msra.mxu0 %v302_v8 }
  0x22   :  { %270 = vmatmul.mubr.bf16.vlgmr.msra.gmra.mrb[0].mxu1 %v303_v9  ;;  %266 = vmatmul.mubr.bf16.vlgmr.msra.gmra.mrb[0].mxu0 %v304_v10 }
  0x23   :  { %273 = vmatprep.mubr.msk.bf16.mxu1 %vm307_vm0, %v306_v0 }
  0x2a   :  { %274 = vmatmul.mubr.bf16.gmra.mrb[4].mxu1 %v305_v11 }
  0xf5   :  { %v161_v13 = vpop.f32.mrb[0].mxu1  ;;  %v153_v14 = vpop.f32.mrb[0].mxu0 }
  0xf6   :  { %v206_v15 = vadd.f32 %v237_v12, %v161_v13  ;;  %v271_v16 = vpop.f32.mrb[1].mxu1  ;;  %v204_v17 = vadd.f32 %v237_v12, %v153_v14  ;;  %v267_v18 = vpop.f32.mrb[1].mxu0 }
  0xf7   :  { %v164_v19 = vpop.f32.mrb[2].mxu1  ;;  %v156_v20 = vpop.f32.mrb[2].mxu0 }
  0xf8   :  { %v212_v21 = vmax.f32 %v206_v15, 0.0  ;;  %v207_v22 = vadd.f32 %v237_v12, %v164_v19  ;;  %v272_v23 = vpop.f32.mrb[3].mxu1  ;;  %v210_v24 = vmax.f32 %v204_v17, 0.0  ;;  %v205_v25 = vadd.f32 %v237_v12, %v156_v20  ;;  %v268_v26 = vpop.f32.mrb[3].mxu0 }
  0xfa   :  { %218 = vst [vmem:[%s388_s3 + $0x10] sm:$0xff] %v212_v21  ;;  %v213_v27 = vmax.f32 %v207_v22, 0.0  ;;  %216 = vst [vmem:[%s388_s3] sm:$0xff] %v210_v24  ;;  %v211_v28 = vmax.f32 %v205_v25, 0.0 }
  0xfc   :  { %219 = vst [vmem:[%s388_s3 + $0x18] sm:$0xff] %v213_v27  ;;  %217 = vst [vmem:[%s388_s3 + $0x8] sm:$0xff] %v211_v28 }
  0xfd   :  { %v169_v29 = vpop.f32.mrb[4].mxu1 }
  0xfe   :  { %v208_v30 = vadd.f32 %v237_v12, %v169_v29  ;;  %v275_v31 = vpop.f32.mrb[5].mxu1 }
  0xff   :  { %v172_v32 = vpop.f32.mrb[6].mxu1 }
 0x100   :  { %v214_v33 = vmax.f32 %v208_v30, 0.0  ;;  %v209_v34 = vadd.f32 %v237_v12, %v172_v32  ;;  %v276_v35 = vpop.f32.mrb[7].mxu1 }
 0x102   :  { %220 = vst [vmem:[%s388_s3 + $0x20] sm:$0xff] %v214_v33  ;;  %v215_v36 = vmax.f32 %v209_v34, 0.0 }
 0x104   :  { %221 = vst [vmem:[%s388_s3 + $0x28] sm:$0xff] %v215_v36 }

// kernel: ocr_forward.29
= control target key start
LH: loop header
LB: loop body
LE: loop exit
PB: predicated region body
PF: predicated region fallthrough
CT: control target
= control target key end

     0   :  { %s997_s12 = smov 0   ;;  %s999_s13 = smov 0   ;;  %s1155_s0 = inlined_call_operand.vmem [shape: bf16[56,128], index: 0, kind: input, shape index: {}]   ;;  %s1156_s1 = inlined_call_operand.vmem [shape: bf16[128,512], index: 1, kind: input, shape index: {}]   ;;  %s1157_s2 = inlined_call_operand.vmem [shape: f32[1,512], index: 2, kind: input, shape index: {}]   ;;  %s1158_s3 = inlined_call_operand.vmem [shape: f32[56,512], index: 3, kind: output, shape index: {}]  }
   0x1   :  { %s1001_s14 = smov 0   ;;  %s1003_s15 = smov 0  }
   0x2   :  { %s1005_s16 = smov 0  }
   0x3 LB: > { %s28_s17 = sadd.s32 1, %s970_s15  ;;  %s813_s18 = sadd.s32 4294967295, %s974_s16   ;;  %s974_s16 = sphi %s1005_s16, %s13_s16   ;;  %s970_s15 = sphi %s1003_s15, %s1163_s15   ;;  %s966_s14 = sphi %s1001_s14, %s1162_s14   ;;  %s962_s13 = sphi %s999_s13, %s1161_s13   ;;  %s958_s12 = sphi %s997_s12, %s1160_s12  }
   0x4   : > { %p30_p0 = scmp.ge.s32.totalorder %s28_s17, 2  ;;  %p76_p1 = scmp.ne.s32.totalorder %s962_s13, %s958_s12 }
   0x5   : > { %p77_p2 = scmp.eq.s32.totalorder %s974_s16, 0  ;;  %p134_p4 = scmp.eq.s32.totalorder %s813_s18, 1 }
   0x6   : > { %s1165_s17 = smov (%p30_p0, %s28_s17), 0  ;;  %s69_s20 = sadd.s32 1, %s962_s13 }
   0x7   : > { %p78_p3 = por %p77_p2, %p76_p1  ;;  %s65_s19 = ssub.s32 %s970_s15, %s1165_s17 }
   0x8   : > { %p67_p5 = scmp.eq.s32.totalorder %s65_s19, 0  ;;  %p1032_p6 = por %p134_p4, %p76_p1 }
   0x9   : > { %p817_p7 = scmp.ge.s32.totalorder %s974_s16, 2 }
   0xa   : > { %s1037_s22 = scalar_select %p67_p5, %s962_s13, %s69_s20  }
   0xb   : > { %168 = sbr.rel (%p817_p7) target bundleno = 30 (0x1e), region = 20 }
  0x12   : > { %171 = sbr.rel (!%p78_p3) target bundleno = 30 (0x1e), region = 24  ;;  %s173_s23 = sand.u32 (%p78_p3), 1, %s962_s13  }
  0x13   : > { %s848_s24 = sshll.u32 (%p78_p3), %s970_s15, 3  ;;  %s818_s25 = sshll.u32 (%p78_p3), %s173_s23, 7 }
  0x14   : > { %s1045_s28 = scalar_lea.vmem (%p78_p3), %s1156_s1, %s848_s24  ;;  %s175_s29 = scalar_lea.vmem (%p78_p3), [#allocation3], %s818_s25 }
  0x15   : > { %v239_v0 = vld [vmem:[%s1045_s28] sm:$0xff] (%p78_p3)  ;;  %v241_v1 = vld [vmem:[%s1045_s28 + $0x10] sm:$0xff] (%p78_p3) }
  0x16   : > { %v243_v2 = vld [vmem:[%s1045_s28 + $0x20] sm:$0xff] (%p78_p3)  ;;  %240 = vst [vmem:[%s175_s29] sm:$0xff] (%p78_p3), %v239_v0  ;;  %242 = vst [vmem:[%s175_s29 + $0x8] sm:$0xff] (%p78_p3), %v241_v1  ;;  %v245_v3 = vld [vmem:[%s1045_s28 + $0x30] sm:$0xff] (%p78_p3) }
  0x17   : > { %244 = vst [vmem:[%s175_s29 + $0x10] sm:$0xff] (%p78_p3), %v243_v2  ;;  %v247_v4 = vld [vmem:[%s1045_s28 + $0x40] sm:$0xff] (%p78_p3)  ;;  %v249_v5 = vld [vmem:[%s1045_s28 + $0x50] sm:$0xff] (%p78_p3)  ;;  %246 = vst [vmem:[%s175_s29 + $0x18] sm:$0xff] (%p78_p3), %v245_v3 }
  0x18   : > { %248 = vst [vmem:[%s175_s29 + $0x20] sm:$0xff] (%p78_p3), %v247_v4  ;;  %250 = vst [vmem:[%s175_s29 + $0x28] sm:$0xff] (%p78_p3), %v249_v5  ;;  %v251_v6 = vld [vmem:[%s1045_s28 + $0x60] sm:$0xff] (%p78_p3)  ;;  %v253_v7 = vld [vmem:[%s1045_s28 + $0x70] sm:$0xff] (%p78_p3) }
  0x19   : > { %v255_v8 = vld [vmem:[%s1045_s28 + $0x80] sm:$0xff]  ;;  %252 = vst [vmem:[%s175_s29 + $0x30] sm:$0xff] %v251_v6  ;;  %254 = vst [vmem:[%s175_s29 + $0x38] sm:$0xff] %v253_v7  ;;  %v257_v9 = vld [vmem:[%s1045_s28 + $0x90] sm:$0xff] }
  0x1a   : > { %256 = vst [vmem:[%s175_s29 + $0x40] sm:$0xff] %v255_v8  ;;  %v259_v10 = vld [vmem:[%s1045_s28 + $0xa0] sm:$0xff]  ;;  %v261_v11 = vld [vmem:[%s1045_s28 + $0xb0] sm:$0xff]  ;;  %258 = vst [vmem:[%s175_s29 + $0x48] sm:$0xff] %v257_v9 }
  0x1b   : > { %260 = vst [vmem:[%s175_s29 + $0x50] sm:$0xff] %v259_v10  ;;  %262 = vst [vmem:[%s175_s29 + $0x58] sm:$0xff] %v261_v11  ;;  %v263_v12 = vld [vmem:[%s1045_s28 + $0xc0] sm:$0xff]  ;;  %v265_v13 = vld [vmem:[%s1045_s28 + $0xd0] sm:$0xff] }
  0x1c   : > { %v267_v14 = vld [vmem:[%s1045_s28 + $0xe0] sm:$0xff]  ;;  %264 = vst [vmem:[%s175_s29 + $0x60] sm:$0xff] %v263_v12  ;;  %266 = vst [vmem:[%s175_s29 + $0x68] sm:$0xff] %v265_v13  ;;  %v269_v15 = vld [vmem:[%s1045_s28 + $0xf0] sm:$0xff] }
  0x1d   : > { %268 = vst [vmem:[%s175_s29 + $0x70] sm:$0xff] %v267_v14  ;;  %270 = vst [vmem:[%s175_s29 + $0x78] sm:$0xff] %v269_v15 }
  0x1e PF: > { %p821_p8 = scmp.ge.s32.totalorder %s974_s16, 1  ;;  %p283_p9 = scmp.lt.s32.totalorder %s974_s16, 3 }
  0x20   : > { %p284_p10 = pnand %p821_p8, %p283_p9 }
  0x21   : > { %s290_s30 = sand.u32 (!%p284_p10), 1, %s958_s12   ;;  %v976_v16 = vmov (!%p284_p10), 0   ;;  %v932_v33 = vld [vmem:[%s1155_s0] sm:$0xff] (!%p284_p10)   ;;  %v933_v34 = vld [vmem:[%s1155_s0 + $0x10] sm:$0xff] (!%p284_p10)   ;;  %v934_v35 = vld [vmem:[%s1155_s0 + $0x8] sm:$0xff] (!%p284_p10)   ;;  %s823_s20 = sshll.u32 (!%p284_p10), %s966_s14, 1  ;;  %v618_v37 = vlaneseq (!%p284_p10) }
  0x22   : > { %287 = sbr.rel (%p284_p10) target bundleno = 303 (0x12f), region = 66  ;;  %s822_s4 = sshll.u32 (!%p284_p10), %s290_s30, 7  ;;  %532 = vmatprep.mubr.bf16.mxu0 (!%p284_p10), %v976_v16  ;;  %552 = vmatprep.mubr.bf16.mxu1 (!%p284_p10), %v976_v16  ;;  %v935_v36 = vld [vmem:[%s1155_s0 + $0x18] ss:$0 sps:$4 sm:$0xff] (!%p284_p10)  }
  0x23   : > { %s1068_s5 = scalar_lea.vmem (!%p284_p10), [#allocation3], %s822_s4  ;;  %p336_p11 = scmp.lt.s32.totalorder (!%p284_p10), %s823_s20, 3  ;;  %v619_v38 = vshrl.u32 (!%p284_p10), %v618_v37, 7 }
  0x24   : > { %v908_v17 = vld [vmem:[%s1068_s5 + $0x4] ss:$8 sps:$4 sm:$0xff] (!%p284_p10)   ;;  %v910_v18 = vld [vmem:[%s1068_s5] ss:$8 sps:$4 sm:$0xff] (!%p284_p10)   ;;  %v911_v19 = vld [vmem:[%s1068_s5 + $0x14] ss:$8 sps:$4 sm:$0xff] (!%p284_p10)  }
  0x25   : > { %500 = vmatprep.subr.bf16.mxu0 (!%p284_p10), %v908_v17  ;;  %850 = vmatprep.subr.bf16.mxu1 (!%p284_p10), %v908_v17  ;;  %v913_v20 = vld [vmem:[%s1068_s5 + $0x10] ss:$8 sps:$4 sm:$0xff] (!%p284_p10)   ;;  %v914_v21 = vld [vmem:[%s1068_s5 + $0x24] ss:$8 sps:$4 sm:$0xff] (!%p284_p10)   ;;  %v916_v22 = vld [vmem:[%s1068_s5 + $0x20] ss:$8 sps:$4 sm:$0xff] (!%p284_p10)  }
  0x26   : > { %501 = vmatpush1.bf16.msra.mxu0 (!%p284_p10), %v910_v18  ;;  %858 = vmatpush1.bf16.msra.mxu1 (!%p284_p10), %v910_v18  ;;  %v917_v23 = vld [vmem:[%s1068_s5 + $0x34] ss:$8 sps:$4 sm:$0xff] (!%p284_p10)   ;;  %v919_v24 = vld [vmem:[%s1068_s5 + $0x30] ss:$8 sps:$4 sm:$0xff] (!%p284_p10)   ;;  %v920_v25 = vld [vmem:[%s1068_s5 + $0x44] ss:$8 sps:$4 sm:$0xff] (!%p284_p10)  }
  0x27   : > { %502 = vmatprep.subr.bf16.mxu0 (!%p284_p10), %v911_v19  ;;  %851 = vmatprep.subr.bf16.mxu1 (!%p284_p10), %v911_v19  ;;  %v922_v26 = vld [vmem:[%s1068_s5 + $0x40] ss:$8 sps:$4 sm:$0xff] (!%p284_p10)   ;;  %v923_v27 = vld [vmem:[%s1068_s5 + $0x54] ss:$8 sps:$4 sm:$0xff] (!%p284_p10)   ;;  %v925_v28 = vld [vmem:[%s1068_s5 + $0x50] ss:$8 sps:$4 sm:$0xff] (!%p284_p10)  }
  0x28   : > { %v926_v29 = vld [vmem:[%s1068_s5 + $0x64] ss:$8 sps:$4 sm:$0xff] (!%p284_p10)   ;;  %v928_v30 = vld [vmem:[%s1068_s5 + $0x60] ss:$8 sps:$4 sm:$0xff] (!%p284_p10)   ;;  %v929_v31 = vld [vmem:[%s1068_s5 + $0x74] ss:$8 sps:$4 sm:$0xff] (!%p284_p10)  }
  0x29   : > { %v931_v32 = vld [vmem:[%s1068_s5 + $0x70] ss:$8 sps:$4 sm:$0xff]   ;;  %s1167_s20 = smov (!%p336_p11, %s823_s20), 3  ;;  %v620_v39 = vsub.s32 0, %v619_v38  ;;  %v624_v41 = vsub.s32 1, %v619_v38  ;;  %s866_s26 = smul.u32 112, %s290_s30 }
  0x2a   : > { %503 = vmatpush1.bf16.msra.mxu0 %v913_v20  ;;  %859 = vmatpush1.bf16.msra.mxu1 %v913_v20  ;;  %s338_s25 = scalar_lea.vmem %s1157_s2, %s1167_s20  ;;  %s849_s12 = sshll.u32 (%p1032_p6), %s966_s14, 4 }
  0x2b   : > { %504 = vmatprep.subr.bf16.mxu0 %v914_v21  ;;  %852 = vmatprep.subr.bf16.mxu1 %v914_v21  ;;  %v616_v40 = vld [vmem:[%s338_s25] sm:$0x3]  ;;  %s1104_s27 = scalar_lea.vmem [#allocation4], %s866_s26  ;;  %s668_s30 = scalar_lea.vmem (%p1032_p6), %s1158_s3, %s849_s12 }
  0x2c   : > { %v621_v42 = vrot.slane %v616_v40, %v620_v39  ;;  %v625_v43 = vrot.slane %v616_v40, %v624_v41 }
  0x2e   : > { %505 = vmatpush1.bf16.msra.mxu0 %v916_v22  ;;  %860 = vmatpush1.bf16.msra.mxu1 %v916_v22 }
  0x2f   : > { %506 = vmatprep.subr.bf16.mxu0 %v917_v23  ;;  %853 = vmatprep.subr.bf16.mxu1 %v917_v23 }
  0x32   : > { %507 = vmatpush1.bf16.msra.mxu0 %v919_v24  ;;  %861 = vmatpush1.bf16.msra.mxu1 %v919_v24 }
  0x33   : > { %508 = vmatprep.subr.bf16.mxu0 %v920_v25  ;;  %854 = vmatprep.subr.bf16.mxu1 %v920_v25 }
  0x36   : > { %509 = vmatpush1.bf16.msra.mxu0 %v922_v26  ;;  %862 = vmatpush1.bf16.msra.mxu1 %v922_v26 }
  0x37   : > { %510 = vmatprep.subr.bf16.mxu0 %v923_v27  ;;  %855 = vmatprep.subr.bf16.mxu1 %v923_v27 }
  0x3a   : > { %511 = vmatpush1.bf16.msra.mxu0 %v925_v28  ;;  %863 = vmatpush1.bf16.msra.mxu1 %v925_v28 }
  0x3b   : > { %512 = vmatprep.subr.bf16.mxu0 %v926_v29  ;;  %856 = vmatprep.subr.bf16.mxu1 %v926_v29 }
  0x3e   : > { %513 = vmatpush1.bf16.msra.mxu0 %v928_v30  ;;  %864 = vmatpush1.bf16.msra.mxu1 %v928_v30 }
  0x3f   : > { %514 = vmatprep.subr.bf16.mxu0 %v929_v31  ;;  %857 = vmatprep.subr.bf16.mxu1 %v929_v31 }
  0x42   : > { %515 = vmatpush1.bf16.msra.mxu0 %v931_v32  ;;  %865 = vmatpush1.bf16.msra.mxu1 %v931_v32 }
  0x45   : > { %533 = vmatmul.mubr.bf16.vlgmr.msra.gmra.mrb[0].mxu0 %v932_v33  ;;  %553 = vmatmul.mubr.bf16.vlgmr.msra.gmra.mrb[0].mxu1 %v933_v34 }
  0x46   : > { %542 = vmatprep.mubr.bf16.mxu0 %v976_v16  ;;  %562 = vmatprep.mubr.bf16.mxu1 %v976_v16 }
  0x4d   : > { %543 = vmatmul.mubr.bf16.gmra.mrb[4].mxu0 %v934_v35  ;;  %563 = vmatmul.mubr.bf16.gmra.mrb[4].mxu1 %v935_v36 }
 0x118   : > { %v534_v44 = vpop.f32.mrb[0].mxu0  ;;  %v554_v45 = vpop.f32.mrb[0].mxu1 }
 0x119   : > { %v628_v46 = vadd.f32 %v621_v42, %v534_v44  ;;  %v636_v47 = vadd.f32 %v621_v42, %v554_v45  ;;  %v536_v48 = vpop.f32.mrb[1].mxu0  ;;  %v556_v49 = vpop.f32.mrb[1].mxu1 }
 0x11a   : > { %v629_v50 = vadd.f32 %v625_v43, %v536_v48  ;;  %v637_v51 = vadd.f32 %v625_v43, %v556_v49  ;;  %v538_v52 = vpop.f32.mrb[2].mxu0  ;;  %v558_v53 = vpop.f32.mrb[2].mxu1 }
 0x11b   : > { %642 = vst [vmem:[%s1104_s27] sm:$0xff] %v628_v46  ;;  %650 = vst [vmem:[%s1104_s27 + $0x40] sm:$0xff] %v636_v47  ;;  %v630_v54 = vadd.f32 %v621_v42, %v538_v52  ;;  %v638_v55 = vadd.f32 %v621_v42, %v558_v53  ;;  %v540_v56 = vpop.f32.mrb[3].mxu0  ;;  %v560_v57 = vpop.f32.mrb[3].mxu1 }
 0x11c   : > { %643 = vst [vmem:[%s1104_s27 + $0x8] sm:$0xff] %v629_v50  ;;  %651 = vst [vmem:[%s1104_s27 + $0x48] sm:$0xff] %v637_v51  ;;  %v631_v58 = vadd.f32 %v625_v43, %v540_v56  ;;  %v639_v59 = vadd.f32 %v625_v43, %v560_v57 }
 0x11d   : > { %644 = vst [vmem:[%s1104_s27 + $0x10] sm:$0xff] %v630_v54  ;;  %652 = vst [vmem:[%s1104_s27 + $0x50] sm:$0xff] %v638_v55 }
 0x11e   : > { %645 = vst [vmem:[%s1104_s27 + $0x18] sm:$0xff] %v631_v58  ;;  %653 = vst [vmem:[%s1104_s27 + $0x58] sm:$0xff] %v639_v59 }
 0x120   : > { %v544_v60 = vpop.f32.mrb[4].mxu0  ;;  %v564_v61 = vpop.f32.mrb[4].mxu1  ;;  %662 = sbr.rel (!%p1032_p6) target bundleno = 303 (0x12f), region = 82 }
 0x121   : > { %v632_v62 = vadd.f32 %v621_v42, %v544_v60  ;;  %v640_v63 = vadd.f32 %v621_v42, %v564_v61  ;;  %v546_v0 = vpop.f32.mrb[5].mxu0  ;;  %v566_v1 = vpop.f32.mrb[5].mxu1 }
 0x122   : > { %v633_v2 = vadd.f32 %v625_v43, %v546_v0  ;;  %v641_v3 = vadd.f32 %v625_v43, %v566_v1  ;;  %v548_v4 = vpop.f32.mrb[6].mxu0  ;;  %v568_v5 = vpop.f32.mrb[6].mxu1  ;;  %v681_v10 = vld [vmem:[%s1104_s27] sm:$0xff] (%p1032_p6) }
 0x123   : > { %646 = vst [vmem:[%s1104_s27 + $0x20] sm:$0xff] %v632_v62  ;;  %654 = vst [vmem:[%s1104_s27 + $0x60] sm:$0xff] %v640_v63  ;;  %v634_v6 = vadd.f32 %v621_v42, %v548_v4  ;;  %v550_v7 = vpop.f32.mrb[7].mxu0  ;;  %v569_v8 = vpop.f32.mrb[7].mxu1  ;;  %v683_v11 = vld [vmem:[%s1104_s27 + $0x8] sm:$0xff] (%p1032_p6)  ;;  %v697_v18 = vld [vmem:[%s1104_s27 + $0x40] sm:$0xff] (%p1032_p6) }
 0x124   : > { %647 = vst [vmem:[%s1104_s27 + $0x28] sm:$0xff] %v633_v2  ;;  %655 = vst [vmem:[%s1104_s27 + $0x68] sm:$0xff] %v641_v3  ;;  %v635_v9 = vadd.f32 %v625_v43, %v550_v7  ;;  %v685_v12 = vld [vmem:[%s1104_s27 + $0x10] sm:$0xff] (%p1032_p6)  ;;  %v699_v19 = vld [vmem:[%s1104_s27 + $0x48] sm:$0xff] (%p1032_p6) }
 0x125   : > { %648 = vst [vmem:[%s1104_s27 + $0x30] sm:$0xff] %v634_v6  ;;  %v687_v13 = vld [vmem:[%s1104_s27 + $0x18] sm:$0xff] (%p1032_p6)  ;;  %682 = vst [vmem:[%s668_s30] sm:$0xff] (%p1032_p6), %v681_v10  ;;  %v701_v20 = vld [vmem:[%s1104_s27 + $0x50] sm:$0xff] (%p1032_p6) }
 0x126   : > { %649 = vst [vmem:[%s1104_s27 + $0x38] sm:$0xff] %v635_v9  ;;  %684 = vst [vmem:[%s668_s30 + $0x8] sm:$0xff] (%p1032_p6), %v683_v11  ;;  %v703_v21 = vld [vmem:[%s1104_s27 + $0x58] sm:$0xff] (%p1032_p6) }
 0x127   : > { %686 = vst [vmem:[%s668_s30 + $0x20] sm:$0xff] %v685_v12  ;;  %688 = vst [vmem:[%s668_s30 + $0x28] sm:$0xff] %v687_v13 }
 0x128   : > { %698 = vst [vmem:[%s668_s30 + $0x80] sm:$0xff] %v697_v18  ;;  %700 = vst [vmem:[%s668_s30 + $0x88] sm:$0xff] %v699_v19 }
 0x129   : > { %702 = vst [vmem:[%s668_s30 + $0xa0] sm:$0xff] %v701_v20  ;;  %704 = vst [vmem:[%s668_s30 + $0xa8] sm:$0xff] %v703_v21 }
 0x12a   : > { %v689_v14 = vld [vmem:[%s1104_s27 + $0x20] sm:$0xff] }
 0x12b   : > { %v691_v15 = vld [vmem:[%s1104_s27 + $0x28] sm:$0xff]  ;;  %690 = vst [vmem:[%s668_s30 + $0x40] sm:$0xff] %v689_v14  ;;  %v705_v22 = vld [vmem:[%s1104_s27 + $0x60] sm:$0xff] }
 0x12c   : > { %692 = vst [vmem:[%s668_s30 + $0x48] sm:$0xff] %v691_v15  ;;  %v693_v16 = vld [vmem:[%s1104_s27 + $0x30] sm:$0xff]  ;;  %v707_v23 = vld [vmem:[%s1104_s27 + $0x68] sm:$0xff]  ;;  %706 = vst [vmem:[%s668_s30 + $0xc0] sm:$0xff] %v705_v22 }
 0x12d   : > { %v695_v17 = vld [vmem:[%s1104_s27 + $0x38] sm:$0xff]  ;;  %694 = vst [vmem:[%s668_s30 + $0x60] sm:$0xff] %v693_v16  ;;  %708 = vst [vmem:[%s668_s30 + $0xc8] sm:$0xff] %v707_v23 }
 0x12e   : > { %696 = vst [vmem:[%s668_s30 + $0x68] sm:$0xff] %v695_v17 }
 0x12f PF: > { %s13_s16 = sadd.s32 1, %s974_s16   ;;  %s1160_s12 = smov %s962_s13 }
 0x130   : > { %p10_p12 = scmp.ge.s32.totalorder %s13_s16, 4   ;;  %s1161_s13 = smov %s1037_s22 }
 0x131   : > { %s1162_s14 = smov %s970_s15  ;;  %s1163_s15 = smov %s1165_s17 }
 0x132   :  { %12 = sbr.rel (!%p10_p12) target bundleno = 3 (0x3), region = 142 }

// kernel: ocr_forward.30
= control target key start
LH: loop header
LB: loop body
LE: loop exit
PB: predicated region body
PF: predicated region fallthrough
CT: control target
= control target key end

     0   :  { %s718_s12 = smov 0   ;;  %s843_s0 = inlined_call_operand.vmem [shape: f32[7,8,512], index: 0, kind: input, shape index: {}]   ;;  %s844_s1 = inlined_call_operand.vmem [shape: bf16[128,512], index: 1, kind: input, shape index: {}]   ;;  %s845_s2 = inlined_call_operand.vmem [shape: f32[1,512], index: 2, kind: input, shape index: {}]   ;;  %s846_s3 = inlined_call_operand.vmem [shape: f32[7,8,128], index: 3, kind: output, shape index: {}]  }
   0x1 LB: > { %s567_s13 = sadd.s32 4294967295, %s694_s12   ;;  %p571_p0 = scmp.ge.s32.totalorder %s694_s12, 1  ;;  %s694_s12 = sphi %s718_s12, %s13_s12  }
   0x2   : > { %p137_p1 = scmp.lt.s32.totalorder %s694_s12, 8 }
   0x4   : > { %p138_p2 = pnand %p571_p0, %p137_p1 }
   0x5   : > { %p160_p3 = scmp.lt.s32.totalorder (!%p138_p2), %s567_s13, 6  ;;  %p575_p4 = scmp.ne.s32.totalorder (!%p138_p2), %s567_s13, 0 }
   0x6   : > { %141 = sbr.rel (%p138_p2) target bundleno = 316 (0x13c), region = 32 }
   0xd   : > { %s161_s14 = scalar_select %p160_p3, %s567_s13, 6 }
   0xe   : > { %173 = sbr.rel (%p575_p4) target bundleno = 21 (0x15), region = 36  ;;  %v696_v0 = vmov (!%p575_p4), 0.0  }
   0xf   : > { %s613_s15 = sshll.u32 %s161_s14, 5  ;;  %s574_s16 = sshll.u32 %s161_s14, 3  ;;  %174 = vst [vmem:[#allocation2] sm:$0xff] (!%p575_p4), %v696_v0  ;;  %175 = vst [vmem:[#allocation3] sm:$0xff] (!%p575_p4), %v696_v0 }
  0x10   : > { %s729_s19 = scalar_lea.vmem %s843_s0, %s613_s15  ;;  %s734_s22 = scalar_lea.vmem %s846_s3, %s574_s16 }
  0x15 PF: > { %v624_v1 = vld [vmem:[%s844_s1 + $0x4] ss:$16 sps:$4 sm:$0xff]   ;;  %v626_v2 = vld [vmem:[%s844_s1] ss:$16 sps:$4 sm:$0xff]   ;;  %v697_v3 = vmov 0   ;;  %v462_v36 = vlaneseq  ;;  %v177_v43 = vld [vmem:[%s729_s19 + $0x8] sm:$0xff] }
  0x16   : > { %406 = vmatprep.mubr.bf16.mxu0 %v697_v3  ;;  %447 = vmatprep.mubr.bf16.mxu1 %v697_v3  ;;  %v627_v4 = vld [vmem:[%s844_s1 + $0x24] ss:$16 sps:$4 sm:$0xff]   ;;  %v629_v5 = vld [vmem:[%s844_s1 + $0x20] ss:$16 sps:$4 sm:$0xff]   ;;  %v635_v7 = vld [vmem:[%s844_s1 + $0xc] ss:$16 sps:$4 sm:$0xff]  }
  0x17   : > { %374 = vmatprep.subr.bf16.mxu0 %v624_v1  ;;  %v630_v6 = vld [vmem:[%s844_s1 + $0x44] ss:$16 sps:$4 sm:$0xff]   ;;  %v638_v8 = vld [vmem:[%s844_s1 + $0x8] ss:$16 sps:$4 sm:$0xff]   ;;  %v632_v9 = vld [vmem:[%s844_s1 + $0x40] ss:$16 sps:$4 sm:$0xff]   ;;  %415 = vmatprep.subr.bf16.mxu1 %v635_v7 }
  0x18   : > { %375 = vmatpush1.bf16.msra.mxu0 %v626_v2  ;;  %v633_v10 = vld [vmem:[%s844_s1 + $0x64] ss:$16 sps:$4 sm:$0xff]   ;;  %416 = vmatpush1.bf16.msra.mxu1 %v638_v8  ;;  %v641_v11 = vld [vmem:[%s844_s1 + $0x2c] ss:$16 sps:$4 sm:$0xff]   ;;  %v644_v12 = vld [vmem:[%s844_s1 + $0x28] ss:$16 sps:$4 sm:$0xff]  }
  0x19   : > { %376 = vmatprep.subr.bf16.mxu0 %v627_v4  ;;  %417 = vmatprep.subr.bf16.mxu1 %v641_v11  ;;  %v637_v13 = vld [vmem:[%s844_s1 + $0x60] ss:$16 sps:$4 sm:$0xff]   ;;  %v639_v14 = vld [vmem:[%s844_s1 + $0x84] ss:$16 sps:$4 sm:$0xff]   ;;  %v647_v15 = vld [vmem:[%s844_s1 + $0x4c] ss:$16 sps:$4 sm:$0xff]  }
  0x1a   : > { %v650_v16 = vld [vmem:[%s844_s1 + $0x48] ss:$16 sps:$4 sm:$0xff]   ;;  %v653_v17 = vld [vmem:[%s844_s1 + $0x6c] ss:$16 sps:$4 sm:$0xff]   ;;  %v643_v18 = vld [vmem:[%s844_s1 + $0x80] ss:$16 sps:$4 sm:$0xff]  }
  0x1b   : > { %v645_v19 = vld [vmem:[%s844_s1 + $0xa4] ss:$16 sps:$4 sm:$0xff]   ;;  %v656_v20 = vld [vmem:[%s844_s1 + $0x68] ss:$16 sps:$4 sm:$0xff]   ;;  %v659_v21 = vld [vmem:[%s844_s1 + $0x8c] ss:$16 sps:$4 sm:$0xff]  }
  0x1c   : > { %377 = vmatpush1.bf16.msra.mxu0 %v629_v5  ;;  %418 = vmatpush1.bf16.msra.mxu1 %v644_v12  ;;  %v649_v22 = vld [vmem:[%s844_s1 + $0xa0] ss:$16 sps:$4 sm:$0xff]   ;;  %v651_v23 = vld [vmem:[%s844_s1 + $0xc4] ss:$16 sps:$4 sm:$0xff]   ;;  %v662_v24 = vld [vmem:[%s844_s1 + $0x88] ss:$16 sps:$4 sm:$0xff]  }
  0x1d   : > { %378 = vmatprep.subr.bf16.mxu0 %v630_v6  ;;  %419 = vmatprep.subr.bf16.mxu1 %v647_v15  ;;  %v663_v25 = vld [vmem:[%s844_s1 + $0xac] ss:$16 sps:$4 sm:$0xff]   ;;  %v655_v26 = vld [vmem:[%s844_s1 + $0xc0] ss:$16 sps:$4 sm:$0xff]   ;;  %v657_v27 = vld [vmem:[%s844_s1 + $0xe4] ss:$16 sps:$4 sm:$0xff]  }
  0x1e   : > { %v665_v28 = vld [vmem:[%s844_s1 + $0xa8] ss:$16 sps:$4 sm:$0xff]   ;;  %v666_v29 = vld [vmem:[%s844_s1 + $0xcc] ss:$16 sps:$4 sm:$0xff]   ;;  %v661_v30 = vld [vmem:[%s844_s1 + $0xe0] ss:$16 sps:$4 sm:$0xff]  }
  0x1f   : > { %v180_v31 = vld [vmem:[#allocation2] sm:$0xff]  ;;  %v668_v32 = vld [vmem:[%s844_s1 + $0xc8] ss:$16 sps:$4 sm:$0xff]   ;;  %v669_v33 = vld [vmem:[%s844_s1 + $0xec] ss:$16 sps:$4 sm:$0xff]   ;;  %v463_v37 = vshrl.u32 %v462_v36, 7 }
  0x20   : > { %379 = vmatpush1.bf16.msra.mxu0 %v632_v9  ;;  %420 = vmatpush1.bf16.msra.mxu1 %v650_v16  ;;  %v181_v34 = vpack.c.bf16 %v180_v31, %v180_v31  ;;  %v671_v35 = vld [vmem:[%s844_s1 + $0xe8] ss:$16 sps:$4 sm:$0xff]   ;;  %v460_v39 = vld [vmem:[%s845_s2] sm:$0xf]  ;;  %v178_v61 = vld [vmem:[%s729_s19 + $0x10] sm:$0xff] }
  0x21   : > { %380 = vmatprep.subr.bf16.mxu0 %v633_v10  ;;  %421 = vmatprep.subr.bf16.mxu1 %v653_v17  ;;  %v464_v38 = vsub.s32 0, %v463_v37  ;;  %v468_v40 = vsub.s32 1, %v463_v37  ;;  %v176_v41 = vld [vmem:[%s729_s19] sm:$0xff]  ;;  %v476_v48 = vsub.s32 3, %v463_v37  ;;  %v179_v54 = vld [vmem:[%s729_s19 + $0x18] sm:$0xff]  ;;  %v472_v59 = vsub.s32 2, %v463_v37 }
  0x22   : > { %v505_v12 = vld [vmem:[#allocation3] sm:$0xff] }
  0x23   : > { %v465_v42 = vrot.slane %v460_v39, %v464_v38  ;;  %v469_v45 = vrot.slane %v460_v39, %v468_v40  ;;  %v477_v57 = vrot.slane %v460_v39, %v476_v48  ;;  %v473_v3 = vrot.slane %v460_v39, %v472_v59 }
  0x24   : > { %381 = vmatpush1.bf16.msra.mxu0 %v637_v13  ;;  %422 = vmatpush1.bf16.msra.mxu1 %v656_v20 }
  0x25   : > { %382 = vmatprep.subr.bf16.mxu0 %v639_v14  ;;  %423 = vmatprep.subr.bf16.mxu1 %v659_v21 }
  0x28   : > { %383 = vmatpush1.bf16.msra.mxu0 %v643_v18  ;;  %424 = vmatpush1.bf16.msra.mxu1 %v662_v24 }
  0x29   : > { %384 = vmatprep.subr.bf16.mxu0 %v645_v19  ;;  %425 = vmatprep.subr.bf16.mxu1 %v663_v25 }
  0x2c   : > { %385 = vmatpush1.bf16.msra.mxu0 %v649_v22  ;;  %426 = vmatpush1.bf16.msra.mxu1 %v665_v28 }
  0x2d   : > { %386 = vmatprep.subr.bf16.mxu0 %v651_v23  ;;  %427 = vmatprep.subr.bf16.mxu1 %v666_v29 }
  0x30   : > { %387 = vmatpush1.bf16.msra.mxu0 %v655_v26  ;;  %428 = vmatpush1.bf16.msra.mxu1 %v668_v32 }
  0x31   : > { %388 = vmatprep.subr.bf16.mxu0 %v657_v27  ;;  %429 = vmatprep.subr.bf16.mxu1 %v669_v33 }
  0x34   : > { %389 = vmatpush1.bf16.msra.mxu0 %v661_v30  ;;  %430 = vmatpush1.bf16.msra.mxu1 %v671_v35 }
  0x37   : > { %407 = vmatmul.mubr.bf16.vlgmr.msra.gmra.mrb[0].mxu0 %v181_v34  ;;  %448 = vmatmul.mubr.bf16.vlgmr.msra.gmra.mrb[0].mxu1 %v181_v34 }
 0x10a   : > { %v408_v44 = vpop.f32.mrb[0].mxu0  ;;  %v449_v56 = vpop.f32.mrb[0].mxu1 }
 0x10b   : > { %v456_v46 = vadd.f32 %v408_v44, %v176_v41  ;;  %v410_v47 = vpop.f32.mrb[1].mxu0  ;;  %v451_v60 = vpop.f32.mrb[1].mxu1  ;;  %v458_v2 = vadd.f32 %v449_v56, %v178_v61 }
 0x10c   : > { %v457_v49 = vadd.f32 %v410_v47, %v177_v43  ;;  %v412_v50 = vpop.f32.mrb[2].mxu0  ;;  %v459_v62 = vadd.f32 %v451_v60, %v179_v54  ;;  %v453_v63 = vpop.f32.mrb[2].mxu1 }
 0x10d   : > { %v482_v51 = vadd.f32 %v465_v42, %v456_v46  ;;  %v413_v52 = vpop.f32.mrb[3].mxu0  ;;  %v454_v0 = vpop.f32.mrb[3].mxu1  ;;  %v484_v5 = vadd.f32 %v473_v3, %v458_v2 }
 0x10e   : > { %v483_v53 = vadd.f32 %v469_v45, %v457_v49  ;;  %v485_v1 = vadd.f32 %v477_v57, %v459_v62 }
 0x10f   : > { %v608_v55 = vmul.f32 -1.442695, %v482_v51 }
 0x110   : > { %v609_v58 = vmul.f32 -1.442695, %v483_v53  ;;  %v610_v4 = vmul.f32 -1.442695, %v485_v1 }
 0x111   : > { %672 = vpow2.f32 %v608_v55 }
 0x112   : > { %674 = vpow2.f32 %v609_v58 }
 0x113   : > { %676 = vpow2.f32 %v610_v4 }
 0x114   : > { %678 = vtanh.f32 %v484_v5 }
 0x11b   : > { %v673_v6 = vpop.eup %672 }
 0x11c   : > { %v675_v7 = vpop.eup %674  ;;  %v489_v8 = vadd.f32 1.0, %v673_v6 }
 0x11d   : > { %v495_v9 = vadd.f32 1.0, %v675_v7  ;;  %v677_v10 = vpop.eup %676 }
 0x11e   : > { %680 = vrcp.f32 %v489_v8  ;;  %v679_v11 = vpop.eup %678  ;;  %v502_v14 = vadd.f32 1.0, %v677_v10 }
 0x11f   : > { %682 = vrcp.f32 %v495_v9 }
 0x120   : > { %684 = vrcp.f32 %v502_v14 }
 0x128   : > { %v681_v13 = vpop.eup %680 }
 0x129   : > { %v683_v15 = vpop.eup %682  ;;  %v507_v16 = vmul.f32 %v681_v13, %v679_v11 }
 0x12a   : > { %v506_v17 = vmul.f32 %v683_v15, %v505_v12  ;;  %v685_v19 = vpop.eup %684 }
 0x12c   : > { %v508_v18 = vadd.f32 %v507_v16, %v506_v17 }
 0x12e   : > { %686 = vtanh.f32 %v508_v18  ;;  %511 = vst [vmem:[#allocation3] sm:$0xff] %v508_v18 }
 0x138   : > { %v687_v20 = vpop.eup %686 }
 0x139   : > { %v510_v21 = vmul.f32 %v687_v20, %v685_v19 }
 0x13b   : > { %512 = vst [vmem:[#allocation2] sm:$0xff] %v510_v21  ;;  %513 = vst [vmem:[%s734_s22] sm:$0xff] %v510_v21 }
 0x13c PF: > { %s13_s12 = sadd.s32 1, %s694_s12  }
 0x13d   : > { %p10_p5 = scmp.ge.s32.totalorder %s13_s12, 9  }
 0x13f   :  { %12 = sbr.rel (!%p10_p5) target bundleno = 1 (0x1), region = 66 }

// kernel: ocr_forward.31
= control target key start
LH: loop header
LB: loop body
LE: loop exit
PB: predicated region body
PF: predicated region fallthrough
CT: control target
= control target key end

     0   :  { %s396_s1 = inlined_call_operand.vmem [shape: bf16[128,128], index: 1, kind: input, shape index: {}]   ;;  %s397_s0 = inlined_call_operand.vmem [shape: bf16[56,128], index: 0, kind: input, shape index: {}]   ;;  %s398_s2 = inlined_call_operand.vmem [shape: f32[1,128], index: 2, kind: input, shape index: {}]   ;;  %s399_s3 = inlined_call_operand.vmem [shape: f32[56,128], index: 3, kind: output, shape index: {}]  }
   0x1   :  { %v304_v0 = vld [vmem:[%s396_s1] sm:$0xff]   ;;  %v305_v1 = vld [vmem:[%s396_s1 + $0x8] sm:$0xff]   ;;  %v306_v2 = vld [vmem:[%s396_s1 + $0x10] sm:$0xff]  }
   0x2   :  { %264 = vmatprep.subr.bf16.mxu0 %v304_v0  ;;  %288 = vmatprep.subr.bf16.mxu1 %v304_v0  ;;  %v307_v3 = vld [vmem:[%s396_s1 + $0x18] sm:$0xff]   ;;  %v312_v4 = vld [vmem:[%s397_s0] sm:$0xff]   ;;  %v313_v5 = vld [vmem:[%s397_s0 + $0x10] sm:$0xff]  }
   0x3   :  { %265 = vmatpush3.bf16.msra.mxu0 %v304_v0  ;;  %296 = vmatpush3.bf16.msra.mxu1 %v304_v0  ;;  %v308_v6 = vld [vmem:[%s396_s1 + $0x20] sm:$0xff]   ;;  %v309_v7 = vld [vmem:[%s396_s1 + $0x28] sm:$0xff]   ;;  %v310_v8 = vld [vmem:[%s396_s1 + $0x30] sm:$0xff]  }
   0x4   :  { %266 = vmatprep.subr.bf16.mxu0 %v305_v1  ;;  %289 = vmatprep.subr.bf16.mxu1 %v305_v1  ;;  %v311_v9 = vld [vmem:[%s396_s1 + $0x38] sm:$0xff]   ;;  %v314_v10 = vld [vmem:[%s397_s0 + $0x8] sm:$0xff]   ;;  %v251_v12 = vld [vmem:[%s398_s2] ss:$0 sm:$0xff] }
   0x5   :  { %280 = vmatprep.mubr.bf16.mxu0 %v312_v4  ;;  %284 = vmatprep.mubr.bf16.mxu1 %v313_v5  ;;  %v315_v11 = vld [vmem:[%s397_s0 + $0x18] ss:$0 sps:$4 sm:$0xff]  }
   0x7   :  { %267 = vmatpush3.bf16.msra.mxu0 %v305_v1  ;;  %297 = vmatpush3.bf16.msra.mxu1 %v305_v1 }
   0x8   :  { %268 = vmatprep.subr.bf16.mxu0 %v306_v2  ;;  %290 = vmatprep.subr.bf16.mxu1 %v306_v2 }
   0xb   :  { %269 = vmatpush3.bf16.msra.mxu0 %v306_v2  ;;  %298 = vmatpush3.bf16.msra.mxu1 %v306_v2 }
   0xc   :  { %270 = vmatprep.subr.bf16.mxu0 %v307_v3  ;;  %291 = vmatprep.subr.bf16.mxu1 %v307_v3 }
   0xf   :  { %271 = vmatpush3.bf16.msra.mxu0 %v307_v3  ;;  %299 = vmatpush3.bf16.msra.mxu1 %v307_v3 }
  0x10   :  { %272 = vmatprep.subr.bf16.mxu0 %v308_v6  ;;  %292 = vmatprep.subr.bf16.mxu1 %v308_v6 }
  0x13   :  { %273 = vmatpush3.bf16.msra.mxu0 %v308_v6  ;;  %300 = vmatpush3.bf16.msra.mxu1 %v308_v6 }
  0x14   :  { %274 = vmatprep.subr.bf16.mxu0 %v309_v7  ;;  %293 = vmatprep.subr.bf16.mxu1 %v309_v7 }
  0x17   :  { %275 = vmatpush3.bf16.msra.mxu0 %v309_v7  ;;  %301 = vmatpush3.bf16.msra.mxu1 %v309_v7 }
  0x18   :  { %276 = vmatprep.subr.bf16.mxu0 %v310_v8  ;;  %294 = vmatprep.subr.bf16.mxu1 %v310_v8 }
  0x1b   :  { %277 = vmatpush3.bf16.msra.mxu0 %v310_v8  ;;  %302 = vmatpush3.bf16.msra.mxu1 %v310_v8 }
  0x1c   :  { %278 = vmatprep.subr.bf16.mxu0 %v311_v9  ;;  %295 = vmatprep.subr.bf16.mxu1 %v311_v9 }
  0x1f   :  { %279 = vmatpush3.bf16.msra.mxu0 %v311_v9  ;;  %303 = vmatpush3.bf16.msra.mxu1 %v311_v9 }
  0x22   :  { %281 = vmatmul.mubr.bf16.vlgmr.msra.gmra.mrb[0].mxu0 %v314_v10  ;;  %285 = vmatmul.mubr.bf16.vlgmr.msra.gmra.mrb[0].mxu1 %v315_v11 }
  0xf5   :  { %v282_v13 = vpop.f32.mrb[0].mxu0  ;;  %v286_v14 = vpop.f32.mrb[0].mxu1 }
  0xf6   :  { %v223_v15 = vadd.f32 %v282_v13, %v251_v12  ;;  %v227_v16 = vadd.f32 %v286_v14, %v251_v12  ;;  %v160_v17 = vpop.f32.mrb[1].mxu0  ;;  %v176_v18 = vpop.f32.mrb[1].mxu1 }
  0xf7   :  { %v221_v19 = vadd.f32 %v251_v12, %v160_v17  ;;  %v225_v20 = vadd.f32 %v251_v12, %v176_v18  ;;  %v283_v21 = vpop.f32.mrb[2].mxu0  ;;  %v287_v22 = vpop.f32.mrb[2].mxu1 }
  0xf8   :  { %230 = vst [vmem:[%s399_s3 + $0x10] sm:$0xff] %v223_v15  ;;  %234 = vst [vmem:[%s399_s3 + $0x30] sm:$0xff] %v227_v16  ;;  %v224_v23 = vadd.f32 %v283_v21, %v251_v12  ;;  %v163_v24 = vpop.f32.mrb[3].mxu0  ;;  %v179_v25 = vpop.f32.mrb[3].mxu1 }
  0xf9   :  { %228 = vst [vmem:[%s399_s3] sm:$0xff] %v221_v19  ;;  %232 = vst [vmem:[%s399_s3 + $0x20] sm:$0xff] %v225_v20  ;;  %v222_v26 = vadd.f32 %v251_v12, %v163_v24  ;;  %v226_v27 = vadd.f32 %v251_v12, %v179_v25 }
  0xfa   :  { %231 = vst [vmem:[%s399_s3 + $0x18] sm:$0xff] %v224_v23 }
  0xfb   :  { %229 = vst [vmem:[%s399_s3 + $0x8] sm:$0xff] %v222_v26  ;;  %233 = vst [vmem:[%s399_s3 + $0x28] sm:$0xff] %v226_v27 }

</bundles_post_ra>
